<compile_context>
chip_gen: v7x
topology: tpu7x:2x2x1
jax: 0.10.0
libtpu: 0.0.40
codegen_flags: <defaults>
</compile_context>

<pallas_src>
import functools

import jax
import jax.numpy as jnp
from jax.experimental import pallas as pl
from jax.experimental.pallas import tpu as pltpu


def _crf_neg_score_kernel(logits_ref, tags_ref, trans_ref, out_ref, *,
                          num_tags, use_mxu):
    logits = logits_ref[...].astype(jnp.float32)      # (Bb, T, K)
    tags = tags_ref[...]                               # (Bb, T, 1) int32
    Bb, T, K = logits.shape

    lane_k = jax.lax.broadcasted_iota(jnp.int32, (Bb, T, K), 2)
    row_t = jax.lax.broadcasted_iota(jnp.int32, (Bb, T, 1), 1)

    # Emission: lane-reduce the tag-select of logits -> (Bb, T).
    em_lane = jnp.sum(jnp.where(lane_k == tags, logits, 0.0), axis=2)

    # prev[b, t] = tags[b, t-1]; per-sequence sublane roll along the T axis.
    # The t==0 sentinel (-1) both removes the "transition before first tag"
    # and neutralizes the roll wraparound (prev[b, 0] == tags[b, T-1]).
    prev = pltpu.roll(tags, shift=1, axis=1)
    prev = jnp.where(row_t == 0, -1, prev)              # (Bb, T, 1)

    if use_mxu:
        # MXU path for larger tag sets: one-hot(prev) @ transitions selects
        # the transition row, then the current-tag lane is selected on the VPU.
        trans = trans_ref[...].astype(jnp.float32)                    # (K, K)
        prev_onehot = (lane_k == prev).astype(jnp.float32)            # (Bb,T,K)
        trans_rows = jnp.dot(prev_onehot.reshape(Bb * T, K), trans,
                             preferred_element_type=jnp.float32)
        trans_rows = trans_rows.reshape(Bb, T, K)
        tr_lane = jnp.sum(jnp.where(lane_k == tags, trans_rows, 0.0), axis=2)
    else:
        # Tiny-K VPU path: flat pair-index one-hot select against the
        # (1, K*K) transition row (implicit broadcast inside the select).
        KK = num_tags * num_tags
        trans_flat = trans_ref[...].astype(jnp.float32).reshape(1, 1, KK)
        pair_idx = jnp.where(prev < 0, -1, prev * num_tags + tags)   # (Bb,T,1)
        lane_kk = jax.lax.broadcasted_iota(jnp.int32, (Bb, T, KK), 2)
        tr_lane = jnp.sum(jnp.where(lane_kk == pair_idx, trans_flat, 0.0),
                          axis=2)                                     # (Bb, T)

    # Single sublane reduction over T for the combined score.
    neg_score = -jnp.sum(em_lane + tr_lane, axis=1)                   # (Bb,)
    out_ref[...] = neg_score.reshape(1, Bb)


def _pick_block_b(B):
    # Multiple of 128 (lane-dense score output), capped at 512 sequences per
    # grid step. VMEM stays tiny at T=8, K<=32; re-derive if T/K grow (v7x
    # has 64 MiB VMEM vs 128 MiB on v5e/v6e).
    return int(min(512, 128 * pl.cdiv(max(B, 1), 128)))


def crf_neg_scores(logits, transitions, tags, *, block_b=None):
    """Batched CRF scoring.

    logits: (B, T, K) float (f32 or bf16), transitions: (K, K), tags: (B, T) int
    returns: (B,) f32 negative scores (one per sequence).
    """
    B, T, K = logits.shape
    Bb = _pick_block_b(B) if block_b is None else block_b
    num_blocks = pl.cdiv(B, Bb)
    B_pad = num_blocks * Bb

    tags = tags.astype(jnp.int32)
    if B_pad != B:
        logits = jnp.pad(logits, ((0, B_pad - B), (0, 0), (0, 0)))
        tags = jnp.pad(tags, ((0, B_pad - B), (0, 0)))
    tags3d = tags.reshape(B_pad, T, 1)

    use_mxu = K >= 32
    if use_mxu:
        trans_in = transitions
        trans_spec = pl.BlockSpec((K, K), lambda b: (0, 0))
    else:
        trans_in = transitions.reshape(1, K * K)   # cheap host-side view
        trans_spec = pl.BlockSpec((1, K * K), lambda b: (0, 0))

    kernel = functools.partial(_crf_neg_score_kernel,
                               num_tags=K, use_mxu=use_mxu)

    out = pl.pallas_call(
        kernel,
        out_shape=jax.ShapeDtypeStruct((num_blocks, Bb), jnp.float32),
        grid=(num_blocks,),
        in_specs=[
            pl.BlockSpec((Bb, T, K), lambda b: (b, 0, 0)),
            pl.BlockSpec((Bb, T, 1), lambda b: (b, 0, 0)),
            trans_spec,
        ],
        out_specs=pl.BlockSpec((1, Bb), lambda b: (b, 0)),
        compiler_params=pltpu.CompilerParams(
            dimension_semantics=("parallel",)),
    )(logits, tags3d, trans_in)
    return out.reshape(B_pad)[:B]


def crf_forward(logits, transitions, tags=None):
    """Mirrors CRF.forward for a single sequence: with tags -> -score."""
    if tags is None:
        # TODO(synk): the reference _decode is ill-defined Python (indexes
        # tuples with tag ids / tensors with float scores); no faithful Pallas
        # equivalent exists, so only the scoring path is implemented.
        raise NotImplementedError("decode path not implemented")
    return crf_neg_scores(logits[None], transitions, tags[None])[0]


def _reference_neg_score(logits, transitions, tags):
    score = jnp.sum(logits[jnp.arange(logits.shape[0]), tags])
    score = score + jnp.sum(transitions[tags[:-1], tags[1:]])
    return -score


if __name__ == "__main__":
    key = jax.random.PRNGKey(0)
    keys = jax.random.split(key, 6)

    # Small-K path (VPU flat pair-select): num_tags=5, T=8, B=4.
    num_tags, T, B = 5, 8, 4
    transitions = jax.random.normal(keys[0], (num_tags, num_tags), jnp.float32)
    logits_b = jax.random.normal(keys[1], (B, T, num_tags), jnp.float32)
    tags_b = jax.random.randint(keys[2], (B, T), 0, num_tags, jnp.int32)

    scores = jax.block_until_ready(crf_neg_scores(logits_b, transitions, tags_b))
    ref_scores = jnp.stack(
        [_reference_neg_score(logits_b[b], transitions, tags_b[b])
         for b in range(B)])
    assert jnp.allclose(scores, ref_scores, atol=1e-4, rtol=1e-4), (
        scores, ref_scores)

    # Large-K path (MXU one-hot @ transitions): num_tags=32.
    K2 = 32
    transitions2 = jax.random.normal(keys[3], (K2, K2), jnp.float32)
    logits2 = jax.random.normal(keys[4], (B, T, K2), jnp.float32)
    tags2 = jax.random.randint(keys[5], (B, T), 0, K2, jnp.int32)
    scores2 = jax.block_until_ready(crf_neg_scores(logits2, transitions2, tags2))
    ref2 = jnp.stack(
        [_reference_neg_score(logits2[b], transitions2, tags2[b])
         for b in range(B)])
    assert jnp.allclose(scores2, ref2, atol=1e-4, rtol=1e-4), (scores2, ref2)

    # Single-sequence path (matches the PyTorch module's forward signature).
    out = jax.block_until_ready(crf_forward(logits_b[0], transitions, tags_b[0]))
    ref = _reference_neg_score(logits_b[0], transitions, tags_b[0])
    assert jnp.allclose(out, ref, atol=1e-4, rtol=1e-4), (out, ref)

    print("KERNEL_OK")
</pallas_src>

<mosaic_0001>
module attributes {stable_mosaic.version = 11 : i64} {
  func.func @_crf_neg_score_kernel(%arg0: i32, %arg1: memref<128x8x5xf32, #tpu.memory_space<vmem>>, %arg2: memref<128x8x1xi32, #tpu.memory_space<vmem>>, %arg3: memref<1x25xf32, #tpu.memory_space<vmem>>, %arg4: memref<1x128xf32, #tpu.memory_space<vmem>>) attributes {dimension_semantics = [#tpu.dimension_semantics<parallel>], iteration_bounds = array<i64: 1>, scalar_prefetch = 0 : i64, scratch_operands = 0 : i64, tpu.core_type = #tpu.core_type<tc>, window_params = [{transform_indices = @transform_0, window_bounds = array<i64: 128, 8, 5>}, {transform_indices = @transform_1, window_bounds = array<i64: 128, 8, 1>}, {pipeline_mode = #tpu.pipeline_mode<synchronous>, transform_indices = @transform_2, window_bounds = array<i64: 1, 25>}, {transform_indices = @transform_3, window_bounds = array<i64: 1, 128>}]} {
    %c0 = arith.constant 0 : index
    %c0_0 = arith.constant 0 : index
    %c0_1 = arith.constant 0 : index
    %0 = vector.load %arg1[%c0, %c0_0, %c0_1] : memref<128x8x5xf32, #tpu.memory_space<vmem>>, vector<128x8x5xf32>
    %c0_2 = arith.constant 0 : index
    %c0_3 = arith.constant 0 : index
    %c0_4 = arith.constant 0 : index
    %1 = vector.load %arg2[%c0_2, %c0_3, %c0_4] : memref<128x8x1xi32, #tpu.memory_space<vmem>>, vector<128x8x1xi32>
    %2 = tpu.iota {dimensions = array<i32: 2>} : vector<128x8x5xi32>
    %3 = tpu.iota {dimensions = array<i32: 1>} : vector<128x8x1xi32>
    %4 = vector.broadcast %1 : vector<128x8x1xi32> to vector<128x8x5xi32>
    %5 = arith.cmpi eq, %2, %4 : vector<128x8x5xi32>
    %cst = arith.constant 0.000000e+00 : f32
    %6 = vector.broadcast %cst : f32 to vector<128x8x5xf32>
    %7 = arith.select %5, %0, %6 : vector<128x8x5xi1>, vector<128x8x5xf32>
    %cst_5 = arith.constant dense<0.000000e+00> : vector<128x8xf32>
    %8 = vector.multi_reduction <add>, %7, %cst_5 [2] : vector<128x8x5xf32> to vector<128x8xf32>
    %c1_i32 = arith.constant 1 : i32
    %9 = tpu.dynamic_rotate %1 by %c1_i32 dim 1 : vector<128x8x1xi32>, i32 -> vector<128x8x1xi32>
    %c0_i32 = arith.constant 0 : i32
    %10 = vector.broadcast %c0_i32 : i32 to vector<128x8x1xi32>
    %11 = arith.cmpi eq, %3, %10 : vector<128x8x1xi32>
    %c-1_i32 = arith.constant -1 : i32
    %12 = vector.broadcast %c-1_i32 : i32 to vector<128x8x1xi32>
    %13 = arith.select %11, %12, %9 : vector<128x8x1xi1>, vector<128x8x1xi32>
    %c0_6 = arith.constant 0 : index
    %c0_7 = arith.constant 0 : index
    %14 = vector.load %arg3[%c0_6, %c0_7] : memref<1x25xf32, #tpu.memory_space<vmem>>, vector<1x25xf32>
    %15 = vector.shape_cast %14 : vector<1x25xf32> to vector<1x1x25xf32>
    %c0_i32_8 = arith.constant 0 : i32
    %16 = vector.broadcast %c0_i32_8 : i32 to vector<128x8x1xi32>
    %17 = arith.cmpi slt, %13, %16 : vector<128x8x1xi32>
    %c5_i32 = arith.constant 5 : i32
    %18 = vector.broadcast %c5_i32 : i32 to vector<128x8x1xi32>
    %19 = arith.muli %13, %18 : vector<128x8x1xi32>
    %20 = arith.addi %19, %1 : vector<128x8x1xi32>
    %c-1_i32_9 = arith.constant -1 : i32
    %21 = vector.broadcast %c-1_i32_9 : i32 to vector<128x8x1xi32>
    %22 = arith.select %17, %21, %20 : vector<128x8x1xi1>, vector<128x8x1xi32>
    %23 = tpu.iota {dimensions = array<i32: 2>} : vector<128x8x25xi32>
    %24 = vector.broadcast %22 : vector<128x8x1xi32> to vector<128x8x25xi32>
    %25 = arith.cmpi eq, %23, %24 : vector<128x8x25xi32>
    %cst_10 = arith.constant 0.000000e+00 : f32
    %26 = vector.shape_cast %15 : vector<1x1x25xf32> to vector<1x1x25xf32>
    %27 = vector.broadcast %26 : vector<1x1x25xf32> to vector<128x8x25xf32>
    %28 = vector.broadcast %cst_10 : f32 to vector<128x8x25xf32>
    %29 = arith.select %25, %27, %28 : vector<128x8x25xi1>, vector<128x8x25xf32>
    %cst_11 = arith.constant dense<0.000000e+00> : vector<128x8xf32>
    %30 = vector.multi_reduction <add>, %29, %cst_11 [2] : vector<128x8x25xf32> to vector<128x8xf32>
    %31 = arith.addf %8, %30 : vector<128x8xf32>
    %cst_12 = arith.constant dense<0.000000e+00> : vector<128xf32>
    %32 = vector.multi_reduction <add>, %31, %cst_12 [1] : vector<128x8xf32> to vector<128xf32>
    %cst_13 = arith.constant 0.000000e+00 : f32
    %33 = vector.broadcast %cst_13 : f32 to vector<128xf32>
    %34 = arith.subf %33, %32 : vector<128xf32>
    %35 = vector.shape_cast %34 : vector<128xf32> to vector<1x128xf32>
    %c0_14 = arith.constant 0 : index
    %c0_15 = arith.constant 0 : index
    %36 = vector.load %arg4[%c0_14, %c0_15] : memref<1x128xf32, #tpu.memory_space<vmem>>, vector<1x128xf32>
    tpu.vector_store %arg4[%c0_14, %c0_15], %35 {strides = array<i32>} : memref<1x128xf32, #tpu.memory_space<vmem>>, vector<1x128xf32>,
    return
  }
  func.func @transform_0(%arg0: i32) -> (i32, i32, i32) {
    %c0_i32 = arith.constant 0 : i32
    %c0_i32_0 = arith.constant 0 : i32
    %c0_i32_1 = arith.constant 0 : i32
    return %arg0, %c0_i32, %c0_i32_0 : i32, i32, i32
  }
  func.func @transform_1(%arg0: i32) -> (i32, i32, i32) {
    %c0_i32 = arith.constant 0 : i32
    %c0_i32_0 = arith.constant 0 : i32
    %c0_i32_1 = arith.constant 0 : i32
    return %arg0, %c0_i32, %c0_i32_0 : i32, i32, i32
  }
  func.func @transform_2(%arg0: i32) -> (i32, i32) {
    %c0_i32 = arith.constant 0 : i32
    %c0_i32_0 = arith.constant 0 : i32
    %c0_i32_1 = arith.constant 0 : i32
    return %c0_i32, %c0_i32_0 : i32, i32
  }
  func.func @transform_3(%arg0: i32) -> (i32, i32) {
    %c0_i32 = arith.constant 0 : i32
    %c0_i32_0 = arith.constant 0 : i32
    return %arg0, %c0_i32 : i32, i32
  }
}

</mosaic_0001>

<bundles_post_ra>
// kernel: tpu_custom_call.1
= control target key start
LH: loop header
LB: loop body
LE: loop exit
PB: predicated region body
PF: predicated region fallthrough
CT: control target
= control target key end

     0   :  { %v4368_v2 = vmov 0   ;;  %s8026_s0 = inlined_call_operand.vmem [shape: f32[128,8,5], index: 0, kind: input, shape index: {}]   ;;  %s8027_s1 = inlined_call_operand.vmem [shape: s32[128,8,1], index: 1, kind: input, shape index: {}]   ;;  %s8028_s2 = inlined_call_operand.vmem [shape: f32[1,25], index: 2, kind: input, shape index: {}]   ;;  %s8029_s3 = inlined_call_operand.hbm [shape: f32[1,128], index: 3, kind: output, shape index: {}]  }
   0x1   :  { %v145_v0 = vld [vmem:[%s8027_s1 + $0x10] sm:$0xff]  ;;  %v143_v1 = vld [vmem:[%s8027_s1] sm:$0xff]  ;;  %4214 = vset.pattern.permute.xlu1 %v4368_v2  ;;  %4213 = vset.pattern.permute.xlu0 %v4368_v2  ;;  %v146_v3 = vld [vmem:[%s8027_s1 + $0x18] sm:$0xff] }
   0x2   :  { %282 = vperm.xlu1 %4214, %v145_v0   ;;  %276 = vperm.xlu0 %4213, %v143_v1   ;;  %v144_v4 = vld [vmem:[%s8027_s1 + $0x8] sm:$0xff]  ;;  %v147_v6 = vld [vmem:[%s8027_s1 + $0x20] sm:$0xff]  ;;  %v150_v7 = vld [vmem:[%s8027_s1 + $0x38] sm:$0xff] }
   0x3   :  { %v148_v5 = vld [vmem:[%s8027_s1 + $0x28] sm:$0xff]  ;;  %v149_v8 = vld [vmem:[%s8027_s1 + $0x30] sm:$0xff]  ;;  %v151_v10 = vld [vmem:[%s8027_s1 + $0x40] sm:$0xff] }
   0x4   :  { %v152_v9 = vld [vmem:[%s8027_s1 + $0x48] sm:$0xff]  ;;  %v154_v11 = vld [vmem:[%s8027_s1 + $0x58] sm:$0xff]  ;;  %v153_v12 = vld [vmem:[%s8027_s1 + $0x50] sm:$0xff] }
   0x5   :  { %v156_v13 = vld [vmem:[%s8027_s1 + $0x68] sm:$0xff]  ;;  %v155_v14 = vld [vmem:[%s8027_s1 + $0x60] sm:$0xff]  ;;  %v158_v15 = vld [vmem:[%s8027_s1 + $0x78] sm:$0xff] }
   0x6   :  { %285 = vperm.xlu1 %4214, %v146_v3   ;;  %279 = vperm.xlu0 %4213, %v144_v4   ;;  %v157_v16 = vld [vmem:[%s8027_s1 + $0x70] sm:$0xff]  ;;  %v160_v17 = vld [vmem:[%s8027_s1 + $0x88] sm:$0xff]  ;;  %v159_v18 = vld [vmem:[%s8027_s1 + $0x80] sm:$0xff] }
   0xa   :  { %291 = vperm.xlu1 %4214, %v148_v5   ;;  %288 = vperm.xlu0 %4213, %v147_v6  }
   0xe   :  { %297 = vperm.xlu1 %4214, %v150_v7   ;;  %294 = vperm.xlu0 %4213, %v149_v8  }
  0x12   :  { %303 = vperm.xlu1 %4214, %v152_v9   ;;  %300 = vperm.xlu0 %4213, %v151_v10  }
  0x16   :  { %309 = vperm.xlu1 %4214, %v154_v11   ;;  %306 = vperm.xlu0 %4213, %v153_v12  }
  0x1a   :  { %315 = vperm.xlu1 %4214, %v156_v13   ;;  %312 = vperm.xlu0 %4213, %v155_v14  }
  0x1e   :  { %321 = vperm.xlu1 %4214, %v158_v15   ;;  %318 = vperm.xlu0 %4213, %v157_v16  }
  0x22   :  { %327 = vperm.xlu1 %4214, %v160_v17   ;;  %324 = vperm.xlu0 %4213, %v159_v18  }
  0x23   :  { %8 = vsyncpa [#allocation3], 0  ;;  %v162_v19 = vld [vmem:[%s8027_s1 + $0x98] sm:$0xff]  ;;  %v161_v20 = vld [vmem:[%s8027_s1 + $0x90] sm:$0xff]  ;;  %vm915_vm4 = vcmask 39936  }
  0x24   :  { %v164_v21 = vld [vmem:[%s8027_s1 + $0xa8] sm:$0xff]  ;;  %v163_v22 = vld [vmem:[%s8027_s1 + $0xa0] sm:$0xff]  ;;  %v166_v23 = vld [vmem:[%s8027_s1 + $0xb8] sm:$0xff] }
  0x25   :  { %v165_v24 = vld [vmem:[%s8027_s1 + $0xb0] sm:$0xff]  ;;  %v168_v25 = vld [vmem:[%s8027_s1 + $0xc8] sm:$0xff]  ;;  %v167_v26 = vld [vmem:[%s8027_s1 + $0xc0] sm:$0xff] }
  0x26   :  { %333 = vperm.xlu1 %4214, %v162_v19   ;;  %330 = vperm.xlu0 %4213, %v161_v20   ;;  %v170_v27 = vld [vmem:[%s8027_s1 + $0xd8] sm:$0xff]  ;;  %v169_v28 = vld [vmem:[%s8027_s1 + $0xd0] sm:$0xff]  ;;  %v172_v29 = vld [vmem:[%s8027_s1 + $0xe8] sm:$0xff] }
  0x27   :  { %v171_v30 = vld [vmem:[%s8027_s1 + $0xe0] sm:$0xff]  ;;  %v174_v31 = vld [vmem:[%s8027_s1 + $0xf8] sm:$0xff]  ;;  %v173_v32 = vld [vmem:[%s8027_s1 + $0xf0] sm:$0xff] }
  0x28   :  { %v176_v33 = vld [vmem:[%s8027_s1 + $0x108] sm:$0xff]  ;;  %v175_v34 = vld [vmem:[%s8027_s1 + $0x100] sm:$0xff]  ;;  %v178_v35 = vld [vmem:[%s8027_s1 + $0x118] sm:$0xff] }
  0x29   :  { %v177_v36 = vld [vmem:[%s8027_s1 + $0x110] sm:$0xff]  ;;  %v180_v37 = vld [vmem:[%s8027_s1 + $0x128] sm:$0xff]  ;;  %v179_v38 = vld [vmem:[%s8027_s1 + $0x120] sm:$0xff] }
  0x2a   :  { %339 = vperm.xlu1 %4214, %v164_v21   ;;  %336 = vperm.xlu0 %4213, %v163_v22   ;;  %v182_v39 = vld [vmem:[%s8027_s1 + $0x138] sm:$0xff]  ;;  %v181_v40 = vld [vmem:[%s8027_s1 + $0x130] sm:$0xff]  ;;  %v184_v41 = vld [vmem:[%s8027_s1 + $0x148] sm:$0xff] }
  0x2b   :  { %v183_v42 = vld [vmem:[%s8027_s1 + $0x140] sm:$0xff]  ;;  %v186_v43 = vld [vmem:[%s8027_s1 + $0x158] sm:$0xff]  ;;  %v185_v44 = vld [vmem:[%s8027_s1 + $0x150] sm:$0xff] }
  0x2c   :  { %v188_v45 = vld [vmem:[%s8027_s1 + $0x168] sm:$0xff]  ;;  %v187_v46 = vld [vmem:[%s8027_s1 + $0x160] sm:$0xff]  ;;  %v190_v47 = vld [vmem:[%s8027_s1 + $0x178] sm:$0xff] }
  0x2d   :  { %v189_v48 = vld [vmem:[%s8027_s1 + $0x170] sm:$0xff]  ;;  %v192_v49 = vld [vmem:[%s8027_s1 + $0x188] sm:$0xff]  ;;  %v191_v50 = vld [vmem:[%s8027_s1 + $0x180] sm:$0xff] }
  0x2e   :  { %345 = vperm.xlu1 %4214, %v166_v23   ;;  %342 = vperm.xlu0 %4213, %v165_v24   ;;  %v194_v51 = vld [vmem:[%s8027_s1 + $0x198] sm:$0xff]  ;;  %v193_v52 = vld [vmem:[%s8027_s1 + $0x190] sm:$0xff]  ;;  %v196_v53 = vld [vmem:[%s8027_s1 + $0x1a8] sm:$0xff] }
  0x2f   :  { %v195_v54 = vld [vmem:[%s8027_s1 + $0x1a0] sm:$0xff]  ;;  %v198_v55 = vld [vmem:[%s8027_s1 + $0x1b8] sm:$0xff]  ;;  %v197_v56 = vld [vmem:[%s8027_s1 + $0x1b0] sm:$0xff] }
  0x30   :  { %v200_v57 = vld [vmem:[%s8027_s1 + $0x1c8] sm:$0xff]  ;;  %v199_v58 = vld [vmem:[%s8027_s1 + $0x1c0] sm:$0xff]  ;;  %v202_v59 = vld [vmem:[%s8027_s1 + $0x1d8] sm:$0xff] }
  0x31   :  { %v201_v60 = vld [vmem:[%s8027_s1 + $0x1d0] sm:$0xff]  ;;  %v204_v61 = vld [vmem:[%s8027_s1 + $0x1e8] sm:$0xff]  ;;  %v203_v62 = vld [vmem:[%s8027_s1 + $0x1e0] sm:$0xff] }
  0x32   :  { %351 = vperm.xlu1 %4214, %v168_v25   ;;  %348 = vperm.xlu0 %4213, %v167_v26   ;;  %v206_v63 = vld [vmem:[%s8027_s1 + $0x1f8] sm:$0xff]  ;;  %v205_v0 = vld [vmem:[%s8027_s1 + $0x1f0] sm:$0xff]  ;;  %v208_v1 = vld [vmem:[%s8027_s1 + $0x208] sm:$0xff] }
  0x33   :  { %v207_v2 = vld [vmem:[%s8027_s1 + $0x200] sm:$0xff]  ;;  %v210_v5 = vld [vmem:[%s8027_s1 + $0x218] sm:$0xff]  ;;  %v209_v6 = vld [vmem:[%s8027_s1 + $0x210] sm:$0xff] }
  0x34   :  { %v212_v9 = vld [vmem:[%s8027_s1 + $0x228] sm:$0xff]  ;;  %v211_v10 = vld [vmem:[%s8027_s1 + $0x220] sm:$0xff]  ;;  %v214_v13 = vld [vmem:[%s8027_s1 + $0x238] sm:$0xff] }
  0x35   :  { %v213_v14 = vld [vmem:[%s8027_s1 + $0x230] sm:$0xff]  ;;  %v216_v17 = vld [vmem:[%s8027_s1 + $0x248] sm:$0xff]  ;;  %v215_v18 = vld [vmem:[%s8027_s1 + $0x240] sm:$0xff] }
  0x36   :  { %357 = vperm.xlu1 %4214, %v170_v27   ;;  %354 = vperm.xlu0 %4213, %v169_v28   ;;  %v218_v21 = vld [vmem:[%s8027_s1 + $0x258] sm:$0xff]  ;;  %v217_v22 = vld [vmem:[%s8027_s1 + $0x250] sm:$0xff]  ;;  %v220_v25 = vld [vmem:[%s8027_s1 + $0x268] sm:$0xff] }
  0x37   :  { %v219_v26 = vld [vmem:[%s8027_s1 + $0x260] sm:$0xff] }
  0x3a   :  { %363 = vperm.xlu1 %4214, %v172_v29   ;;  %360 = vperm.xlu0 %4213, %v171_v30   ;;  %v222_v29 = vld [vmem:[%s8027_s1 + $0x278] sm:$0xff]  ;;  %v221_v30 = vld [vmem:[%s8027_s1 + $0x270] sm:$0xff] }
  0x3e   :  { %369 = vperm.xlu1 %4214, %v174_v31   ;;  %366 = vperm.xlu0 %4213, %v173_v32  }
  0x42   :  { %375 = vperm.xlu1 %4214, %v176_v33   ;;  %372 = vperm.xlu0 %4213, %v175_v34   ;;  %v224_v33 = vld [vmem:[%s8027_s1 + $0x288] sm:$0xff]  ;;  %v223_v34 = vld [vmem:[%s8027_s1 + $0x280] sm:$0xff] }
  0x46   :  { %381 = vperm.xlu1 %4214, %v178_v35   ;;  %378 = vperm.xlu0 %4213, %v177_v36  }
  0x4a   :  { %387 = vperm.xlu1 %4214, %v180_v37   ;;  %384 = vperm.xlu0 %4213, %v179_v38   ;;  %v226_v37 = vld [vmem:[%s8027_s1 + $0x298] sm:$0xff]  ;;  %v225_v38 = vld [vmem:[%s8027_s1 + $0x290] sm:$0xff] }
  0x4e   :  { %393 = vperm.xlu1 %4214, %v182_v39   ;;  %390 = vperm.xlu0 %4213, %v181_v40  }
  0x52   :  { %399 = vperm.xlu1 %4214, %v184_v41   ;;  %396 = vperm.xlu0 %4213, %v183_v42   ;;  %v228_v41 = vld [vmem:[%s8027_s1 + $0x2a8] sm:$0xff]  ;;  %v227_v42 = vld [vmem:[%s8027_s1 + $0x2a0] sm:$0xff] }
  0x56   :  { %405 = vperm.xlu1 %4214, %v186_v43   ;;  %402 = vperm.xlu0 %4213, %v185_v44  }
  0x5a   :  { %411 = vperm.xlu1 %4214, %v188_v45   ;;  %408 = vperm.xlu0 %4213, %v187_v46   ;;  %v230_v45 = vld [vmem:[%s8027_s1 + $0x2b8] sm:$0xff]  ;;  %v229_v46 = vld [vmem:[%s8027_s1 + $0x2b0] sm:$0xff] }
  0x5e   :  { %417 = vperm.xlu1 %4214, %v190_v47   ;;  %414 = vperm.xlu0 %4213, %v189_v48  }
  0x62   :  { %423 = vperm.xlu1 %4214, %v192_v49   ;;  %420 = vperm.xlu0 %4213, %v191_v50   ;;  %v232_v49 = vld [vmem:[%s8027_s1 + $0x2c8] sm:$0xff]  ;;  %v231_v50 = vld [vmem:[%s8027_s1 + $0x2c0] sm:$0xff] }
  0x66   :  { %429 = vperm.xlu1 %4214, %v194_v51   ;;  %426 = vperm.xlu0 %4213, %v193_v52  }
  0x6a   :  { %435 = vperm.xlu1 %4214, %v196_v53   ;;  %432 = vperm.xlu0 %4213, %v195_v54   ;;  %v234_v53 = vld [vmem:[%s8027_s1 + $0x2d8] sm:$0xff]  ;;  %v233_v54 = vld [vmem:[%s8027_s1 + $0x2d0] sm:$0xff] }
  0x6e   :  { %441 = vperm.xlu1 %4214, %v198_v55   ;;  %438 = vperm.xlu0 %4213, %v197_v56  }
  0x72   :  { %447 = vperm.xlu1 %4214, %v200_v57   ;;  %444 = vperm.xlu0 %4213, %v199_v58   ;;  %v236_v57 = vld [vmem:[%s8027_s1 + $0x2e8] sm:$0xff]  ;;  %v235_v58 = vld [vmem:[%s8027_s1 + $0x2e0] sm:$0xff] }
  0x76   :  { %453 = vperm.xlu1 %4214, %v202_v59   ;;  %450 = vperm.xlu0 %4213, %v201_v60  }
  0x7a   :  { %459 = vperm.xlu1 %4214, %v204_v61   ;;  %456 = vperm.xlu0 %4213, %v203_v62   ;;  %v238_v61 = vld [vmem:[%s8027_s1 + $0x2f8] sm:$0xff]  ;;  %v237_v62 = vld [vmem:[%s8027_s1 + $0x2f0] sm:$0xff] }
  0x7e   :  { %465 = vperm.xlu1 %4214, %v206_v63   ;;  %462 = vperm.xlu0 %4213, %v205_v0  }
  0x81   :  { %v4588_v3 = vpop.permute.xlu1 %282  ;;  %v4590_v4 = vpop.permute.xlu0 %276 }
  0x82   :  { %471 = vperm.xlu1 %4214, %v208_v1   ;;  %468 = vperm.xlu0 %4213, %v207_v2   ;;  %v240_v1 = vld [vmem:[%s8027_s1 + $0x308] sm:$0xff]  ;;  %v239_v2 = vld [vmem:[%s8027_s1 + $0x300] sm:$0xff] }
  0x85   :  { %v4598_v7 = vpop.permute.xlu1 %285  ;;  %v4600_v8 = vpop.permute.xlu0 %279 }
  0x86   :  { %477 = vperm.xlu1 %4214, %v210_v5   ;;  %474 = vperm.xlu0 %4213, %v209_v6  }
  0x89   :  { %v4608_v11 = vpop.permute.xlu1 %291  ;;  %v4610_v12 = vpop.permute.xlu0 %288 }
  0x8a   :  { %483 = vperm.xlu1 %4214, %v212_v9   ;;  %480 = vperm.xlu0 %4213, %v211_v10   ;;  %v242_v9 = vld [vmem:[%s8027_s1 + $0x318] sm:$0xff]  ;;  %v241_v10 = vld [vmem:[%s8027_s1 + $0x310] sm:$0xff] }
  0x8d   :  { %v4618_v15 = vpop.permute.xlu1 %297  ;;  %v4620_v16 = vpop.permute.xlu0 %294 }
  0x8e   :  { %489 = vperm.xlu1 %4214, %v214_v13   ;;  %486 = vperm.xlu0 %4213, %v213_v14  }
  0x91   :  { %v4628_v19 = vpop.permute.xlu1 %303  ;;  %v4630_v20 = vpop.permute.xlu0 %300 }
  0x92   :  { %495 = vperm.xlu1 %4214, %v216_v17   ;;  %492 = vperm.xlu0 %4213, %v215_v18   ;;  %v244_v17 = vld [vmem:[%s8027_s1 + $0x328] sm:$0xff]  ;;  %v243_v18 = vld [vmem:[%s8027_s1 + $0x320] sm:$0xff] }
  0x95   :  { %v4638_v23 = vpop.permute.xlu1 %309  ;;  %v4640_v24 = vpop.permute.xlu0 %306 }
  0x96   :  { %501 = vperm.xlu1 %4214, %v218_v21   ;;  %498 = vperm.xlu0 %4213, %v217_v22  }
  0x99   :  { %v4648_v27 = vpop.permute.xlu1 %315  ;;  %v4650_v28 = vpop.permute.xlu0 %312 }
  0x9a   :  { %507 = vperm.xlu1 %4214, %v220_v25   ;;  %504 = vperm.xlu0 %4213, %v219_v26   ;;  %v246_v25 = vld [vmem:[%s8027_s1 + $0x338] sm:$0xff]  ;;  %v245_v26 = vld [vmem:[%s8027_s1 + $0x330] sm:$0xff] }
  0x9d   :  { %v4658_v31 = vpop.permute.xlu1 %321  ;;  %v4660_v32 = vpop.permute.xlu0 %318 }
  0x9e   :  { %513 = vperm.xlu1 %4214, %v222_v29   ;;  %510 = vperm.xlu0 %4213, %v221_v30  }
  0xa1   :  { %v4668_v35 = vpop.permute.xlu1 %327  ;;  %v4670_v36 = vpop.permute.xlu0 %324 }
  0xa2   :  { %519 = vperm.xlu1 %4214, %v224_v33   ;;  %516 = vperm.xlu0 %4213, %v223_v34   ;;  %v248_v33 = vld [vmem:[%s8027_s1 + $0x348] sm:$0xff]  ;;  %v247_v34 = vld [vmem:[%s8027_s1 + $0x340] sm:$0xff] }
  0xa5   :  { %v4678_v39 = vpop.permute.xlu1 %333  ;;  %v4680_v40 = vpop.permute.xlu0 %330 }
  0xa6   :  { %525 = vperm.xlu1 %4214, %v226_v37   ;;  %522 = vperm.xlu0 %4213, %v225_v38  }
  0xa9   :  { %v4688_v43 = vpop.permute.xlu1 %339  ;;  %v4690_v44 = vpop.permute.xlu0 %336 }
  0xaa   :  { %531 = vperm.xlu1 %4214, %v228_v41   ;;  %528 = vperm.xlu0 %4213, %v227_v42   ;;  %v250_v41 = vld [vmem:[%s8027_s1 + $0x358] sm:$0xff]  ;;  %v249_v42 = vld [vmem:[%s8027_s1 + $0x350] sm:$0xff] }
  0xad   :  { %v4698_v47 = vpop.permute.xlu1 %345  ;;  %v4700_v48 = vpop.permute.xlu0 %342 }
  0xae   :  { %537 = vperm.xlu1 %4214, %v230_v45   ;;  %534 = vperm.xlu0 %4213, %v229_v46  }
  0xb1   :  { %v4708_v51 = vpop.permute.xlu1 %351  ;;  %v4710_v52 = vpop.permute.xlu0 %348 }
  0xb2   :  { %543 = vperm.xlu1 %4214, %v232_v49   ;;  %540 = vperm.xlu0 %4213, %v231_v50   ;;  %v252_v49 = vld [vmem:[%s8027_s1 + $0x368] sm:$0xff]  ;;  %v251_v50 = vld [vmem:[%s8027_s1 + $0x360] sm:$0xff] }
  0xb5   :  { %v4718_v55 = vpop.permute.xlu1 %357  ;;  %v4720_v56 = vpop.permute.xlu0 %354 }
  0xb6   :  { %549 = vperm.xlu1 %4214, %v234_v53   ;;  %546 = vperm.xlu0 %4213, %v233_v54  }
  0xb9   :  { %v4728_v59 = vpop.permute.xlu1 %363  ;;  %v4730_v60 = vpop.permute.xlu0 %360 }
  0xba   :  { %555 = vperm.xlu1 %4214, %v236_v57   ;;  %552 = vperm.xlu0 %4213, %v235_v58   ;;  %v254_v57 = vld [vmem:[%s8027_s1 + $0x378] sm:$0xff]  ;;  %v253_v58 = vld [vmem:[%s8027_s1 + $0x370] sm:$0xff] }
  0xbd   :  { %v4738_v63 = vpop.permute.xlu1 %369  ;;  %v4740_v0 = vpop.permute.xlu0 %366 }
  0xbe   :  { %561 = vperm.xlu1 %4214, %v238_v61   ;;  %558 = vperm.xlu0 %4213, %v237_v62  }
  0xc1   :  { %v4748_v5 = vpop.permute.xlu1 %375  ;;  %v4750_v6 = vpop.permute.xlu0 %372 }
  0xc2   :  { %567 = vperm.xlu1 %4214, %v240_v1   ;;  %564 = vperm.xlu0 %4213, %v239_v2   ;;  %v256_v1 = vld [vmem:[%s8027_s1 + $0x388] sm:$0xff]  ;;  %v255_v2 = vld [vmem:[%s8027_s1 + $0x380] sm:$0xff] }
  0xc5   :  { %v4758_v13 = vpop.permute.xlu1 %381  ;;  %v4760_v14 = vpop.permute.xlu0 %378 }
  0xc6   :  { %573 = vperm.xlu1 %4214, %v242_v9   ;;  %570 = vperm.xlu0 %4213, %v241_v10  }
  0xc9   :  { %v4768_v21 = vpop.permute.xlu1 %387  ;;  %v4770_v22 = vpop.permute.xlu0 %384 }
  0xca   :  { %579 = vperm.xlu1 %4214, %v244_v17   ;;  %576 = vperm.xlu0 %4213, %v243_v18   ;;  %v258_v17 = vld [vmem:[%s8027_s1 + $0x398] sm:$0xff]  ;;  %v257_v18 = vld [vmem:[%s8027_s1 + $0x390] sm:$0xff] }
  0xcd   :  { %v4778_v29 = vpop.permute.xlu1 %393  ;;  %v4780_v30 = vpop.permute.xlu0 %390 }
  0xce   :  { %585 = vperm.xlu1 %4214, %v246_v25   ;;  %582 = vperm.xlu0 %4213, %v245_v26  }
  0xd1   :  { %v4788_v37 = vpop.permute.xlu1 %399  ;;  %v4790_v38 = vpop.permute.xlu0 %396 }
  0xd2   :  { %591 = vperm.xlu1 %4214, %v248_v33   ;;  %588 = vperm.xlu0 %4213, %v247_v34   ;;  %v260_v33 = vld [vmem:[%s8027_s1 + $0x3a8] sm:$0xff]  ;;  %v259_v34 = vld [vmem:[%s8027_s1 + $0x3a0] sm:$0xff] }
  0xd5   :  { %v4798_v45 = vpop.permute.xlu1 %405  ;;  %v4800_v46 = vpop.permute.xlu0 %402 }
  0xd6   :  { %597 = vperm.xlu1 %4214, %v250_v41   ;;  %594 = vperm.xlu0 %4213, %v249_v42  }
  0xd9   :  { %v4808_v53 = vpop.permute.xlu1 %411  ;;  %v4810_v54 = vpop.permute.xlu0 %408 }
  0xda   :  { %603 = vperm.xlu1 %4214, %v252_v49   ;;  %600 = vperm.xlu0 %4213, %v251_v50   ;;  %v262_v49 = vld [vmem:[%s8027_s1 + $0x3b8] sm:$0xff]  ;;  %v261_v50 = vld [vmem:[%s8027_s1 + $0x3b0] sm:$0xff] }
  0xdd   :  { %v4818_v61 = vpop.permute.xlu1 %417  ;;  %v4820_v62 = vpop.permute.xlu0 %414 }
  0xde   :  { %609 = vperm.xlu1 %4214, %v254_v57   ;;  %606 = vperm.xlu0 %4213, %v253_v58  }
  0xe1   :  { %v4828_v9 = vpop.permute.xlu1 %423  ;;  %v4830_v10 = vpop.permute.xlu0 %420 }
  0xe2   :  { %615 = vperm.xlu1 %4214, %v256_v1   ;;  %612 = vperm.xlu0 %4213, %v255_v2   ;;  %v264_v1 = vld [vmem:[%s8027_s1 + $0x3c8] sm:$0xff]  ;;  %v263_v2 = vld [vmem:[%s8027_s1 + $0x3c0] sm:$0xff] }
  0xe5   :  { %v4838_v25 = vpop.permute.xlu1 %429  ;;  %v4840_v26 = vpop.permute.xlu0 %426 }
  0xe6   :  { %8031 = vst [vmem:[#allocation5_spill] sm:$0xff] %v4838_v25  ;;  %621 = vperm.xlu1 %4214, %v258_v17   ;;  %618 = vperm.xlu0 %4213, %v257_v18  }
  0xe9   :  { %v4848_v41 = vpop.permute.xlu1 %435  ;;  %v4850_v42 = vpop.permute.xlu0 %432 }
  0xea   :  { %8032 = vst [vmem:[#allocation6_spill] sm:$0xff] %v4848_v41  ;;  %627 = vperm.xlu1 %4214, %v260_v33   ;;  %624 = vperm.xlu0 %4213, %v259_v34   ;;  %v266_v33 = vld [vmem:[%s8027_s1 + $0x3d8] sm:$0xff]  ;;  %v265_v34 = vld [vmem:[%s8027_s1 + $0x3d0] sm:$0xff] }
  0xed   :  { %v4858_v57 = vpop.permute.xlu1 %441  ;;  %v4860_v58 = vpop.permute.xlu0 %438 }
  0xee   :  { %8033 = vst [vmem:[#allocation7_spill] sm:$0xff] %v4858_v57  ;;  %8034 = vst [vmem:[#allocation8_spill] sm:$0xff] %v4860_v58  ;;  %633 = vperm.xlu1 %4214, %v262_v49   ;;  %630 = vperm.xlu0 %4213, %v261_v50   ;;  %v8030_v58 = vlaneseq }
  0xf1   :  { %v4868_v17 = vpop.permute.xlu1 %447  ;;  %v4870_v18 = vpop.permute.xlu0 %444 }
  0xf2   :  { %8035 = vst [vmem:[#allocation9_spill] sm:$0xff] %v4868_v17  ;;  %8036 = vst [vmem:[#allocation10_spill] sm:$0xff] %v4870_v18  ;;  %639 = vperm.xlu1 %4214, %v264_v1   ;;  %636 = vperm.xlu0 %4213, %v263_v2   ;;  %v268_v17 = vld [vmem:[%s8027_s1 + $0x3e8] sm:$0xff]  ;;  %v267_v1 = vld [vmem:[%s8027_s1 + $0x3e0] sm:$0xff] }
  0xf5   :  { %v4878_v49 = vpop.permute.xlu1 %453  ;;  %v4880_v50 = vpop.permute.xlu0 %450 }
  0xf6   :  { %8037 = vst [vmem:[#allocation11_spill] sm:$0xff] %v4878_v49  ;;  %8038 = vst [vmem:[#allocation12_spill] sm:$0xff] %v4880_v50  ;;  %645 = vperm.xlu1 %4214, %v266_v33   ;;  %642 = vperm.xlu0 %4213, %v265_v34   ;;  %v269_v49 = vld [vmem:[%s8027_s1 + $0x3f0] sm:$0xff] }
  0xf9   :  { %v4888_v2 = vpop.permute.xlu1 %459  ;;  %v4890_v57 = vpop.permute.xlu0 %456 }
  0xfa   :  { %8039 = vst [vmem:[#allocation13_spill] sm:$0xff] %v4888_v2  ;;  %8040 = vst [vmem:[#allocation14_spill] sm:$0xff] %v4890_v57  ;;  %651 = vperm.xlu1 %4214, %v268_v17   ;;  %648 = vperm.xlu0 %4213, %v267_v1  }
  0xfd   :  { %v4895_v33 = vpop.permute.xlu1 %465  ;;  %v4897_v34 = vpop.permute.xlu0 %462 }
  0xfe   :  { %8041 = vst [vmem:[#allocation15_spill] sm:$0xff] %v4895_v33  ;;  %654 = vperm.xlu0 %4213, %v269_v49   ;;  %v4918_v49 = vand.u32 127, %v8030_v58 }
 0x100   :  { %vm659_vm0 = vcmp.eq.s32.totalorder %v4918_v49, %v4590_v4  ;;  %vm660_vm1 = vcmp.eq.s32.totalorder %v4918_v49, %v4600_v8  ;;  %vm661_vm2 = vcmp.eq.s32.totalorder %v4918_v49, %v4588_v3  ;;  %vm663_vm3 = vcmp.eq.s32.totalorder %v4918_v49, %v4610_v12  ;;  %v19_v8 = vld [vmem:[%s8026_s0 + $0x20] sm:$0xff] }
 0x101   :  { %v4899_v50 = vpop.permute.xlu1 %471  ;;  %v4901_v18 = vpop.permute.xlu0 %468  ;;  %vm662_vm5 = vcmp.eq.s32.totalorder %v4918_v49, %v4598_v7  ;;  %v791_v12 = vsel %vm663_vm3, %v19_v8, 0.0  ;;  %vm665_vm6 = vcmp.eq.s32.totalorder %v4918_v49, %v4620_v16  ;;  %vm664_vm7 = vcmp.eq.s32.totalorder %v4918_v49, %v4608_v11  ;;  %v20_v8 = vld [vmem:[%s8026_s0 + $0x28] sm:$0xff] }
 0x102   :  { %8042 = vst [vmem:[#allocation16_spill] sm:$0xff] %v4899_v50  ;;  %v928_v7 = vsel %vm915_vm4, %v791_v12, 0.0  ;;  %vm667_vm8 = vcmp.eq.s32.totalorder %v4918_v49, %v4630_v20  ;;  %v792_v12 = vsel %vm664_vm7, %v20_v8, 0.0  ;;  %vm666_vm9 = vcmp.eq.s32.totalorder %v4918_v49, %v4618_v15  ;;  %v22_v20 = vld [vmem:[%s8026_s0 + $0x38] sm:$0xff] }
 0x103   :  { %vm669_vm10 = vcmp.eq.s32.totalorder %v4918_v49, %v4640_v24  ;;  %vm668_vm11 = vcmp.eq.s32.totalorder %v4918_v49, %v4628_v19  ;;  %v24_v24 = vld [vmem:[%s8026_s0 + $0x48] sm:$0xff]  ;;  %vm671_vm12 = vcmp.eq.s32.totalorder %v4918_v49, %v4650_v28  ;;  %vm670_vm13 = vcmp.eq.s32.totalorder %v4918_v49, %v4638_v23 }
 0x104   :  { %vm673_vm14 = vcmp.eq.s32.totalorder %v4918_v49, %v4660_v32  ;;  %vm672_vm15 = vcmp.eq.s32.totalorder %v4918_v49, %v4648_v27  ;;  %v28_v32 = vld [vmem:[%s8026_s0 + $0x68] sm:$0xff]  ;;  %vm676_vm3 = vcmp.eq.s32.totalorder %v4918_v49, %v4668_v35  ;;  %vm681_vm7 = vcmp.eq.s32.totalorder %v4918_v49, %v4700_v48 }
 0x105   :  { %v4903_v41 = vpop.permute.xlu1 %477  ;;  %v4905_v2 = vpop.permute.xlu0 %474  ;;  %v36_v48 = vld [vmem:[%s8026_s0 + $0xa8] sm:$0xff] }
 0x106   :  { %8043 = vst [vmem:[#allocation17_spill] sm:$0xff] %v4903_v41  ;;  %v18_v41 = vld [vmem:[%s8026_s0 + $0x18] sm:$0xff] }
 0x109   :  { %v4907_v57 = vpop.permute.xlu1 %483  ;;  %v4909_v17 = vpop.permute.xlu0 %480 }
 0x10a   :  { %8044 = vst [vmem:[#allocation18_spill] sm:$0xff] %v4907_v57  ;;  %v15_v57 = vld [vmem:[%s8026_s0] sm:$0xff] }
 0x10d   :  { %v4911_v1 = vpop.permute.xlu1 %489  ;;  %v4915_v33 = vpop.permute.xlu0 %486 }
 0x10e   :  { %8045 = vst [vmem:[#allocation19_spill] sm:$0xff] %v4911_v1  ;;  %8047 = vst [vmem:[#allocation21_spill] sm:$0xff] %v4915_v33  ;;  %v787_v33 = vsel %vm659_vm0, %v15_v57, 0.0  ;;  %vm675_vm0 = vcmp.eq.s32.totalorder %v4918_v49, %v4670_v36  ;;  %v30_v36 = vld [vmem:[%s8026_s0 + $0x78] sm:$0xff] }
 0x111   :  { %v4913_v25 = vpop.permute.xlu1 %495  ;;  %v4932_v1 = vpop.permute.xlu0 %492 }
 0x112   :  { %8046 = vst [vmem:[#allocation20_spill] sm:$0xff] %v4913_v25  ;;  %v16_v25 = vld [vmem:[%s8026_s0 + $0x8] sm:$0xff]  ;;  %8049 = vst [vmem:[#allocation23_spill] sm:$0xff] %v4932_v1  ;;  %v916_v1 = vsel %vm915_vm4, %v787_v33, 0.0  ;;  %v21_v33 = vld [vmem:[%s8026_s0 + $0x30] sm:$0xff] }
 0x113   :  { %v788_v4 = vsel %vm660_vm1, %v16_v25, 0.0  ;;  %vm674_vm1 = vcmp.eq.s32.totalorder %v4918_v49, %v4658_v31 }
 0x114   :  { %v919_v3 = vsel %vm915_vm4, %v788_v4, 0.0  ;;  %v793_v4 = vsel %vm665_vm6, %v21_v33, 0.0  ;;  %vm678_vm6 = vcmp.eq.s32.totalorder %v4918_v49, %v4678_v39 }
 0x115   :  { %v4920_v50 = vpop.permute.xlu1 %501  ;;  %v4952_v57 = vpop.permute.xlu0 %498  ;;  %v934_v11 = vsel %vm915_vm4, %v793_v4, 0.0  ;;  %v794_v4 = vsel %vm666_vm9, %v22_v20, 0.0  ;;  %v26_v20 = vld [vmem:[%s8026_s0 + $0x58] sm:$0xff]  ;;  %vm683_vm9 = vcmp.eq.s32.totalorder %v4918_v49, %v4710_v52 }
 0x116   :  { %8048 = vst [vmem:[#allocation22_spill] sm:$0xff] %v4920_v50  ;;  %v17_v50 = vld [vmem:[%s8026_s0 + $0x10] sm:$0xff] }
 0x117   :  { %v789_v25 = vsel %vm661_vm2, %v17_v50, 0.0  ;;  %vm677_vm2 = vcmp.eq.s32.totalorder %v4918_v49, %v4680_v40 }
 0x118   :  { %v922_v50 = vsel %vm915_vm4, %v789_v25, 0.0 }
 0x119   :  { %v4934_v58 = vpop.permute.xlu1 %507  ;;  %v4976_v25 = vpop.permute.xlu0 %504 }
 0x11a   :  { %8050 = vst [vmem:[#allocation24_spill] sm:$0xff] %v4934_v58 }
 0x11d   :  { %v4947_v58 = vpop.permute.xlu1 %513  ;;  %917 = vadd.xlane.f32.xlu0 %v916_v1  ;;  %v790_v1 = vsel %vm662_vm5, %v18_v41, 0.0  ;;  %v4996_v8 = vpop.permute.xlu0 %510  ;;  %vm679_vm5 = vcmp.eq.s32.totalorder %v4918_v49, %v4690_v44  ;;  %v34_v44 = vld [vmem:[%s8026_s0 + $0x98] sm:$0xff] }
 0x11e   :  { %920 = vadd.xlane.f32.xlu1 %v919_v3  ;;  %v23_v3 = vld [vmem:[%s8026_s0 + $0x40] sm:$0xff]  ;;  %v925_v41 = vsel %vm915_vm4, %v790_v1, 0.0 }
 0x11f   :  { %v795_v33 = vsel %vm667_vm8, %v23_v3, 0.0  ;;  %vm680_vm8 = vcmp.eq.s32.totalorder %v4918_v49, %v4688_v43 }
 0x120   :  { %v940_v15 = vsel %vm915_vm4, %v795_v33, 0.0 }
 0x121   :  { %923 = vadd.xlane.f32.xlu0 %v922_v50  ;;  %v4971_v16 = vpop.permute.xlu1 %519  ;;  %v25_v50 = vld [vmem:[%s8026_s0 + $0x50] sm:$0xff] }
 0x122   :  { %929 = vadd.xlane.f32.xlu1 %v928_v7  ;;  %v931_v7 = vsel %vm915_vm4, %v792_v12, 0.0  ;;  %v797_v3 = vsel %vm669_vm10, %v25_v50, 0.0  ;;  %v796_v12 = vsel %vm668_vm11, %v24_v24, 0.0  ;;  %v29_v50 = vld [vmem:[%s8026_s0 + $0x70] sm:$0xff]  ;;  %v31_v24 = vld [vmem:[%s8026_s0 + $0x80] sm:$0xff]  ;;  %vm682_vm10 = vcmp.eq.s32.totalorder %v4918_v49, %v4698_v47 }
 0x123   :  { %v946_v19 = vsel %vm915_vm4, %v797_v3, 0.0  ;;  %v801_v3 = vsel %vm673_vm14, %v29_v50, 0.0  ;;  %vm685_vm11 = vcmp.eq.s32.totalorder %v4918_v49, %v4720_v56  ;;  %v40_v56 = vld [vmem:[%s8026_s0 + $0xc8] sm:$0xff]  ;;  %vm686_vm14 = vcmp.eq.s32.totalorder %v4918_v49, %v4718_v55 }
 0x124   :  { %v958_v27 = vsel %vm915_vm4, %v801_v3, 0.0  ;;  %v35_v3 = vld [vmem:[%s8026_s0 + $0xa0] sm:$0xff] }
 0x125   :  { %926 = vadd.xlane.f32.xlu0 %v925_v41  ;;  %v4991_v1 = vpop.permute.xlu1 %525  ;;  %v27_v41 = vld [vmem:[%s8026_s0 + $0x60] sm:$0xff] }
 0x126   :  { %935 = vadd.xlane.f32.xlu1 %v934_v11  ;;  %v937_v11 = vsel %vm915_vm4, %v794_v4, 0.0  ;;  %v799_v33 = vsel %vm671_vm12, %v27_v41, 0.0  ;;  %v798_v4 = vsel %vm670_vm13, %v26_v20, 0.0  ;;  %v33_v20 = vld [vmem:[%s8026_s0 + $0x90] sm:$0xff]  ;;  %vm684_vm12 = vcmp.eq.s32.totalorder %v4918_v49, %v4708_v51 }
 0x127   :  { %v952_v23 = vsel %vm915_vm4, %v799_v33, 0.0  ;;  %v949_v41 = vsel %vm915_vm4, %v798_v4, 0.0  ;;  %v803_v33 = vsel %vm675_vm0, %v31_v24, 0.0  ;;  %v32_v4 = vld [vmem:[%s8026_s0 + $0x88] sm:$0xff]  ;;  %vm687_vm13 = vcmp.eq.s32.totalorder %v4918_v49, %v4730_v60  ;;  %v42_v60 = vld [vmem:[%s8026_s0 + $0xd8] sm:$0xff] }
 0x128   :  { %v964_v31 = vsel %vm915_vm4, %v803_v33, 0.0  ;;  %vm688_vm0 = vcmp.eq.s32.totalorder %v4918_v49, %v4728_v59 }
 0x129   :  { %932 = vadd.xlane.f32.xlu0 %v931_v7  ;;  %v5015_v28 = vpop.permute.xlu1 %531  ;;  %v5020_v7 = vpop.permute.xlu0 %516 }
 0x12a   :  { %941 = vadd.xlane.f32.xlu1 %v940_v15  ;;  %v943_v15 = vsel %vm915_vm4, %v796_v12, 0.0 }
 0x12d   :  { %938 = vadd.xlane.f32.xlu0 %v937_v11  ;;  %v5035_v11 = vpop.permute.xlu1 %537  ;;  %v5040_v12 = vpop.permute.xlu0 %522 }
 0x12e   :  { %947 = vadd.xlane.f32.xlu1 %v946_v19  ;;  %v800_v19 = vsel %vm672_vm15, %v28_v32, 0.0  ;;  %vm689_vm15 = vcmp.eq.s32.totalorder %v4918_v49, %v4740_v0 }
 0x12f   :  { %v955_v50 = vsel %vm915_vm4, %v800_v19, 0.0  ;;  %v37_v19 = vld [vmem:[%s8026_s0 + $0xb0] sm:$0xff] }
 0x131   :  { %944 = vadd.xlane.f32.xlu0 %v943_v15  ;;  %v802_v15 = vsel %vm674_vm1, %v30_v36, 0.0  ;;  %v5059_v40 = vpop.permute.xlu1 %543  ;;  %v5064_v32 = vpop.permute.xlu0 %528  ;;  %vm691_vm1 = vcmp.eq.s32.totalorder %v4918_v49, %v4750_v6  ;;  %v46_v6 = vld [vmem:[%s8026_s0 + $0xf8] sm:$0xff] }
 0x132   :  { %953 = vadd.xlane.f32.xlu1 %v952_v23  ;;  %v805_v23 = vsel %vm677_vm2, %v33_v20, 0.0  ;;  %v961_v24 = vsel %vm915_vm4, %v802_v15, 0.0  ;;  %v806_v20 = vsel %vm678_vm6, %v34_v44, 0.0  ;;  %v39_v15 = vld [vmem:[%s8026_s0 + $0xc0] sm:$0xff]  ;;  %vm690_vm2 = vcmp.eq.s32.totalorder %v4918_v49, %v4738_v63 }
 0x133   :  { %v970_v35 = vsel %vm915_vm4, %v805_v23, 0.0  ;;  %v973_v23 = vsel %vm915_vm4, %v806_v20, 0.0  ;;  %vm695_vm6 = vcmp.eq.s32.totalorder %v4918_v49, %v4770_v22 }
 0x135   :  { %950 = vadd.xlane.f32.xlu0 %v949_v41  ;;  %v804_v41 = vsel %vm676_vm3, %v32_v4, 0.0  ;;  %v5079_v36 = vpop.permute.xlu1 %549  ;;  %v808_v4 = vsel %vm680_vm8, %v36_v48, 0.0  ;;  %vm693_vm3 = vcmp.eq.s32.totalorder %v4918_v49, %v4760_v14  ;;  %v48_v14 = vld [vmem:[%s8026_s0 + $0x108] sm:$0xff]  ;;  %vm697_vm8 = vcmp.eq.s32.totalorder %v4918_v49, %v4780_v30 }
 0x136   :  { %959 = vadd.xlane.f32.xlu1 %v958_v27  ;;  %v807_v27 = vsel %vm679_vm5, %v35_v3, 0.0  ;;  %v967_v33 = vsel %vm915_vm4, %v804_v41, 0.0  ;;  %v811_v3 = vsel %vm683_vm9, %v39_v15, 0.0  ;;  %vm692_vm5 = vcmp.eq.s32.totalorder %v4918_v49, %v4748_v5  ;;  %v52_v30 = vld [vmem:[%s8026_s0 + $0x128] sm:$0xff] }
 0x137   :  { %v976_v39 = vsel %vm915_vm4, %v807_v27, 0.0  ;;  %v979_v27 = vsel %vm915_vm4, %v808_v4, 0.0  ;;  %v988_v47 = vsel %vm915_vm4, %v811_v3, 0.0  ;;  %v814_v4 = vsel %vm686_vm14, %v42_v60, 0.0  ;;  %v51_v60 = vld [vmem:[%s8026_s0 + $0x120] sm:$0xff] }
 0x138   :  { %vm696_vm9 = vcmp.eq.s32.totalorder %v4918_v49, %v4768_v21  ;;  %vm703_vm14 = vcmp.eq.s32.totalorder %v4918_v49, %v4810_v54  ;;  %v58_v54 = vld [vmem:[%s8026_s0 + $0x158] sm:$0xff] }
 0x139   :  { %956 = vadd.xlane.f32.xlu0 %v955_v50  ;;  %v5084_v50 = vpop.permute.xlu0 %534  ;;  %v5103_v52 = vpop.permute.xlu1 %555 }
 0x13a   :  { %965 = vadd.xlane.f32.xlu1 %v964_v31  ;;  %v809_v31 = vsel %vm681_vm7, %v37_v19, 0.0  ;;  %vm694_vm7 = vcmp.eq.s32.totalorder %v4918_v49, %v4758_v13 }
 0x13b   :  { %v982_v43 = vsel %vm915_vm4, %v809_v31, 0.0  ;;  %v812_v31 = vsel %vm684_vm12, %v40_v56, 0.0  ;;  %v49_v56 = vld [vmem:[%s8026_s0 + $0x110] sm:$0xff]  ;;  %vm701_vm12 = vcmp.eq.s32.totalorder %v4918_v49, %v4800_v46 }
 0x13d   :  { %962 = vadd.xlane.f32.xlu0 %v961_v24  ;;  %v38_v24 = vld [vmem:[%s8026_s0 + $0xb8] sm:$0xff]  ;;  %v5108_v41 = vpop.permute.xlu0 %540  ;;  %v5123_v20 = vpop.permute.xlu1 %561 }
 0x13e   :  { %971 = vadd.xlane.f32.xlu1 %v970_v35  ;;  %v41_v35 = vld [vmem:[%s8026_s0 + $0xd0] sm:$0xff]  ;;  %v810_v44 = vsel %vm682_vm10, %v38_v24, 0.0  ;;  %v44_v24 = vld [vmem:[%s8026_s0 + $0xe8] sm:$0xff]  ;;  %vm699_vm10 = vcmp.eq.s32.totalorder %v4918_v49, %v4790_v38  ;;  %v54_v38 = vld [vmem:[%s8026_s0 + $0x138] sm:$0xff] }
 0x13f   :  { %v813_v19 = vsel %vm685_vm11, %v41_v35, 0.0  ;;  %v47_v35 = vld [vmem:[%s8026_s0 + $0x100] sm:$0xff]  ;;  %vm698_vm11 = vcmp.eq.s32.totalorder %v4918_v49, %v4778_v29 }
 0x140   :  { %v994_v51 = vsel %vm915_vm4, %v813_v19, 0.0  ;;  %v819_v19 = vsel %vm691_vm1, %v47_v35, 0.0  ;;  %vm704_vm1 = vcmp.eq.s32.totalorder %v4918_v49, %v4808_v53 }
 0x141   :  { %968 = vadd.xlane.f32.xlu0 %v967_v33  ;;  %v43_v33 = vld [vmem:[%s8026_s0 + $0xe0] sm:$0xff]  ;;  %v5128_v48 = vpop.permute.xlu0 %546  ;;  %v5147_v0 = vpop.permute.xlu1 %567  ;;  %v1012_v63 = vsel %vm915_vm4, %v819_v19, 0.0 }
 0x142   :  { %977 = vadd.xlane.f32.xlu1 %v976_v39  ;;  %v985_v39 = vsel %vm915_vm4, %v810_v44, 0.0  ;;  %v815_v15 = vsel %vm687_vm13, %v43_v33, 0.0  ;;  %v816_v44 = vsel %vm688_vm0, %v44_v24, 0.0  ;;  %vm700_vm13 = vcmp.eq.s32.totalorder %v4918_v49, %v4788_v37 }
 0x143   :  { %v1000_v55 = vsel %vm915_vm4, %v815_v15, 0.0  ;;  %v1003_v33 = vsel %vm915_vm4, %v816_v44, 0.0  ;;  %v821_v15 = vsel %vm693_vm3, %v49_v56, 0.0  ;;  %v55_v44 = vld [vmem:[%s8026_s0 + $0x140] sm:$0xff]  ;;  %v824_v56 = vsel %vm696_vm9, %v52_v30, 0.0 }
 0x144   :  { %v1018_v5 = vsel %vm915_vm4, %v821_v15, 0.0  ;;  %v1027_v15 = vsel %vm915_vm4, %v824_v56, 0.0  ;;  %vm705_vm0 = vcmp.eq.s32.totalorder %v4918_v49, %v4820_v62  ;;  %v60_v62 = vld [vmem:[%s8026_s0 + $0x168] sm:$0xff]  ;;  %vm706_vm3 = vcmp.eq.s32.totalorder %v4918_v49, %v4818_v61 }
 0x145   :  { %974 = vadd.xlane.f32.xlu0 %v973_v23  ;;  %v45_v23 = vld [vmem:[%s8026_s0 + $0xf0] sm:$0xff]  ;;  %v832_v56 = vsel %vm704_vm1, %v60_v62, 0.0  ;;  %vm721_vm1 = vcmp.eq.s32.totalorder %v4918_v49, %v4897_v34  ;;  %v76_v34 = vld [vmem:[%s8026_s0 + $0x1e8] sm:$0xff] }
 0x146   :  { %983 = vadd.xlane.f32.xlu1 %v982_v43  ;;  %v991_v43 = vsel %vm915_vm4, %v812_v31, 0.0  ;;  %v817_v3 = vsel %vm689_vm15, %v45_v23, 0.0  ;;  %vm702_vm15 = vcmp.eq.s32.totalorder %v4918_v49, %v4798_v45  ;;  %v8053_v62 = vld [vmem:[#allocation6_spill] sm:$0xff] }
 0x147   :  { %v1006_v59 = vsel %vm915_vm4, %v817_v3, 0.0  ;;  %v53_v3 = vld [vmem:[%s8026_s0 + $0x130] sm:$0xff] }
 0x149   :  { %980 = vadd.xlane.f32.xlu0 %v979_v27  ;;  %v5152_v27 = vpop.permute.xlu0 %552 }
 0x14a   :  { %989 = vadd.xlane.f32.xlu1 %v988_v47  ;;  %v997_v47 = vsel %vm915_vm4, %v814_v4, 0.0  ;;  %v50_v4 = vld [vmem:[%s8026_s0 + $0x118] sm:$0xff] }
 0x14d   :  { %986 = vadd.xlane.f32.xlu0 %v985_v39  ;;  %v5167_v39 = vpop.permute.xlu1 %573  ;;  %v5172_v31 = vpop.permute.xlu0 %558 }
 0x14e   :  { %995 = vadd.xlane.f32.xlu1 %v994_v51  ;;  %v818_v51 = vsel %vm690_vm2, %v46_v6, 0.0  ;;  %vm707_vm2 = vcmp.eq.s32.totalorder %v4918_v49, %v4830_v10 }
 0x14f   :  { %v1009_v23 = vsel %vm915_vm4, %v818_v51, 0.0  ;;  %v57_v51 = vld [vmem:[%s8026_s0 + $0x150] sm:$0xff] }
 0x151   :  { %992 = vadd.xlane.f32.xlu0 %v991_v43  ;;  %v820_v43 = vsel %vm692_vm5, %v48_v14, 0.0  ;;  %v5191_v22 = vpop.permute.xlu1 %579  ;;  %v5196_v24 = vpop.permute.xlu0 %564  ;;  %v826_v14 = vsel %vm698_vm11, %v54_v38, 0.0  ;;  %v62_v38 = vld [vmem:[%s8026_s0 + $0x178] sm:$0xff]  ;;  %vm709_vm5 = vcmp.eq.s32.totalorder %v4918_v49, %v4840_v26  ;;  %v64_v26 = vld [vmem:[%s8026_s0 + $0x188] sm:$0xff] }
 0x152   :  { %1001 = vadd.xlane.f32.xlu1 %v1000_v55  ;;  %v823_v55 = vsel %vm695_vm6, %v51_v60, 0.0  ;;  %v1015_v35 = vsel %vm915_vm4, %v820_v43, 0.0  ;;  %v829_v60 = vsel %vm701_vm12, %v57_v51, 0.0  ;;  %v65_v51 = vld [vmem:[%s8026_s0 + $0x190] sm:$0xff]  ;;  %vm708_vm6 = vcmp.eq.s32.totalorder %v4918_v49, %v4828_v9 }
 0x153   :  { %v1024_v13 = vsel %vm915_vm4, %v823_v55, 0.0  ;;  %v1033_v55 = vsel %vm915_vm4, %v826_v14, 0.0  ;;  %v1042_v37 = vsel %vm915_vm4, %v829_v60, 0.0  ;;  %v834_v14 = vsel %vm706_vm3, %v62_v38, 0.0 }
 0x154   :  { %v837_v60 = vsel %vm709_vm5, %v65_v51, 0.0  ;;  %vm723_vm3 = vcmp.eq.s32.totalorder %v4918_v49, %v4901_v18  ;;  %v78_v18 = vld [vmem:[%s8026_s0 + $0x1f8] sm:$0xff] }
 0x155   :  { %998 = vadd.xlane.f32.xlu0 %v997_v47  ;;  %v822_v47 = vsel %vm694_vm7, %v50_v4, 0.0  ;;  %v5211_v6 = vpop.permute.xlu1 %585  ;;  %vm711_vm7 = vcmp.eq.s32.totalorder %v4918_v49, %v4850_v42  ;;  %v1066_v9 = vsel %vm915_vm4, %v837_v60, 0.0  ;;  %v66_v42 = vld [vmem:[%s8026_s0 + $0x198] sm:$0xff] }
 0x156   :  { %1007 = vadd.xlane.f32.xlu1 %v1006_v59  ;;  %v825_v59 = vsel %vm697_vm8, %v53_v3, 0.0  ;;  %v1021_v19 = vsel %vm915_vm4, %v822_v47, 0.0 }
 0x157   :  { %v1030_v21 = vsel %vm915_vm4, %v825_v59, 0.0  ;;  %v830_v59 = vsel %vm702_vm15, %v58_v54, 0.0 }
 0x159   :  { %1004 = vadd.xlane.f32.xlu0 %v1003_v33  ;;  %v5216_v33 = vpop.permute.xlu0 %570  ;;  %v5235_v46 = vpop.permute.xlu1 %591 }
 0x15a   :  { %1013 = vadd.xlane.f32.xlu1 %v1012_v63  ;;  %v827_v63 = vsel %vm699_vm10, %v55_v44, 0.0  ;;  %vm712_vm10 = vcmp.eq.s32.totalorder %v4918_v49, %v8053_v62 }
 0x15b   :  { %v1036_v29 = vsel %vm915_vm4, %v827_v63, 0.0 }
 0x15d   :  { %1010 = vadd.xlane.f32.xlu0 %v1009_v23  ;;  %v56_v23 = vld [vmem:[%s8026_s0 + $0x148] sm:$0xff]  ;;  %v5240_v43 = vpop.permute.xlu0 %576  ;;  %v5255_v47 = vpop.permute.xlu1 %597 }
 0x15e   :  { %1019 = vadd.xlane.f32.xlu1 %v1018_v5  ;;  %v59_v5 = vld [vmem:[%s8026_s0 + $0x160] sm:$0xff]  ;;  %v828_v4 = vsel %vm700_vm13, %v56_v23, 0.0 }
 0x15f   :  { %v831_v3 = vsel %vm703_vm14, %v59_v5, 0.0  ;;  %v67_v23 = vld [vmem:[%s8026_s0 + $0x1a0] sm:$0xff]  ;;  %v1057_v5 = vsel %vm915_vm4, %v834_v14, 0.0  ;;  %v8055_v14 = vld [vmem:[#allocation7_spill] sm:$0xff] }
 0x160   :  { %v1048_v45 = vsel %vm915_vm4, %v831_v3, 0.0  ;;  %v839_v54 = vsel %vm711_vm7, %v67_v23, 0.0  ;;  %vm714_vm12 = vcmp.eq.s32.totalorder %v4918_v49, %v8055_v14  ;;  %v8056_v23 = vld [vmem:[#allocation12_spill] sm:$0xff] }
 0x161   :  { %1016 = vadd.xlane.f32.xlu0 %v1015_v35  ;;  %v61_v35 = vld [vmem:[%s8026_s0 + $0x170] sm:$0xff]  ;;  %v5260_v30 = vpop.permute.xlu0 %582  ;;  %v5279_v10 = vpop.permute.xlu1 %603  ;;  %vm717_vm13 = vcmp.eq.s32.totalorder %v4918_v49, %v8056_v23 }
 0x162   :  { %1025 = vadd.xlane.f32.xlu1 %v1024_v13  ;;  %v1039_v13 = vsel %vm915_vm4, %v828_v4, 0.0  ;;  %v833_v44 = vsel %vm705_vm0, %v61_v35, 0.0  ;;  %v8051_v4 = vld [vmem:[#allocation5_spill] sm:$0xff]  ;;  %v8052_v35 = vld [vmem:[#allocation8_spill] sm:$0xff] }
 0x163   :  { %v1054_v53 = vsel %vm915_vm4, %v833_v44, 0.0  ;;  %vm710_vm8 = vcmp.eq.s32.totalorder %v4918_v49, %v8051_v4  ;;  %vm713_vm9 = vcmp.eq.s32.totalorder %v4918_v49, %v8052_v35 }
 0x164   :  { %v838_v44 = vsel %vm710_vm8, %v66_v42, 0.0  ;;  %v8057_v42 = vld [vmem:[#allocation9_spill] sm:$0xff]  ;;  %vm727_vm8 = vcmp.eq.s32.totalorder %v4918_v49, %v4909_v17  ;;  %v82_v17 = vld [vmem:[%s8026_s0 + $0x218] sm:$0xff] }
 0x165   :  { %1022 = vadd.xlane.f32.xlu0 %v1021_v19  ;;  %v63_v19 = vld [vmem:[%s8026_s0 + $0x180] sm:$0xff]  ;;  %v1069_v51 = vsel %vm915_vm4, %v838_v44, 0.0  ;;  %vm716_vm14 = vcmp.eq.s32.totalorder %v4918_v49, %v8057_v42 }
 0x166   :  { %1031 = vadd.xlane.f32.xlu1 %v1030_v21  ;;  %v1045_v21 = vsel %vm915_vm4, %v830_v59, 0.0  ;;  %v835_v63 = vsel %vm707_vm2, %v63_v19, 0.0  ;;  %v1072_v59 = vsel %vm915_vm4, %v839_v54, 0.0  ;;  %v75_v44 = vld [vmem:[%s8026_s0 + $0x1e0] sm:$0xff] }
 0x167   :  { %v1060_v61 = vsel %vm915_vm4, %v835_v63, 0.0  ;;  %v71_v63 = vld [vmem:[%s8026_s0 + $0x1c0] sm:$0xff] }
 0x169   :  { %1028 = vadd.xlane.f32.xlu0 %v1027_v15  ;;  %v5284_v15 = vpop.permute.xlu0 %588 }
 0x16a   :  { %1037 = vadd.xlane.f32.xlu1 %v1036_v29  ;;  %v1051_v29 = vsel %vm915_vm4, %v832_v56, 0.0 }
 0x16d   :  { %1034 = vadd.xlane.f32.xlu0 %v1033_v55  ;;  %v5299_v55 = vpop.permute.xlu1 %609  ;;  %v5304_v3 = vpop.permute.xlu0 %594 }
 0x16e   :  { %1043 = vadd.xlane.f32.xlu1 %v1042_v37  ;;  %v836_v37 = vsel %vm708_vm6, %v64_v26, 0.0  ;;  %v70_v26 = vld [vmem:[%s8026_s0 + $0x1b8] sm:$0xff]  ;;  %vm725_vm6 = vcmp.eq.s32.totalorder %v4918_v49, %v4905_v2 }
 0x16f   :  { %v842_v54 = vsel %vm714_vm12, %v70_v26, 0.0 }
 0x170   :  { %v1081_v62 = vsel %vm915_vm4, %v842_v54, 0.0 }
 0x171   :  { %1040 = vadd.xlane.f32.xlu0 %v1039_v13  ;;  %v69_v13 = vld [vmem:[%s8026_s0 + $0x1b0] sm:$0xff]  ;;  %v5323_v56 = vpop.permute.xlu1 %615  ;;  %v5328_v38 = vpop.permute.xlu0 %600 }
 0x172   :  { %1049 = vadd.xlane.f32.xlu1 %v1048_v45  ;;  %v1063_v45 = vsel %vm915_vm4, %v836_v37, 0.0  ;;  %v841_v19 = vsel %vm713_vm9, %v69_v13, 0.0 }
 0x175   :  { %1046 = vadd.xlane.f32.xlu0 %v1045_v21  ;;  %v68_v21 = vld [vmem:[%s8026_s0 + $0x1a8] sm:$0xff]  ;;  %v5343_v37 = vpop.permute.xlu1 %621  ;;  %v5348_v35 = vpop.permute.xlu0 %606 }
 0x176   :  { %1055 = vadd.xlane.f32.xlu1 %v1054_v53  ;;  %v8054_v53 = vld [vmem:[#allocation10_spill] sm:$0xff] }
 0x177   :  { %vm715_vm11 = vcmp.eq.s32.totalorder %v4918_v49, %v8054_v53  ;;  %v8059_v53 = vld [vmem:[#allocation11_spill] sm:$0xff] }
 0x178   :  { %v843_v60 = vsel %vm715_vm11, %v71_v63, 0.0  ;;  %vm718_vm0 = vcmp.eq.s32.totalorder %v4918_v49, %v8059_v53 }
 0x179   :  { %1052 = vadd.xlane.f32.xlu0 %v1051_v29  ;;  %v1078_v29 = vsel %vm915_vm4, %v841_v19, 0.0  ;;  %v1084_v4 = vsel %vm915_vm4, %v843_v60, 0.0  ;;  %v5372_v14 = vpop.permute.xlu0 %612 }
 0x17a   :  { %1061 = vadd.xlane.f32.xlu1 %v1060_v61  ;;  %v840_v61 = vsel %vm712_vm10, %v68_v21, 0.0 }
 0x17d   :  { %1058 = vadd.xlane.f32.xlu0 %v1057_v5  ;;  %v73_v5 = vld [vmem:[%s8026_s0 + $0x1d0] sm:$0xff] }
 0x17e   :  { %1067 = vadd.xlane.f32.xlu1 %v1066_v9  ;;  %v1075_v9 = vsel %vm915_vm4, %v840_v61, 0.0  ;;  %v845_v13 = vsel %vm717_vm13, %v73_v5, 0.0  ;;  %v77_v61 = vld [vmem:[%s8026_s0 + $0x1f0] sm:$0xff]  ;;  %v8060_v5 = vld [vmem:[#allocation13_spill] sm:$0xff] }
 0x17f   :  { %v1090_v19 = vsel %vm915_vm4, %v845_v13, 0.0  ;;  %vm720_vm2 = vcmp.eq.s32.totalorder %v4918_v49, %v8060_v5 }
 0x181   :  { %1064 = vadd.xlane.f32.xlu0 %v1063_v45  ;;  %v72_v45 = vld [vmem:[%s8026_s0 + $0x1c8] sm:$0xff] }
 0x182   :  { %1073 = vadd.xlane.f32.xlu1 %v1072_v59  ;;  %v8058_v59 = vld [vmem:[#allocation14_spill] sm:$0xff]  ;;  %v844_v21 = vsel %vm716_vm14, %v72_v45, 0.0  ;;  %v848_v45 = vsel %vm720_vm2, %v76_v34, 0.0  ;;  %vm733_vm14 = vcmp.eq.s32.totalorder %v4918_v49, %v4952_v57  ;;  %vm737_vm2 = vcmp.eq.s32.totalorder %v4918_v49, %v4996_v8 }
 0x183   :  { %vm719_vm15 = vcmp.eq.s32.totalorder %v4918_v49, %v8058_v59  ;;  %v1087_v60 = vsel %vm915_vm4, %v844_v21, 0.0  ;;  %v8061_v59 = vld [vmem:[#allocation15_spill] sm:$0xff]  ;;  %v1099_v21 = vsel %vm915_vm4, %v848_v45, 0.0  ;;  %v88_v57 = vld [vmem:[%s8026_s0 + $0x248] sm:$0xff] }
 0x184   :  { %v847_v63 = vsel %vm719_vm15, %v75_v44, 0.0  ;;  %vm722_vm5 = vcmp.eq.s32.totalorder %v4918_v49, %v8061_v59  ;;  %v5392_v44 = vpop.permute.xlu0 %618  ;;  %v85_v45 = vld [vmem:[%s8026_s0 + $0x230] sm:$0xff]  ;;  %v92_v8 = vld [vmem:[%s8026_s0 + $0x268] sm:$0xff] }
 0x185   :  { %1070 = vadd.xlane.f32.xlu0 %v1069_v51  ;;  %v74_v51 = vld [vmem:[%s8026_s0 + $0x1d8] sm:$0xff]  ;;  %v1096_v26 = vsel %vm915_vm4, %v847_v63, 0.0  ;;  %v850_v63 = vsel %vm722_vm5, %v78_v18, 0.0  ;;  %vm739_vm5 = vcmp.eq.s32.totalorder %v4918_v49, %v5020_v7 }
 0x186   :  { %1079 = vadd.xlane.f32.xlu1 %v1078_v29  ;;  %v5367_v29 = vpop.permute.xlu1 %627  ;;  %v846_v23 = vsel %vm718_vm0, %v74_v51, 0.0  ;;  %v8062_v51 = vld [vmem:[#allocation16_spill] sm:$0xff]  ;;  %v1105_v5 = vsel %vm915_vm4, %v850_v63, 0.0  ;;  %vm735_vm0 = vcmp.eq.s32.totalorder %v4918_v49, %v4976_v25 }
 0x187   :  { %v1093_v54 = vsel %vm915_vm4, %v846_v23, 0.0  ;;  %vm724_vm7 = vcmp.eq.s32.totalorder %v4918_v49, %v8062_v51  ;;  %v84_v51 = vld [vmem:[%s8026_s0 + $0x228] sm:$0xff]  ;;  %v90_v25 = vld [vmem:[%s8026_s0 + $0x258] sm:$0xff] }
 0x188   :  { %v5416_v23 = vpop.permute.xlu0 %624  ;;  %v94_v7 = vld [vmem:[%s8026_s0 + $0x278] sm:$0xff] }
 0x189   :  { %1076 = vadd.xlane.f32.xlu0 %v1075_v9  ;;  %v849_v9 = vsel %vm721_vm1, %v77_v61, 0.0 }
 0x18a   :  { %1085 = vadd.xlane.f32.xlu1 %v1084_v4  ;;  %v79_v4 = vld [vmem:[%s8026_s0 + $0x200] sm:$0xff]  ;;  %v5387_v42 = vpop.permute.xlu1 %633  ;;  %v1102_v13 = vsel %vm915_vm4, %v849_v9, 0.0 }
 0x18d   :  { %1082 = vadd.xlane.f32.xlu0 %v1081_v62  ;;  %v851_v62 = vsel %vm723_vm3, %v79_v4, 0.0  ;;  %v8063_v4 = vld [vmem:[#allocation17_spill] sm:$0xff] }
 0x18e   :  { %1091 = vadd.xlane.f32.xlu1 %v1090_v19  ;;  %v81_v19 = vld [vmem:[%s8026_s0 + $0x210] sm:$0xff]  ;;  %v1108_v53 = vsel %vm915_vm4, %v851_v62, 0.0  ;;  %v5411_v2 = vpop.permute.xlu1 %639  ;;  %vm726_vm9 = vcmp.eq.s32.totalorder %v4918_v49, %v8063_v4 }
 0x18f   :  { %v853_v61 = vsel %vm725_vm6, %v81_v19, 0.0  ;;  %v854_v19 = vsel %vm726_vm9, %v82_v17, 0.0  ;;  %vm738_vm6 = vcmp.eq.s32.totalorder %v4918_v49, %v4947_v58  ;;  %vm743_vm9 = vcmp.eq.s32.totalorder %v4918_v49, %v5064_v32  ;;  %v98_v32 = vld [vmem:[%s8026_s0 + $0x298] sm:$0xff] }
 0x190   :  { %v1114_v9 = vsel %vm915_vm4, %v853_v61, 0.0  ;;  %v8066_v61 = vld [vmem:[#allocation23_spill] sm:$0xff] }
 0x191   :  { %1088 = vadd.xlane.f32.xlu0 %v1087_v60  ;;  %v80_v60 = vld [vmem:[%s8026_s0 + $0x208] sm:$0xff]  ;;  %vm731_vm12 = vcmp.eq.s32.totalorder %v4918_v49, %v8066_v61  ;;  %v91_v61 = vld [vmem:[%s8026_s0 + $0x260] sm:$0xff] }
 0x192   :  { %1097 = vadd.xlane.f32.xlu1 %v1096_v26  ;;  %v83_v26 = vld [vmem:[%s8026_s0 + $0x220] sm:$0xff]  ;;  %v852_v34 = vsel %vm724_vm7, %v80_v60, 0.0  ;;  %v5431_v62 = vpop.permute.xlu1 %645  ;;  %vm741_vm7 = vcmp.eq.s32.totalorder %v4918_v49, %v5040_v12  ;;  %v96_v12 = vld [vmem:[%s8026_s0 + $0x288] sm:$0xff] }
 0x193   :  { %v1111_v59 = vsel %vm915_vm4, %v852_v34, 0.0  ;;  %v87_v60 = vld [vmem:[%s8026_s0 + $0x240] sm:$0xff]  ;;  %v8067_v34 = vld [vmem:[#allocation19_spill] sm:$0xff] }
 0x194   :  { %vm730_vm13 = vcmp.eq.s32.totalorder %v4918_v49, %v8067_v34  ;;  %v859_v4 = vsel %vm731_vm12, %v87_v60, 0.0  ;;  %vm744_vm12 = vcmp.eq.s32.totalorder %v4918_v49, %v5015_v28 }
 0x195   :  { %1094 = vadd.xlane.f32.xlu0 %v1093_v54  ;;  %v855_v54 = vsel %vm727_vm8, %v83_v26, 0.0  ;;  %v1117_v26 = vsel %vm915_vm4, %v854_v19, 0.0  ;;  %vm740_vm8 = vcmp.eq.s32.totalorder %v4918_v49, %v4971_v16 }
 0x196   :  { %1103 = vadd.xlane.f32.xlu1 %v1102_v13  ;;  %v8064_v13 = vld [vmem:[#allocation21_spill] sm:$0xff]  ;;  %v1120_v18 = vsel %vm915_vm4, %v855_v54, 0.0  ;;  %v86_v54 = vld [vmem:[%s8026_s0 + $0x238] sm:$0xff]  ;;  %v5455_v17 = vpop.permute.xlu1 %651 }
 0x197   :  { %vm729_vm10 = vcmp.eq.s32.totalorder %v4918_v49, %v8064_v13  ;;  %v89_v13 = vld [vmem:[%s8026_s0 + $0x250] sm:$0xff]  ;;  %v858_v19 = vsel %vm730_vm13, %v86_v54, 0.0  ;;  %vm747_vm13 = vcmp.eq.s32.totalorder %v4918_v49, %v5108_v41  ;;  %v102_v41 = vld [vmem:[%s8026_s0 + $0x2b8] sm:$0xff] }
 0x198   :  { %v857_v63 = vsel %vm729_vm10, %v85_v45, 0.0  ;;  %v1129_v60 = vsel %vm915_vm4, %v858_v19, 0.0  ;;  %vm742_vm10 = vcmp.eq.s32.totalorder %v4918_v49, %v4991_v1 }
 0x199   :  { %1100 = vadd.xlane.f32.xlu0 %v1099_v21  ;;  %v8065_v21 = vld [vmem:[#allocation18_spill] sm:$0xff] }
 0x19a   :  { %1109 = vadd.xlane.f32.xlu1 %v1108_v53  ;;  %vm728_vm11 = vcmp.eq.s32.totalorder %v4918_v49, %v8065_v21  ;;  %v5436_v53 = vpop.permute.xlu0 %630  ;;  %v8068_v21 = vld [vmem:[#allocation20_spill] sm:$0xff] }
 0x19b   :  { %vm732_vm15 = vcmp.eq.s32.totalorder %v4918_v49, %v8068_v21  ;;  %v8072_v21 = vld [vmem:[#allocation24_spill] sm:$0xff] }
 0x19c   :  { %vm736_vm3 = vcmp.eq.s32.totalorder %v4918_v49, %v8072_v21 }
 0x19d   :  { %1106 = vadd.xlane.f32.xlu0 %v1105_v5  ;;  %v1126_v5 = vsel %vm915_vm4, %v857_v63, 0.0  ;;  %v861_v63 = vsel %vm733_vm14, %v89_v13, 0.0  ;;  %v93_v13 = vld [vmem:[%s8026_s0 + $0x270] sm:$0xff]  ;;  %vm746_vm14 = vcmp.eq.s32.totalorder %v4918_v49, %v5035_v11 }
 0x19e   :  { %1115 = vadd.xlane.f32.xlu1 %v1114_v9  ;;  %v856_v9 = vsel %vm728_vm11, %v84_v51, 0.0  ;;  %v5460_v45 = vpop.permute.xlu0 %636  ;;  %vm745_vm11 = vcmp.eq.s32.totalorder %v4918_v49, %v5084_v50  ;;  %v100_v50 = vld [vmem:[%s8026_s0 + $0x2a8] sm:$0xff] }
 0x1a1   :  { %1112 = vadd.xlane.f32.xlu0 %v1111_v59  ;;  %v1123_v59 = vsel %vm915_vm4, %v856_v9, 0.0  ;;  %v8070_v9 = vld [vmem:[#allocation22_spill] sm:$0xff] }
 0x1a2   :  { %1121 = vadd.xlane.f32.xlu1 %v1120_v18  ;;  %v1132_v18 = vsel %vm915_vm4, %v859_v4, 0.0  ;;  %vm734_vm1 = vcmp.eq.s32.totalorder %v4918_v49, %v8070_v9  ;;  %v5480_v34 = vpop.permute.xlu0 %642  ;;  %v863_v4 = vsel %vm735_vm0, %v91_v61, 0.0  ;;  %v95_v61 = vld [vmem:[%s8026_s0 + $0x280] sm:$0xff]  ;;  %v864_v9 = vsel %vm736_vm3, %v92_v8, 0.0 }
 0x1a3   :  { %v862_v19 = vsel %vm734_vm1, %v90_v25, 0.0  ;;  %v99_v8 = vld [vmem:[%s8026_s0 + $0x2a0] sm:$0xff]  ;;  %vm748_vm0 = vcmp.eq.s32.totalorder %v4918_v49, %v5059_v40  ;;  %vm751_vm1 = vcmp.eq.s32.totalorder %v4918_v49, %v5152_v27  ;;  %v106_v27 = vld [vmem:[%s8026_s0 + $0x2d8] sm:$0xff]  ;;  %vm753_vm3 = vcmp.eq.s32.totalorder %v4918_v49, %v5172_v31  ;;  %v108_v31 = vld [vmem:[%s8026_s0 + $0x2e8] sm:$0xff] }
 0x1a5   :  { %1118 = vadd.xlane.f32.xlu0 %v1117_v26  ;;  %v1138_v26 = vsel %vm915_vm4, %v861_v63, 0.0  ;;  %v865_v63 = vsel %vm737_vm2, %v93_v13, 0.0  ;;  %v97_v13 = vld [vmem:[%s8026_s0 + $0x290] sm:$0xff]  ;;  %vm750_vm2 = vcmp.eq.s32.totalorder %v4918_v49, %v5079_v36 }
 0x1a6   :  { %1127 = vadd.xlane.f32.xlu1 %v1126_v5  ;;  %v860_v5 = vsel %vm732_vm15, %v88_v57, 0.0  ;;  %v869_v21 = vsel %vm741_vm7, %v97_v13, 0.0  ;;  %vm749_vm15 = vcmp.eq.s32.totalorder %v4918_v49, %v5128_v48  ;;  %v104_v48 = vld [vmem:[%s8026_s0 + $0x2c8] sm:$0xff]  ;;  %vm754_vm7 = vcmp.eq.s32.totalorder %v4918_v49, %v5123_v20 }
 0x1a7   :  { %v1162_v16 = vsel %vm915_vm4, %v869_v21, 0.0  ;;  %v103_v21 = vld [vmem:[%s8026_s0 + $0x2c0] sm:$0xff] }
 0x1a9   :  { %1124 = vadd.xlane.f32.xlu0 %v1123_v59  ;;  %v1135_v59 = vsel %vm915_vm4, %v860_v5, 0.0  ;;  %v1150_v5 = vsel %vm915_vm4, %v865_v63, 0.0 }
 0x1aa   :  { %1133 = vadd.xlane.f32.xlu1 %v1132_v18  ;;  %v1144_v18 = vsel %vm915_vm4, %v863_v4, 0.0  ;;  %v867_v4 = vsel %vm739_vm5, %v95_v61, 0.0  ;;  %vm752_vm5 = vcmp.eq.s32.totalorder %v4918_v49, %v5103_v52 }
 0x1ab   :  { %v5471_v51 = vpop.xlane.xlu1 %920  ;;  %v1156_v58 = vsel %vm915_vm4, %v867_v4, 0.0 }
 0x1ac   :  { %8069 = vst [vmem:[#allocation5_spill] sm:$0xff] %v5471_v51 }
 0x1ad   :  { %1130 = vadd.xlane.f32.xlu0 %v1129_v60  ;;  %v5506_v60 = vpop.permute.xlu0 %648 }
 0x1ae   :  { %1139 = vadd.xlane.f32.xlu1 %v1138_v26  ;;  %v1141_v26 = vsel %vm915_vm4, %v862_v19, 0.0 }
 0x1af   :  { %v5487_v54 = vpop.xlane.xlu1 %929 }
 0x1b0   :  { %8071 = vst [vmem:[#allocation8_spill] sm:$0xff] %v5487_v54 }
 0x1b1   :  { %1136 = vadd.xlane.f32.xlu0 %v1135_v59  ;;  %v1147_v59 = vsel %vm915_vm4, %v864_v9, 0.0  ;;  %v5526_v19 = vpop.permute.xlu0 %654  ;;  %v871_v9 = vsel %vm743_vm9, %v99_v8, 0.0  ;;  %vm756_vm9 = vcmp.eq.s32.totalorder %v4918_v49, %v5147_v0 }
 0x1b2   :  { %1145 = vadd.xlane.f32.xlu1 %v1144_v18  ;;  %v866_v18 = vsel %vm738_vm6, %v94_v7, 0.0  ;;  %v101_v7 = vld [vmem:[%s8026_s0 + $0x2b0] sm:$0xff]  ;;  %v1168_v1 = vsel %vm915_vm4, %v871_v9, 0.0  ;;  %vm755_vm6 = vcmp.eq.s32.totalorder %v4918_v49, %v5196_v24  ;;  %v110_v24 = vld [vmem:[%s8026_s0 + $0x2f8] sm:$0xff] }
 0x1b3   :  { %v5501_v57 = vpop.xlane.xlu1 %935  ;;  %v1153_v61 = vsel %vm915_vm4, %v866_v18, 0.0  ;;  %v105_v9 = vld [vmem:[%s8026_s0 + $0x2d0] sm:$0xff] }
 0x1b4   :  { %8073 = vst [vmem:[#allocation6_spill] sm:$0xff] %v5501_v57 }
 0x1b5   :  { %1142 = vadd.xlane.f32.xlu0 %v1141_v26  ;;  %v868_v26 = vsel %vm740_vm8, %v96_v12, 0.0  ;;  %vm757_vm8 = vcmp.eq.s32.totalorder %v4918_v49, %v5216_v33  ;;  %v112_v33 = vld [vmem:[%s8026_s0 + $0x308] sm:$0xff] }
 0x1b6   :  { %1151 = vadd.xlane.f32.xlu1 %v1150_v5  ;;  %v5542_v5 = vpop.xlane.xlu0 %917  ;;  %v1159_v13 = vsel %vm915_vm4, %v868_v26, 0.0 }
 0x1b7   :  { %v5517_v25 = vpop.xlane.xlu1 %941  ;;  %8076 = vst [vmem:[#allocation12_spill] sm:$0xff] %v5542_v5 }
 0x1b8   :  { %8074 = vst [vmem:[#allocation10_spill] sm:$0xff] %v5517_v25 }
 0x1b9   :  { %1148 = vadd.xlane.f32.xlu0 %v1147_v59  ;;  %v870_v59 = vsel %vm742_vm10, %v98_v32, 0.0  ;;  %vm759_vm10 = vcmp.eq.s32.totalorder %v4918_v49, %v5240_v43  ;;  %v114_v43 = vld [vmem:[%s8026_s0 + $0x318] sm:$0xff] }
 0x1ba   :  { %1157 = vadd.xlane.f32.xlu1 %v1156_v58  ;;  %v873_v58 = vsel %vm745_vm11, %v101_v7, 0.0  ;;  %v5568_v12 = vpop.xlane.xlu0 %923  ;;  %v1165_v8 = vsel %vm915_vm4, %v870_v59, 0.0  ;;  %v874_v7 = vsel %vm746_vm14, %v102_v41, 0.0  ;;  %vm758_vm11 = vcmp.eq.s32.totalorder %v4918_v49, %v5167_v39 }
 0x1bb   :  { %v5533_v63 = vpop.xlane.xlu1 %947  ;;  %8079 = vst [vmem:[#allocation11_spill] sm:$0xff] %v5568_v12  ;;  %v1174_v28 = vsel %vm915_vm4, %v873_v58, 0.0  ;;  %v107_v58 = vld [vmem:[%s8026_s0 + $0x2e0] sm:$0xff]  ;;  %vm763_vm14 = vcmp.eq.s32.totalorder %v4918_v49, %v5284_v15  ;;  %v118_v15 = vld [vmem:[%s8026_s0 + $0x338] sm:$0xff] }
 0x1bc   :  { %8075 = vst [vmem:[#allocation7_spill] sm:$0xff] %v5533_v63 }
 0x1bd   :  { %1154 = vadd.xlane.f32.xlu0 %v1153_v61  ;;  %v872_v61 = vsel %vm744_vm12, %v100_v50, 0.0  ;;  %v1177_v50 = vsel %vm915_vm4, %v874_v7, 0.0  ;;  %v111_v7 = vld [vmem:[%s8026_s0 + $0x300] sm:$0xff]  ;;  %vm761_vm12 = vcmp.eq.s32.totalorder %v4918_v49, %v5260_v30  ;;  %v116_v30 = vld [vmem:[%s8026_s0 + $0x328] sm:$0xff] }
 0x1be   :  { %1163 = vadd.xlane.f32.xlu1 %v1162_v16  ;;  %v875_v16 = vsel %vm747_vm13, %v103_v21, 0.0  ;;  %v1171_v32 = vsel %vm915_vm4, %v872_v61, 0.0  ;;  %v876_v21 = vsel %vm748_vm0, %v104_v48, 0.0  ;;  %v109_v61 = vld [vmem:[%s8026_s0 + $0x2f0] sm:$0xff]  ;;  %v880_v48 = vsel %vm752_vm5, %v108_v31, 0.0 }
 0x1bf   :  { %v5549_v4 = vpop.xlane.xlu1 %953  ;;  %v1180_v11 = vsel %vm915_vm4, %v875_v16, 0.0  ;;  %v1183_v41 = vsel %vm915_vm4, %v876_v21, 0.0  ;;  %v113_v21 = vld [vmem:[%s8026_s0 + $0x310] sm:$0xff]  ;;  %v884_v31 = vsel %vm756_vm9, %v112_v33, 0.0  ;;  %vm760_vm13 = vcmp.eq.s32.totalorder %v4918_v49, %v5191_v22 }
 0x1c0   :  { %8077 = vst [vmem:[#allocation9_spill] sm:$0xff] %v5549_v4  ;;  %vm765_vm0 = vcmp.eq.s32.totalorder %v4918_v49, %v5304_v3  ;;  %v120_v3 = vld [vmem:[%s8026_s0 + $0x348] sm:$0xff]  ;;  %vm769_vm5 = vcmp.eq.s32.totalorder %v4918_v49, %v5348_v35  ;;  %vm773_vm9 = vcmp.eq.s32.totalorder %v4918_v49, %v5392_v44 }
 0x1c1   :  { %1160 = vadd.xlane.f32.xlu0 %v1159_v13  ;;  %v5588_v13 = vpop.xlane.xlu0 %926  ;;  %v124_v35 = vld [vmem:[%s8026_s0 + $0x368] sm:$0xff] }
 0x1c2   :  { %1169 = vadd.xlane.f32.xlu1 %v1168_v1  ;;  %8081 = vst [vmem:[#allocation15_spill] sm:$0xff] %v5588_v13  ;;  %v877_v1 = vsel %vm749_vm15, %v105_v9, 0.0  ;;  %v878_v9 = vsel %vm750_vm2, %v106_v27, 0.0  ;;  %v882_v27 = vsel %vm754_vm7, %v110_v24, 0.0  ;;  %vm762_vm15 = vcmp.eq.s32.totalorder %v4918_v49, %v5211_v6  ;;  %v128_v44 = vld [vmem:[%s8026_s0 + $0x388] sm:$0xff]  ;;  %v4320_v13 = vld [vmem:[%s8027_s1 + $0x290] sm:$0xff] }
 0x1c3   :  { %v5563_v18 = vpop.xlane.xlu1 %959  ;;  %v1186_v40 = vsel %vm915_vm4, %v877_v1, 0.0  ;;  %v1189_v1 = vsel %vm915_vm4, %v878_v9, 0.0  ;;  %vm767_vm2 = vcmp.eq.s32.totalorder %v4918_v49, %v5328_v38  ;;  %v122_v38 = vld [vmem:[%s8026_s0 + $0x358] sm:$0xff]  ;;  %vm771_vm7 = vcmp.eq.s32.totalorder %v4918_v49, %v5372_v14 }
 0x1c4   :  { %8078 = vst [vmem:[#allocation14_spill] sm:$0xff] %v5563_v18  ;;  %v126_v14 = vld [vmem:[%s8026_s0 + $0x378] sm:$0xff] }
 0x1c5   :  { %1166 = vadd.xlane.f32.xlu0 %v1165_v8  ;;  %v879_v8 = vsel %vm751_vm1, %v107_v58, 0.0  ;;  %v5614_v16 = vpop.xlane.xlu0 %932  ;;  %vm764_vm1 = vcmp.eq.s32.totalorder %v4918_v49, %v5235_v46 }
 0x1c6   :  { %1175 = vadd.xlane.f32.xlu1 %v1174_v28  ;;  %8084 = vst [vmem:[#allocation21_spill] sm:$0xff] %v5614_v16  ;;  %v1192_v36 = vsel %vm915_vm4, %v879_v8, 0.0  ;;  %v1195_v8 = vsel %vm915_vm4, %v880_v48, 0.0  ;;  %v1207_v48 = vsel %vm915_vm4, %v884_v31, 0.0 }
 0x1c7   :  { %v5579_v26 = vpop.xlane.xlu1 %965 }
 0x1c8   :  { %8080 = vst [vmem:[#allocation13_spill] sm:$0xff] %v5579_v26 }
 0x1c9   :  { %1172 = vadd.xlane.f32.xlu0 %v1171_v32  ;;  %v881_v32 = vsel %vm753_vm3, %v109_v61, 0.0  ;;  %v5634_v58 = vpop.xlane.xlu0 %938  ;;  %v885_v61 = vsel %vm757_vm8, %v113_v21, 0.0  ;;  %vm766_vm3 = vcmp.eq.s32.totalorder %v4918_v49, %v5255_v47  ;;  %vm770_vm8 = vcmp.eq.s32.totalorder %v4918_v49, %v5299_v55 }
 0x1ca   :  { %1181 = vadd.xlane.f32.xlu1 %v1180_v11  ;;  %v1198_v52 = vsel %vm915_vm4, %v881_v32, 0.0  ;;  %8086 = vst [vmem:[#allocation23_spill] sm:$0xff] %v5634_v58  ;;  %v1201_v32 = vsel %vm915_vm4, %v882_v27, 0.0  ;;  %v1210_v0 = vsel %vm915_vm4, %v885_v61, 0.0  ;;  %v888_v61 = vsel %vm760_vm13, %v116_v30, 0.0 }
 0x1cb   :  { %v5595_v59 = vpop.xlane.xlu1 %971  ;;  %v1219_v31 = vsel %vm915_vm4, %v888_v61, 0.0  ;;  %v894_v61 = vsel %vm766_vm3, %v122_v38, 0.0  ;;  %vm777_vm13 = vcmp.eq.s32.totalorder %v4918_v49, %v5436_v53  ;;  %v132_v53 = vld [vmem:[%s8026_s0 + $0x3a8] sm:$0xff]  ;;  %vm783_vm3 = vcmp.eq.s32.totalorder %v4918_v49, %v5506_v60  ;;  %v138_v60 = vld [vmem:[%s8026_s0 + $0x3d8] sm:$0xff] }
 0x1cc   :  { %8082 = vst [vmem:[#allocation16_spill] sm:$0xff] %v5595_v59 }
 0x1cd   :  { %1178 = vadd.xlane.f32.xlu0 %v1177_v50  ;;  %v883_v50 = vsel %vm755_vm6, %v111_v7, 0.0  ;;  %v5660_v9 = vpop.xlane.xlu0 %944  ;;  %vm768_vm6 = vcmp.eq.s32.totalorder %v4918_v49, %v5279_v10 }
 0x1ce   :  { %1187 = vadd.xlane.f32.xlu1 %v1186_v40  ;;  %v1204_v20 = vsel %vm915_vm4, %v883_v50, 0.0  ;;  %8089 = vst [vmem:[#allocation22_spill] sm:$0xff] %v5660_v9  ;;  %v886_v50 = vsel %vm758_vm11, %v114_v43, 0.0  ;;  %vm775_vm11 = vcmp.eq.s32.totalorder %v4918_v49, %v5416_v23  ;;  %v130_v23 = vld [vmem:[%s8026_s0 + $0x398] sm:$0xff] }
 0x1cf   :  { %v5609_v28 = vpop.xlane.xlu1 %977  ;;  %v1213_v27 = vsel %vm915_vm4, %v886_v50, 0.0  ;;  %v892_v50 = vsel %vm764_vm1, %v120_v3, 0.0  ;;  %vm781_vm1 = vcmp.eq.s32.totalorder %v4918_v49, %v5480_v34  ;;  %v136_v34 = vld [vmem:[%s8026_s0 + $0x3c8] sm:$0xff] }
 0x1d0   :  { %8083 = vst [vmem:[#allocation17_spill] sm:$0xff] %v5609_v28 }
 0x1d1   :  { %1184 = vadd.xlane.f32.xlu0 %v1183_v41  ;;  %v5680_v24 = vpop.xlane.xlu0 %950 }
 0x1d2   :  { %1193 = vadd.xlane.f32.xlu1 %v1192_v36  ;;  %v115_v36 = vld [vmem:[%s8026_s0 + $0x320] sm:$0xff]  ;;  %8091 = vst [vmem:[#allocation25_spill] sm:$0xff] %v5680_v24 }
 0x1d3   :  { %v5625_v11 = vpop.xlane.xlu1 %983  ;;  %v887_v7 = vsel %vm759_vm10, %v115_v36, 0.0  ;;  %vm772_vm10 = vcmp.eq.s32.totalorder %v4918_v49, %v5323_v56 }
 0x1d4   :  { %8085 = vst [vmem:[#allocation18_spill] sm:$0xff] %v5625_v11  ;;  %v1216_v39 = vsel %vm915_vm4, %v887_v7, 0.0  ;;  %v890_v7 = vsel %vm762_vm15, %v118_v15, 0.0  ;;  %vm779_vm15 = vcmp.eq.s32.totalorder %v4918_v49, %v5460_v45  ;;  %v134_v45 = vld [vmem:[%s8026_s0 + $0x3b8] sm:$0xff] }
 0x1d5   :  { %1190 = vadd.xlane.f32.xlu0 %v1189_v1 }
 0x1d6   :  { %1199 = vadd.xlane.f32.xlu1 %v1198_v52  ;;  %v117_v52 = vld [vmem:[%s8026_s0 + $0x330] sm:$0xff] }
 0x1d7   :  { %v5641_v40 = vpop.xlane.xlu1 %989  ;;  %v889_v21 = vsel %vm761_vm12, %v117_v52, 0.0  ;;  %vm774_vm12 = vcmp.eq.s32.totalorder %v4918_v49, %v5343_v37 }
 0x1d8   :  { %8087 = vst [vmem:[#allocation19_spill] sm:$0xff] %v5641_v40  ;;  %v1222_v22 = vsel %vm915_vm4, %v889_v21, 0.0 }
 0x1d9   :  { %1196 = vadd.xlane.f32.xlu0 %v1195_v8 }
 0x1da   :  { %1205 = vadd.xlane.f32.xlu1 %v1204_v20  ;;  %v119_v20 = vld [vmem:[%s8026_s0 + $0x340] sm:$0xff] }
 0x1db   :  { %v5655_v41 = vpop.xlane.xlu1 %995  ;;  %v891_v33 = vsel %vm763_vm14, %v119_v20, 0.0  ;;  %vm776_vm14 = vcmp.eq.s32.totalorder %v4918_v49, %v5367_v29 }
 0x1dc   :  { %8088 = vst [vmem:[#allocation20_spill] sm:$0xff] %v5655_v41  ;;  %v1228_v6 = vsel %vm915_vm4, %v891_v33, 0.0 }
 0x1dd   :  { %1202 = vadd.xlane.f32.xlu0 %v1201_v32  ;;  %v121_v32 = vld [vmem:[%s8026_s0 + $0x350] sm:$0xff] }
 0x1de   :  { %1211 = vadd.xlane.f32.xlu1 %v1210_v0  ;;  %v5706_v0 = vpop.xlane.xlu0 %956  ;;  %v893_v43 = vsel %vm765_vm0, %v121_v32, 0.0  ;;  %v127_v32 = vld [vmem:[%s8026_s0 + $0x380] sm:$0xff]  ;;  %vm778_vm0 = vcmp.eq.s32.totalorder %v4918_v49, %v5387_v42 }
 0x1df   :  { %v5671_v1 = vpop.xlane.xlu1 %1001  ;;  %8094 = vst [vmem:[#allocation28_spill] sm:$0xff] %v5706_v0  ;;  %v1234_v46 = vsel %vm915_vm4, %v893_v43, 0.0  ;;  %v899_v43 = vsel %vm771_vm7, %v127_v32, 0.0  ;;  %vm784_vm7 = vcmp.eq.s32.totalorder %v4918_v49, %v5455_v17 }
 0x1e0   :  { %8090 = vst [vmem:[#allocation24_spill] sm:$0xff] %v5671_v1  ;;  %v1252_v55 = vsel %vm915_vm4, %v899_v43, 0.0 }
 0x1e1   :  { %1208 = vadd.xlane.f32.xlu0 %v1207_v48  ;;  %v123_v48 = vld [vmem:[%s8026_s0 + $0x360] sm:$0xff] }
 0x1e2   :  { %1217 = vadd.xlane.f32.xlu1 %v1216_v39  ;;  %v1225_v39 = vsel %vm915_vm4, %v890_v7, 0.0  ;;  %v5726_v21 = vpop.xlane.xlu0 %962  ;;  %v895_v30 = vsel %vm767_vm2, %v123_v48, 0.0  ;;  %v896_v7 = vsel %vm768_vm6, %v124_v35, 0.0  ;;  %v129_v48 = vld [vmem:[%s8026_s0 + $0x390] sm:$0xff]  ;;  %vm780_vm2 = vcmp.eq.s32.totalorder %v4918_v49, %v5411_v2 }
 0x1e3   :  { %v5687_v8 = vpop.xlane.xlu1 %1007  ;;  %8096 = vst [vmem:[#allocation30_spill] sm:$0xff] %v5726_v21  ;;  %v1240_v47 = vsel %vm915_vm4, %v895_v30, 0.0  ;;  %v901_v30 = vsel %vm773_vm9, %v129_v48, 0.0  ;;  %v133_v35 = vld [vmem:[%s8026_s0 + $0x3b0] sm:$0xff]  ;;  %vm785_vm6 = vcmp.eq.s32.totalorder %v4918_v49, %v5526_v19  ;;  %v140_v19 = vld [vmem:[%s8026_s0 + $0x3e8] sm:$0xff] }
 0x1e4   :  { %8092 = vst [vmem:[#allocation26_spill] sm:$0xff] %v5687_v8  ;;  %v1258_v56 = vsel %vm915_vm4, %v901_v30, 0.0 }
 0x1e5   :  { %1214 = vadd.xlane.f32.xlu0 %v1213_v27  ;;  %v125_v27 = vld [vmem:[%s8026_s0 + $0x370] sm:$0xff] }
 0x1e6   :  { %1223 = vadd.xlane.f32.xlu1 %v1222_v22  ;;  %v1231_v22 = vsel %vm915_vm4, %v892_v50, 0.0  ;;  %v897_v33 = vsel %vm769_vm5, %v125_v27, 0.0  ;;  %v131_v27 = vld [vmem:[%s8026_s0 + $0x3a0] sm:$0xff]  ;;  %vm782_vm5 = vcmp.eq.s32.totalorder %v4918_v49, %v5431_v62 }
 0x1e7   :  { %v5701_v36 = vpop.xlane.xlu1 %1013  ;;  %v1246_v10 = vsel %vm915_vm4, %v897_v33, 0.0 }
 0x1e8   :  { %8093 = vst [vmem:[#allocation27_spill] sm:$0xff] %v5701_v36 }
 0x1e9   :  { %1220 = vadd.xlane.f32.xlu0 %v1219_v31  ;;  %v5752_v31 = vpop.xlane.xlu0 %968 }
 0x1ea   :  { %1229 = vadd.xlane.f32.xlu1 %v1228_v6  ;;  %8099 = vst [vmem:[#allocation33_spill] sm:$0xff] %v5752_v31  ;;  %v1237_v6 = vsel %vm915_vm4, %v894_v61, 0.0  ;;  %v903_v61 = vsel %vm775_vm11, %v131_v27, 0.0 }
 0x1eb   :  { %v5717_v52 = vpop.xlane.xlu1 %1019  ;;  %v1264_v37 = vsel %vm915_vm4, %v903_v61, 0.0  ;;  %v139_v61 = vld [vmem:[%s8026_s0 + $0x3e0] sm:$0xff] }
 0x1ec   :  { %8095 = vst [vmem:[#allocation29_spill] sm:$0xff] %v5717_v52 }
 0x1ed   :  { %1226 = vadd.xlane.f32.xlu0 %v1225_v39  ;;  %v1243_v39 = vsel %vm915_vm4, %v896_v7, 0.0  ;;  %v5772_v50 = vpop.xlane.xlu0 %974  ;;  %v905_v7 = vsel %vm777_vm13, %v133_v35, 0.0 }
 0x1ee   :  { %1235 = vadd.xlane.f32.xlu1 %v1234_v46  ;;  %v898_v46 = vsel %vm770_vm8, %v126_v14, 0.0  ;;  %8101 = vst [vmem:[#allocation35_spill] sm:$0xff] %v5772_v50  ;;  %v135_v14 = vld [vmem:[%s8026_s0 + $0x3c0] sm:$0xff]  ;;  %v1270_v29 = vsel %vm915_vm4, %v905_v7, 0.0  ;;  %v141_v7 = vld [vmem:[%s8026_s0 + $0x3f0] sm:$0xff] }
 0x1ef   :  { %v5733_v20 = vpop.xlane.xlu1 %1025 }
 0x1f0   :  { %8097 = vst [vmem:[#allocation31_spill] sm:$0xff] %v5733_v20 }
 0x1f1   :  { %1232 = vadd.xlane.f32.xlu0 %v1231_v22  ;;  %v1249_v22 = vsel %vm915_vm4, %v898_v46, 0.0  ;;  %v5798_v32 = vpop.xlane.xlu0 %980  ;;  %v907_v46 = vsel %vm779_vm15, %v135_v14, 0.0  ;;  %v910_v14 = vsel %vm782_vm5, %v138_v60, 0.0 }
 0x1f2   :  { %1241 = vadd.xlane.f32.xlu1 %v1240_v47  ;;  %v900_v47 = vsel %vm772_vm10, %v128_v44, 0.0  ;;  %8104 = vst [vmem:[#allocation38_spill] sm:$0xff] %v5798_v32  ;;  %v137_v44 = vld [vmem:[%s8026_s0 + $0x3d0] sm:$0xff]  ;;  %v1276_v42 = vsel %vm915_vm4, %v907_v46, 0.0  ;;  %v1285_v46 = vsel %vm915_vm4, %v910_v14, 0.0  ;;  %v4217_v14 = vld [vmem:[%s8027_s1 + $0x18] sm:$0xff] }
 0x1f3   :  { %v5747_v15 = vpop.xlane.xlu1 %1031 }
 0x1f4   :  { %8098 = vst [vmem:[#allocation32_spill] sm:$0xff] %v5747_v15 }
 0x1f5   :  { %1238 = vadd.xlane.f32.xlu0 %v1237_v6  ;;  %v1255_v6 = vsel %vm915_vm4, %v900_v47, 0.0 }
 0x1f6   :  { %1247 = vadd.xlane.f32.xlu1 %v1246_v10  ;;  %v902_v10 = vsel %vm774_vm12, %v130_v23, 0.0 }
 0x1f7   :  { %v5763_v3 = vpop.xlane.xlu1 %1037  ;;  %v1261_v48 = vsel %vm915_vm4, %v902_v10, 0.0 }
 0x1f8   :  { %8100 = vst [vmem:[#allocation34_spill] sm:$0xff] %v5763_v3 }
 0x1f9   :  { %1244 = vadd.xlane.f32.xlu0 %v1243_v39  ;;  %v904_v39 = vsel %vm776_vm14, %v132_v53, 0.0 }
 0x1fa   :  { %1253 = vadd.xlane.f32.xlu1 %v1252_v55  ;;  %v5818_v55 = vpop.xlane.xlu0 %986  ;;  %v1267_v27 = vsel %vm915_vm4, %v904_v39, 0.0 }
 0x1fb   :  { %v5779_v38 = vpop.xlane.xlu1 %1043  ;;  %8106 = vst [vmem:[#allocation40_spill] sm:$0xff] %v5818_v55 }
 0x1fc   :  { %8102 = vst [vmem:[#allocation36_spill] sm:$0xff] %v5779_v38 }
 0x1fd   :  { %1250 = vadd.xlane.f32.xlu0 %v1249_v22  ;;  %v906_v22 = vsel %vm778_vm0, %v134_v45, 0.0 }
 0x1fe   :  { %1259 = vadd.xlane.f32.xlu1 %v1258_v56  ;;  %v909_v56 = vsel %vm781_vm1, %v137_v44, 0.0  ;;  %v5844_v23 = vpop.xlane.xlu0 %992  ;;  %v1273_v35 = vsel %vm915_vm4, %v906_v22, 0.0  ;;  %v912_v44 = vsel %vm784_vm7, %v140_v19, 0.0 }
 0x1ff   :  { %v5793_v33 = vpop.xlane.xlu1 %1049  ;;  %8109 = vst [vmem:[#allocation43_spill] sm:$0xff] %v5844_v23  ;;  %v1282_v2 = vsel %vm915_vm4, %v909_v56, 0.0  ;;  %v1291_v56 = vsel %vm915_vm4, %v912_v44, 0.0 }
 0x200   :  { %8103 = vst [vmem:[#allocation37_spill] sm:$0xff] %v5793_v33 }
 0x201   :  { %1256 = vadd.xlane.f32.xlu0 %v1255_v6  ;;  %v908_v6 = vsel %vm780_vm2, %v136_v34, 0.0  ;;  %v4215_v34 = vld [vmem:[%s8027_s1] sm:$0xff] }
 0x202   :  { %1265 = vadd.xlane.f32.xlu1 %v1264_v37  ;;  %v911_v37 = vsel %vm783_vm3, %v139_v61, 0.0  ;;  %v1279_v53 = vsel %vm915_vm4, %v908_v6, 0.0  ;;  %v1300_v61 = vrot.slane %v4215_v34, 7 }
 0x203   :  { %v5809_v43 = vpop.xlane.xlu1 %1055  ;;  %v1288_v62 = vsel %vm915_vm4, %v911_v37, 0.0 }
 0x204   :  { %8105 = vst [vmem:[#allocation39_spill] sm:$0xff] %v5809_v43 }
 0x205   :  { %1262 = vadd.xlane.f32.xlu0 %v1261_v48  ;;  %v5864_v48 = vpop.xlane.xlu0 %998 }
 0x206   :  { %1271 = vadd.xlane.f32.xlu1 %v1270_v29  ;;  %8111 = vst [vmem:[#allocation45_spill] sm:$0xff] %v5864_v48  ;;  %v913_v29 = vsel %vm785_vm6, %v141_v7, 0.0 }
 0x207   :  { %v5825_v30 = vpop.xlane.xlu1 %1061  ;;  %v1294_v45 = vsel %vm915_vm4, %v913_v29, 0.0  ;;  %v1303_v29 = vrot.slane %v4217_v14, 7 }
 0x208   :  { %8107 = vst [vmem:[#allocation41_spill] sm:$0xff] %v5825_v30 }
 0x209   :  { %1268 = vadd.xlane.f32.xlu0 %v1267_v27  ;;  %v8113_v27 = vlaneseq  ;;  %v5878_v22 = vpop.xlane.xlu0 %1004 }
 0x20a   :  { %1277 = vadd.xlane.f32.xlu1 %v1276_v42  ;;  %8115 = vst [vmem:[#allocation48_spill] sm:$0xff] %v5878_v22 }
 0x20b   :  { %v5839_v47 = vpop.xlane.xlu1 %1067  ;;  %v5874_v42 = vshrl.u32 %v8113_v27, 7  ;;  %v270_v27 = vld [vmem:[%s8027_s1 + $0x3f8] sm:$0xff] }
 0x20c   :  { %8108 = vst [vmem:[#allocation42_spill] sm:$0xff] %v5839_v47 }
 0x20d   :  { %1274 = vadd.xlane.f32.xlu0 %v1273_v35  ;;  %vm1428_vm8 = vcmp.eq.s32.totalorder %v5874_v42, 0  ;;  %v5892_v60 = vpop.xlane.xlu0 %1010 }
 0x20e   :  { %1283 = vadd.xlane.f32.xlu1 %v1282_v2  ;;  %v4216_v2 = vld [vmem:[%s8027_s1 + $0x10] sm:$0xff]  ;;  %v1429_v37 = vsel %vm1428_vm8, 4294967295, %v1300_v61  ;;  %8117 = vst [vmem:[#allocation50_spill] sm:$0xff] %v5892_v60  ;;  %v4218_v61 = vld [vmem:[%s8027_s1 + $0x28] sm:$0xff] }
 0x20f   :  { %v5855_v10 = vpop.xlane.xlu1 %1073  ;;  %v1302_v6 = vrot.slane %v4216_v2, 7  ;;  %vm1558_vm9 = vcmp.lt.s32.totalorder %v1429_v37, 0 }
 0x210   :  { %8110 = vst [vmem:[#allocation44_spill] sm:$0xff] %v5855_v10 }
 0x211   :  { %1280 = vadd.xlane.f32.xlu0 %v1279_v53  ;;  %v1686_v53 = vmul.u32 5, %v1429_v37  ;;  %v5903_v44 = vpop.xlane.xlu0 %1016 }
 0x212   :  { %1289 = vadd.xlane.f32.xlu1 %v1288_v62  ;;  %v1431_v62 = vsel %vm1428_vm8, 4294967295, %v1302_v6  ;;  %8120 = vst [vmem:[#allocation53_spill] sm:$0xff] %v5903_v44  ;;  %v1305_v6 = vrot.slane %v4218_v61, 7 }
 0x213   :  { %v5869_v39 = vpop.xlane.xlu1 %1079  ;;  %vm1560_vm10 = vcmp.lt.s32.totalorder %v1431_v62, 0 }
 0x214   :  { %8112 = vst [vmem:[#allocation46_spill] sm:$0xff] %v5869_v39 }
 0x215   :  { %1286 = vadd.xlane.f32.xlu0 %v1285_v46  ;;  %v1688_v46 = vmul.u32 5, %v1431_v62  ;;  %v5920_v43 = vpop.xlane.xlu0 %1022 }
 0x216   :  { %1295 = vadd.xlane.f32.xlu1 %v1294_v45  ;;  %v1814_v45 = vadd.s32 %v4215_v34, %v1686_v53  ;;  %8122 = vst [vmem:[#allocation55_spill] sm:$0xff] %v5920_v43 }
 0x217   :  { %v5876_v17 = vpop.xlane.xlu1 %1085 }
 0x218   :  { %8114 = vst [vmem:[#allocation47_spill] sm:$0xff] %v5876_v17  ;;  %v1942_v53 = vsel %vm1558_vm9, 4294967295, %v1814_v45  ;;  %v4219_v17 = vld [vmem:[%s8027_s1 + $0x38] sm:$0xff] }
 0x219   :  { %1292 = vadd.xlane.f32.xlu0 %v1291_v56  ;;  %v1432_v56 = vsel %vm1428_vm8, 4294967295, %v1303_v29  ;;  %v1307_v29 = vrot.slane %v4219_v17, 7 }
 0x21a   :  { %v1689_v34 = vmul.u32 5, %v1432_v56  ;;  %vm1561_vm11 = vcmp.lt.s32.totalorder %v1432_v56, 0 }
 0x21b   :  { %v5885_v35 = vpop.xlane.xlu1 %1091 }
 0x21c   :  { %8116 = vst [vmem:[#allocation49_spill] sm:$0xff] %v5885_v35  ;;  %v1434_v35 = vsel %vm1428_vm8, 4294967295, %v1305_v6  ;;  %v1817_v37 = vadd.s32 %v4217_v14, %v1689_v34 }
 0x21d   :  { %vm1563_vm12 = vcmp.lt.s32.totalorder %v1434_v35, 0 }
 0x21f   :  { %v5894_v7 = vpop.xlane.xlu1 %1097 }
 0x220   :  { %8118 = vst [vmem:[#allocation51_spill] sm:$0xff] %v5894_v7 }
 0x223   :  { %v5901_v19 = vpop.xlane.xlu1 %1103 }
 0x224   :  { %8119 = vst [vmem:[#allocation52_spill] sm:$0xff] %v5901_v19  ;;  %v1816_v19 = vadd.s32 %v4216_v2, %v1688_v46  ;;  %v1436_v2 = vsel %vm1428_vm8, 4294967295, %v1307_v29  ;;  %v4220_v46 = vld [vmem:[%s8027_s1 + $0x48] sm:$0xff] }
 0x225   :  { %v1309_v45 = vrot.slane %v4220_v46, 7  ;;  %v1693_v8 = vmul.u32 5, %v1436_v2  ;;  %vm1565_vm13 = vcmp.lt.s32.totalorder %v1436_v2, 0 }
 0x227   :  { %657 = vperm.xlu1 %4214, %v270_v27   ;;  %v5913_v7 = vpop.xlane.xlu1 %1109  ;;  %v1691_v27 = vmul.u32 5, %v1434_v35  ;;  %v1438_v14 = vsel %vm1428_vm8, 4294967295, %v1309_v45 }
 0x228   :  { %8121 = vst [vmem:[#allocation54_spill] sm:$0xff] %v5913_v7  ;;  %v1944_v7 = vsel %vm1560_vm10, 4294967295, %v1816_v19  ;;  %v4221_v19 = vld [vmem:[%s8027_s1 + $0x58] sm:$0xff]  ;;  %v1695_v56 = vmul.u32 5, %v1438_v14  ;;  %vm1567_vm14 = vcmp.lt.s32.totalorder %v1438_v14, 0 }
 0x229   :  { %v1819_v62 = vadd.s32 %v4218_v61, %v1691_v27  ;;  %v1311_v34 = vrot.slane %v4221_v19, 7 }
 0x22b   :  { %2071 = vperm.xlu1 %4214, %v1942_v53   ;;  %v5922_v33 = vpop.xlane.xlu1 %1115  ;;  %v5931_v53 = vpop.xlane.xlu0 %1028  ;;  %v1440_v61 = vsel %vm1428_vm8, 4294967295, %v1311_v34 }
 0x22c   :  { %8123 = vst [vmem:[#allocation56_spill] sm:$0xff] %v5922_v33  ;;  %8125 = vst [vmem:[#allocation58_spill] sm:$0xff] %v5931_v53  ;;  %v1945_v33 = vsel %vm1561_vm11, 4294967295, %v1817_v37  ;;  %v4222_v37 = vld [vmem:[%s8027_s1 + $0x68] sm:$0xff]  ;;  %v1697_v35 = vmul.u32 5, %v1440_v61  ;;  %vm1569_vm15 = vcmp.lt.s32.totalorder %v1440_v61, 0 }
 0x22d   :  { %v1313_v27 = vrot.slane %v4222_v37, 7 }
 0x22e   :  { %v1825_v2 = vadd.s32 %v4221_v19, %v1697_v35 }
 0x22f   :  { %2077 = vperm.xlu1 %4214, %v1944_v7   ;;  %v5929_v6 = vpop.xlane.xlu1 %1121  ;;  %v1821_v7 = vadd.s32 %v4219_v17, %v1693_v8  ;;  %v5945_v45 = vpop.xlane.xlu0 %1034  ;;  %v1442_v8 = vsel %vm1428_vm8, 4294967295, %v1313_v27  ;;  %v4223_v17 = vld [vmem:[%s8027_s1 + $0x78] sm:$0xff] }
 0x230   :  { %8124 = vst [vmem:[#allocation57_spill] sm:$0xff] %v5929_v6  ;;  %v1947_v6 = vsel %vm1563_vm12, 4294967295, %v1819_v62  ;;  %8127 = vst [vmem:[#allocation60_spill] sm:$0xff] %v5945_v45  ;;  %v1315_v62 = vrot.slane %v4223_v17, 7  ;;  %v1699_v39 = vmul.u32 5, %v1442_v8  ;;  %vm1571_vm0 = vcmp.lt.s32.totalorder %v1442_v8, 0 }
 0x232   :  { %v1827_v14 = vadd.s32 %v4222_v37, %v1699_v39  ;;  %v4226_v37 = vld [vmem:[%s8027_s1 + $0xa8] sm:$0xff] }
 0x233   :  { %2080 = vperm.xlu1 %4214, %v1945_v33   ;;  %v5938_v29 = vpop.xlane.xlu1 %1127  ;;  %v1823_v33 = vadd.s32 %v4220_v46, %v1695_v56  ;;  %v1444_v46 = vsel %vm1428_vm8, 4294967295, %v1315_v62 }
 0x234   :  { %8126 = vst [vmem:[#allocation59_spill] sm:$0xff] %v5938_v29  ;;  %v1949_v29 = vsel %vm1565_vm13, 4294967295, %v1821_v7  ;;  %v4224_v7 = vld [vmem:[%s8027_s1 + $0x88] sm:$0xff]  ;;  %vm1573_vm1 = vcmp.lt.s32.totalorder %v1444_v46, 0 }
 0x235   :  { %v1317_v56 = vrot.slane %v4224_v7, 7 }
 0x237   :  { %2086 = vperm.xlu1 %4214, %v1947_v6   ;;  %v5947_v60 = vpop.xlane.xlu1 %1133  ;;  %v5956_v6 = vpop.xlane.xlu0 %1040  ;;  %v1446_v19 = vsel %vm1428_vm8, 4294967295, %v1317_v56 }
 0x238   :  { %8128 = vst [vmem:[#allocation61_spill] sm:$0xff] %v5947_v60  ;;  %8130 = vst [vmem:[#allocation63_spill] sm:$0xff] %v5956_v6  ;;  %v1951_v60 = vsel %vm1567_vm14, 4294967295, %v1823_v33  ;;  %v4225_v33 = vld [vmem:[%s8027_s1 + $0x98] sm:$0xff]  ;;  %v1703_v61 = vmul.u32 5, %v1446_v19  ;;  %vm1575_vm2 = vcmp.lt.s32.totalorder %v1446_v19, 0 }
 0x239   :  { %v1319_v35 = vrot.slane %v4225_v33, 7 }
 0x23a   :  { %v1831_v8 = vadd.s32 %v4224_v7, %v1703_v61 }
 0x23b   :  { %2092 = vperm.xlu1 %4214, %v1949_v29   ;;  %v5954_v34 = vpop.xlane.xlu1 %1139  ;;  %v1701_v29 = vmul.u32 5, %v1444_v46  ;;  %v5970_v62 = vpop.xlane.xlu0 %1046  ;;  %v1448_v39 = vsel %vm1428_vm8, 4294967295, %v1319_v35 }
 0x23c   :  { %8129 = vst [vmem:[#allocation62_spill] sm:$0xff] %v5954_v34  ;;  %v1953_v34 = vsel %vm1569_vm15, 4294967295, %v1825_v2  ;;  %8132 = vst [vmem:[#allocation65_spill] sm:$0xff] %v5970_v62  ;;  %v1321_v2 = vrot.slane %v4226_v37, 7  ;;  %v1705_v62 = vmul.u32 5, %v1448_v39  ;;  %vm1577_vm3 = vcmp.lt.s32.totalorder %v1448_v39, 0 }
 0x23e   :  { %v1833_v46 = vadd.s32 %v4225_v33, %v1705_v62  ;;  %v4229_v62 = vld [vmem:[%s8027_s1 + $0xd8] sm:$0xff] }
 0x23f   :  { %2098 = vperm.xlu1 %4214, %v1951_v60   ;;  %v5963_v27 = vpop.xlane.xlu1 %1145  ;;  %v1829_v60 = vadd.s32 %v4223_v17, %v1701_v29  ;;  %v1450_v17 = vsel %vm1428_vm8, 4294967295, %v1321_v2 }
 0x240   :  { %8131 = vst [vmem:[#allocation64_spill] sm:$0xff] %v5963_v27  ;;  %v1955_v27 = vsel %vm1571_vm0, 4294967295, %v1827_v14  ;;  %v4227_v14 = vld [vmem:[%s8027_s1 + $0xb8] sm:$0xff]  ;;  %vm1579_vm5 = vcmp.lt.s32.totalorder %v1450_v17, 0 }
 0x241   :  { %v1323_v29 = vrot.slane %v4227_v14, 7 }
 0x243   :  { %2104 = vperm.xlu1 %4214, %v1953_v34   ;;  %v5972_v38 = vpop.xlane.xlu1 %1151  ;;  %v5981_v34 = vpop.xlane.xlu0 %1052  ;;  %v1452_v7 = vsel %vm1428_vm8, 4294967295, %v1323_v29 }
 0x244   :  { %8133 = vst [vmem:[#allocation66_spill] sm:$0xff] %v5972_v38  ;;  %8135 = vst [vmem:[#allocation68_spill] sm:$0xff] %v5981_v34  ;;  %v1957_v38 = vsel %vm1573_vm1, 4294967295, %v1829_v60  ;;  %v4228_v60 = vld [vmem:[%s8027_s1 + $0xc8] sm:$0xff]  ;;  %v1709_v19 = vmul.u32 5, %v1452_v7  ;;  %vm1581_vm6 = vcmp.lt.s32.totalorder %v1452_v7, 0 }
 0x245   :  { %v1325_v61 = vrot.slane %v4228_v60, 7 }
 0x246   :  { %v1837_v39 = vadd.s32 %v4227_v14, %v1709_v19 }
 0x247   :  { %2110 = vperm.xlu1 %4214, %v1955_v27   ;;  %v5979_v56 = vpop.xlane.xlu1 %1157  ;;  %v1707_v27 = vmul.u32 5, %v1450_v17  ;;  %v5995_v2 = vpop.xlane.xlu0 %1058  ;;  %v1454_v33 = vsel %vm1428_vm8, 4294967295, %v1325_v61 }
 0x248   :  { %8134 = vst [vmem:[#allocation67_spill] sm:$0xff] %v5979_v56  ;;  %v1959_v56 = vsel %vm1575_vm2, 4294967295, %v1831_v8  ;;  %8137 = vst [vmem:[#allocation70_spill] sm:$0xff] %v5995_v2  ;;  %v1327_v8 = vrot.slane %v4229_v62, 7  ;;  %v1711_v2 = vmul.u32 5, %v1454_v33  ;;  %vm1583_vm7 = vcmp.lt.s32.totalorder %v1454_v33, 0 }
 0x24a   :  { %v1839_v17 = vadd.s32 %v4228_v60, %v1711_v2  ;;  %v4232_v2 = vld [vmem:[%s8027_s1 + $0x108] sm:$0xff] }
 0x24b   :  { %2116 = vperm.xlu1 %4214, %v1957_v38   ;;  %v5988_v35 = vpop.xlane.xlu1 %1163  ;;  %v1835_v38 = vadd.s32 %v4226_v37, %v1707_v27  ;;  %v1456_v37 = vsel %vm1428_vm8, 4294967295, %v1327_v8 }
 0x24c   :  { %8136 = vst [vmem:[#allocation69_spill] sm:$0xff] %v5988_v35  ;;  %v1961_v35 = vsel %vm1577_vm3, 4294967295, %v1833_v46  ;;  %v4230_v46 = vld [vmem:[%s8027_s1 + $0xe8] sm:$0xff]  ;;  %vm1585_vm9 = vcmp.lt.s32.totalorder %v1456_v37, 0 }
 0x24d   :  { %v1329_v27 = vrot.slane %v4230_v46, 7 }
 0x24f   :  { %2122 = vperm.xlu1 %4214, %v1959_v56   ;;  %v5997_v34 = vpop.xlane.xlu1 %1169  ;;  %v6006_v56 = vpop.xlane.xlu0 %1064  ;;  %v1458_v14 = vsel %vm1428_vm8, 4294967295, %v1329_v27 }
 0x250   :  { %8138 = vst [vmem:[#allocation71_spill] sm:$0xff] %v5997_v34  ;;  %8140 = vst [vmem:[#allocation73_spill] sm:$0xff] %v6006_v56  ;;  %v1963_v34 = vsel %vm1579_vm5, 4294967295, %v1835_v38  ;;  %v4231_v38 = vld [vmem:[%s8027_s1 + $0xf8] sm:$0xff]  ;;  %v1715_v7 = vmul.u32 5, %v1458_v14  ;;  %vm1587_vm10 = vcmp.lt.s32.totalorder %v1458_v14, 0 }
 0x251   :  { %v1331_v19 = vrot.slane %v4231_v38, 7 }
 0x252   :  { %v1843_v33 = vadd.s32 %v4230_v46, %v1715_v7 }
 0x253   :  { %2128 = vperm.xlu1 %4214, %v1961_v35   ;;  %v6004_v29 = vpop.xlane.xlu1 %1175  ;;  %v1713_v35 = vmul.u32 5, %v1456_v37  ;;  %v6020_v8 = vpop.xlane.xlu0 %1070  ;;  %v1460_v60 = vsel %vm1428_vm8, 4294967295, %v1331_v19 }
 0x254   :  { %8139 = vst [vmem:[#allocation72_spill] sm:$0xff] %v6004_v29  ;;  %v1965_v29 = vsel %vm1581_vm6, 4294967295, %v1837_v39  ;;  %8142 = vst [vmem:[#allocation75_spill] sm:$0xff] %v6020_v8  ;;  %v1333_v39 = vrot.slane %v4232_v2, 7  ;;  %v1717_v8 = vmul.u32 5, %v1460_v60  ;;  %vm1589_vm11 = vcmp.lt.s32.totalorder %v1460_v60, 0 }
 0x256   :  { %v1845_v37 = vadd.s32 %v4231_v38, %v1717_v8  ;;  %v4235_v8 = vld [vmem:[%s8027_s1 + $0x138] sm:$0xff] }
 0x257   :  { %2134 = vperm.xlu1 %4214, %v1963_v34   ;;  %v6013_v61 = vpop.xlane.xlu1 %1181  ;;  %v1841_v34 = vadd.s32 %v4229_v62, %v1713_v35  ;;  %v1462_v62 = vsel %vm1428_vm8, 4294967295, %v1333_v39 }
 0x258   :  { %8141 = vst [vmem:[#allocation74_spill] sm:$0xff] %v6013_v61  ;;  %v1967_v61 = vsel %vm1583_vm7, 4294967295, %v1839_v17  ;;  %v4233_v17 = vld [vmem:[%s8027_s1 + $0x118] sm:$0xff]  ;;  %vm1591_vm12 = vcmp.lt.s32.totalorder %v1462_v62, 0 }
 0x259   :  { %v1335_v35 = vrot.slane %v4233_v17, 7 }
 0x25b   :  { %2140 = vperm.xlu1 %4214, %v1965_v29   ;;  %v6022_v22 = vpop.xlane.xlu1 %1187  ;;  %v6031_v29 = vpop.xlane.xlu0 %1076  ;;  %v1464_v46 = vsel %vm1428_vm8, 4294967295, %v1335_v35 }
 0x25c   :  { %8143 = vst [vmem:[#allocation76_spill] sm:$0xff] %v6022_v22  ;;  %8145 = vst [vmem:[#allocation78_spill] sm:$0xff] %v6031_v29  ;;  %v1969_v22 = vsel %vm1585_vm9, 4294967295, %v1841_v34  ;;  %v4234_v34 = vld [vmem:[%s8027_s1 + $0x128] sm:$0xff]  ;;  %v1721_v14 = vmul.u32 5, %v1464_v46  ;;  %vm1593_vm13 = vcmp.lt.s32.totalorder %v1464_v46, 0 }
 0x25d   :  { %v1337_v7 = vrot.slane %v4234_v34, 7 }
 0x25e   :  { %v1849_v60 = vadd.s32 %v4233_v17, %v1721_v14 }
 0x25f   :  { %2146 = vperm.xlu1 %4214, %v1967_v61   ;;  %v6029_v27 = vpop.xlane.xlu1 %1193  ;;  %v1719_v61 = vmul.u32 5, %v1462_v62  ;;  %v6045_v39 = vpop.xlane.xlu0 %1082  ;;  %v1466_v38 = vsel %vm1428_vm8, 4294967295, %v1337_v7 }
 0x260   :  { %8144 = vst [vmem:[#allocation77_spill] sm:$0xff] %v6029_v27  ;;  %v1971_v27 = vsel %vm1587_vm10, 4294967295, %v1843_v33  ;;  %8147 = vst [vmem:[#allocation80_spill] sm:$0xff] %v6045_v39  ;;  %v1339_v33 = vrot.slane %v4235_v8, 7  ;;  %v1723_v39 = vmul.u32 5, %v1466_v38  ;;  %vm1595_vm14 = vcmp.lt.s32.totalorder %v1466_v38, 0 }
 0x262   :  { %v1851_v62 = vadd.s32 %v4234_v34, %v1723_v39  ;;  %v4238_v39 = vld [vmem:[%s8027_s1 + $0x168] sm:$0xff] }
 0x263   :  { %2152 = vperm.xlu1 %4214, %v1969_v22   ;;  %v6038_v19 = vpop.xlane.xlu1 %1199  ;;  %v1847_v22 = vadd.s32 %v4232_v2, %v1719_v61  ;;  %v1468_v2 = vsel %vm1428_vm8, 4294967295, %v1339_v33 }
 0x264   :  { %8146 = vst [vmem:[#allocation79_spill] sm:$0xff] %v6038_v19  ;;  %v1973_v19 = vsel %vm1589_vm11, 4294967295, %v1845_v37  ;;  %v4236_v37 = vld [vmem:[%s8027_s1 + $0x148] sm:$0xff]  ;;  %vm1597_vm15 = vcmp.lt.s32.totalorder %v1468_v2, 0 }
 0x265   :  { %v1341_v61 = vrot.slane %v4236_v37, 7 }
 0x267   :  { %2158 = vperm.xlu1 %4214, %v1971_v27   ;;  %v6047_v29 = vpop.xlane.xlu1 %1205  ;;  %v6056_v27 = vpop.xlane.xlu0 %1088  ;;  %v1470_v17 = vsel %vm1428_vm8, 4294967295, %v1341_v61 }
 0x268   :  { %8148 = vst [vmem:[#allocation81_spill] sm:$0xff] %v6047_v29  ;;  %8150 = vst [vmem:[#allocation83_spill] sm:$0xff] %v6056_v27  ;;  %v1975_v29 = vsel %vm1591_vm12, 4294967295, %v1847_v22  ;;  %v4237_v22 = vld [vmem:[%s8027_s1 + $0x158] sm:$0xff]  ;;  %v1727_v46 = vmul.u32 5, %v1470_v17  ;;  %vm1599_vm0 = vcmp.lt.s32.totalorder %v1470_v17, 0 }
 0x269   :  { %v1343_v14 = vrot.slane %v4237_v22, 7 }
 0x26a   :  { %v1855_v38 = vadd.s32 %v4236_v37, %v1727_v46 }
 0x26b   :  { %2164 = vperm.xlu1 %4214, %v1973_v19   ;;  %v6054_v35 = vpop.xlane.xlu1 %1211  ;;  %v1725_v19 = vmul.u32 5, %v1468_v2  ;;  %v6070_v33 = vpop.xlane.xlu0 %1094  ;;  %v1472_v34 = vsel %vm1428_vm8, 4294967295, %v1343_v14 }
 0x26c   :  { %8149 = vst [vmem:[#allocation82_spill] sm:$0xff] %v6054_v35  ;;  %v1977_v35 = vsel %vm1593_vm13, 4294967295, %v1849_v60  ;;  %8152 = vst [vmem:[#allocation85_spill] sm:$0xff] %v6070_v33  ;;  %v1345_v60 = vrot.slane %v4238_v39, 7  ;;  %v1729_v33 = vmul.u32 5, %v1472_v34  ;;  %vm1601_vm1 = vcmp.lt.s32.totalorder %v1472_v34, 0 }
 0x26e   :  { %v1857_v2 = vadd.s32 %v4237_v22, %v1729_v33  ;;  %v4241_v33 = vld [vmem:[%s8027_s1 + $0x198] sm:$0xff] }
 0x26f   :  { %2170 = vperm.xlu1 %4214, %v1975_v29   ;;  %v6063_v7 = vpop.xlane.xlu1 %1217  ;;  %v1853_v29 = vadd.s32 %v4235_v8, %v1725_v19  ;;  %v1474_v8 = vsel %vm1428_vm8, 4294967295, %v1345_v60 }
 0x270   :  { %8151 = vst [vmem:[#allocation84_spill] sm:$0xff] %v6063_v7  ;;  %v1979_v7 = vsel %vm1595_vm14, 4294967295, %v1851_v62  ;;  %v4239_v62 = vld [vmem:[%s8027_s1 + $0x178] sm:$0xff]  ;;  %vm1603_vm2 = vcmp.lt.s32.totalorder %v1474_v8, 0 }
 0x271   :  { %v1347_v19 = vrot.slane %v4239_v62, 7 }
 0x273   :  { %2176 = vperm.xlu1 %4214, %v1977_v35   ;;  %v6072_v27 = vpop.xlane.xlu1 %1223  ;;  %v6081_v35 = vpop.xlane.xlu0 %1100  ;;  %v1476_v37 = vsel %vm1428_vm8, 4294967295, %v1347_v19 }
 0x274   :  { %8153 = vst [vmem:[#allocation86_spill] sm:$0xff] %v6072_v27  ;;  %8155 = vst [vmem:[#allocation88_spill] sm:$0xff] %v6081_v35  ;;  %v1981_v27 = vsel %vm1597_vm15, 4294967295, %v1853_v29  ;;  %v4240_v29 = vld [vmem:[%s8027_s1 + $0x188] sm:$0xff]  ;;  %v1733_v17 = vmul.u32 5, %v1476_v37  ;;  %vm1605_vm3 = vcmp.lt.s32.totalorder %v1476_v37, 0 }
 0x275   :  { %v1349_v46 = vrot.slane %v4240_v29, 7 }
 0x276   :  { %v1861_v34 = vadd.s32 %v4239_v62, %v1733_v17 }
 0x277   :  { %2182 = vperm.xlu1 %4214, %v1979_v7   ;;  %v6079_v61 = vpop.xlane.xlu1 %1229  ;;  %v1731_v7 = vmul.u32 5, %v1474_v8  ;;  %v6095_v60 = vpop.xlane.xlu0 %1106  ;;  %v1478_v22 = vsel %vm1428_vm8, 4294967295, %v1349_v46 }
 0x278   :  { %8154 = vst [vmem:[#allocation87_spill] sm:$0xff] %v6079_v61  ;;  %v1983_v61 = vsel %vm1599_vm0, 4294967295, %v1855_v38  ;;  %8157 = vst [vmem:[#allocation90_spill] sm:$0xff] %v6095_v60  ;;  %v1351_v38 = vrot.slane %v4241_v33, 7  ;;  %v1735_v60 = vmul.u32 5, %v1478_v22  ;;  %vm1607_vm5 = vcmp.lt.s32.totalorder %v1478_v22, 0 }
 0x27a   :  { %v1863_v8 = vadd.s32 %v4240_v29, %v1735_v60  ;;  %v4244_v60 = vld [vmem:[%s8027_s1 + $0x1c8] sm:$0xff] }
 0x27b   :  { %2188 = vperm.xlu1 %4214, %v1981_v27   ;;  %v6088_v14 = vpop.xlane.xlu1 %1235  ;;  %v1859_v27 = vadd.s32 %v4238_v39, %v1731_v7  ;;  %v1480_v39 = vsel %vm1428_vm8, 4294967295, %v1351_v38 }
 0x27c   :  { %8156 = vst [vmem:[#allocation89_spill] sm:$0xff] %v6088_v14  ;;  %v1985_v14 = vsel %vm1601_vm1, 4294967295, %v1857_v2  ;;  %v4242_v2 = vld [vmem:[%s8027_s1 + $0x1a8] sm:$0xff]  ;;  %vm1609_vm6 = vcmp.lt.s32.totalorder %v1480_v39, 0 }
 0x27d   :  { %v1353_v7 = vrot.slane %v4242_v2, 7 }
 0x27f   :  { %2194 = vperm.xlu1 %4214, %v1983_v61   ;;  %v6097_v35 = vpop.xlane.xlu1 %1241  ;;  %v6106_v61 = vpop.xlane.xlu0 %1112  ;;  %v1482_v62 = vsel %vm1428_vm8, 4294967295, %v1353_v7 }
 0x280   :  { %8158 = vst [vmem:[#allocation91_spill] sm:$0xff] %v6097_v35  ;;  %8160 = vst [vmem:[#allocation93_spill] sm:$0xff] %v6106_v61  ;;  %v1987_v35 = vsel %vm1603_vm2, 4294967295, %v1859_v27  ;;  %v4243_v27 = vld [vmem:[%s8027_s1 + $0x1b8] sm:$0xff]  ;;  %v1739_v37 = vmul.u32 5, %v1482_v62  ;;  %vm1611_vm7 = vcmp.lt.s32.totalorder %v1482_v62, 0 }
 0x281   :  { %v1355_v17 = vrot.slane %v4243_v27, 7 }
 0x282   :  { %v1867_v22 = vadd.s32 %v4242_v2, %v1739_v37 }
 0x283   :  { %2200 = vperm.xlu1 %4214, %v1985_v14   ;;  %v6104_v19 = vpop.xlane.xlu1 %1247  ;;  %v1737_v14 = vmul.u32 5, %v1480_v39  ;;  %v6120_v38 = vpop.xlane.xlu0 %1118  ;;  %v1484_v29 = vsel %vm1428_vm8, 4294967295, %v1355_v17 }
 0x284   :  { %8159 = vst [vmem:[#allocation92_spill] sm:$0xff] %v6104_v19  ;;  %v1989_v19 = vsel %vm1605_vm3, 4294967295, %v1861_v34  ;;  %8162 = vst [vmem:[#allocation95_spill] sm:$0xff] %v6120_v38  ;;  %v1357_v34 = vrot.slane %v4244_v60, 7  ;;  %v1741_v38 = vmul.u32 5, %v1484_v29  ;;  %vm1613_vm9 = vcmp.lt.s32.totalorder %v1484_v29, 0 }
 0x286   :  { %v1869_v39 = vadd.s32 %v4243_v27, %v1741_v38  ;;  %v4247_v38 = vld [vmem:[%s8027_s1 + $0x1f8] sm:$0xff] }
 0x287   :  { %2206 = vperm.xlu1 %4214, %v1987_v35   ;;  %v6113_v46 = vpop.xlane.xlu1 %1253  ;;  %v1865_v35 = vadd.s32 %v4241_v33, %v1737_v14  ;;  %v1486_v33 = vsel %vm1428_vm8, 4294967295, %v1357_v34 }
 0x288   :  { %8161 = vst [vmem:[#allocation94_spill] sm:$0xff] %v6113_v46  ;;  %v1991_v46 = vsel %vm1607_vm5, 4294967295, %v1863_v8  ;;  %v4245_v8 = vld [vmem:[%s8027_s1 + $0x1d8] sm:$0xff]  ;;  %vm1615_vm10 = vcmp.lt.s32.totalorder %v1486_v33, 0 }
 0x289   :  { %v1359_v14 = vrot.slane %v4245_v8, 7 }
 0x28b   :  { %2212 = vperm.xlu1 %4214, %v1989_v19   ;;  %v6122_v61 = vpop.xlane.xlu1 %1259  ;;  %v6131_v19 = vpop.xlane.xlu0 %1124  ;;  %v1488_v2 = vsel %vm1428_vm8, 4294967295, %v1359_v14 }
 0x28c   :  { %8163 = vst [vmem:[#allocation96_spill] sm:$0xff] %v6122_v61  ;;  %8165 = vst [vmem:[#allocation98_spill] sm:$0xff] %v6131_v19  ;;  %v1993_v61 = vsel %vm1609_vm6, 4294967295, %v1865_v35  ;;  %v4246_v35 = vld [vmem:[%s8027_s1 + $0x1e8] sm:$0xff]  ;;  %v1745_v62 = vmul.u32 5, %v1488_v2  ;;  %vm1617_vm11 = vcmp.lt.s32.totalorder %v1488_v2, 0 }
 0x28d   :  { %v1361_v37 = vrot.slane %v4246_v35, 7 }
 0x28e   :  { %v1873_v29 = vadd.s32 %v4245_v8, %v1745_v62 }
 0x28f   :  { %2218 = vperm.xlu1 %4214, %v1991_v46   ;;  %v6129_v7 = vpop.xlane.xlu1 %1265  ;;  %v1743_v46 = vmul.u32 5, %v1486_v33  ;;  %v6145_v34 = vpop.xlane.xlu0 %1130  ;;  %v1490_v27 = vsel %vm1428_vm8, 4294967295, %v1361_v37 }
 0x290   :  { %8164 = vst [vmem:[#allocation97_spill] sm:$0xff] %v6129_v7  ;;  %v1995_v7 = vsel %vm1611_vm7, 4294967295, %v1867_v22  ;;  %8167 = vst [vmem:[#allocation100_spill] sm:$0xff] %v6145_v34  ;;  %v1363_v22 = vrot.slane %v4247_v38, 7  ;;  %v1747_v34 = vmul.u32 5, %v1490_v27  ;;  %vm1619_vm12 = vcmp.lt.s32.totalorder %v1490_v27, 0 }
 0x291   :  { %v142_v27 = vld [vmem:[%s8026_s0 + $0x3f8] sm:$0xff] }
 0x292   :  { %v1875_v33 = vadd.s32 %v4246_v35, %v1747_v34  ;;  %v4250_v34 = vld [vmem:[%s8027_s1 + $0x228] sm:$0xff] }
 0x293   :  { %2224 = vperm.xlu1 %4214, %v1993_v61   ;;  %v6138_v17 = vpop.xlane.xlu1 %1271  ;;  %v1871_v61 = vadd.s32 %v4244_v60, %v1743_v46  ;;  %v1492_v60 = vsel %vm1428_vm8, 4294967295, %v1363_v22 }
 0x294   :  { %8166 = vst [vmem:[#allocation99_spill] sm:$0xff] %v6138_v17  ;;  %v1997_v17 = vsel %vm1613_vm9, 4294967295, %v1869_v39  ;;  %v4248_v39 = vld [vmem:[%s8027_s1 + $0x208] sm:$0xff]  ;;  %vm1621_vm13 = vcmp.lt.s32.totalorder %v1492_v60, 0 }
 0x295   :  { %v1365_v46 = vrot.slane %v4248_v39, 7 }
 0x297   :  { %2230 = vperm.xlu1 %4214, %v1995_v7   ;;  %v6147_v19 = vpop.xlane.xlu1 %1277  ;;  %v6156_v7 = vpop.xlane.xlu0 %1136  ;;  %v1494_v8 = vsel %vm1428_vm8, 4294967295, %v1365_v46 }
 0x298   :  { %8168 = vst [vmem:[#allocation101_spill] sm:$0xff] %v6147_v19  ;;  %8170 = vst [vmem:[#allocation103_spill] sm:$0xff] %v6156_v7  ;;  %v1999_v19 = vsel %vm1615_vm10, 4294967295, %v1871_v61  ;;  %v4249_v61 = vld [vmem:[%s8027_s1 + $0x218] sm:$0xff]  ;;  %v1751_v2 = vmul.u32 5, %v1494_v8  ;;  %vm1623_vm15 = vcmp.lt.s32.totalorder %v1494_v8, 0 }
 0x299   :  { %v1367_v62 = vrot.slane %v4249_v61, 7  ;;  %v4253_v8 = vld [vmem:[%s8027_s1 + $0x8] sm:$0xff] }
 0x29a   :  { %v1879_v46 = vadd.s32 %v4248_v39, %v1751_v2 }
 0x29b   :  { %2236 = vperm.xlu1 %4214, %v1997_v17   ;;  %v6154_v14 = vpop.xlane.xlu1 %1283  ;;  %v1749_v17 = vmul.u32 5, %v1492_v60  ;;  %v6170_v22 = vpop.xlane.xlu0 %1142  ;;  %v1496_v35 = vsel %vm1428_vm8, 4294967295, %v1367_v62  ;;  %v4251_v60 = vld [vmem:[%s8027_s1 + $0x238] sm:$0xff] }
 0x29c   :  { %8169 = vst [vmem:[#allocation102_spill] sm:$0xff] %v6154_v14  ;;  %v2001_v14 = vsel %vm1617_vm11, 4294967295, %v1873_v29  ;;  %8172 = vst [vmem:[#allocation105_spill] sm:$0xff] %v6170_v22  ;;  %v1369_v29 = vrot.slane %v4250_v34, 7  ;;  %v1371_v62 = vrot.slane %v4251_v60, 7  ;;  %vm1625_vm0 = vcmp.lt.s32.totalorder %v1496_v35, 0 }
 0x29f   :  { %2242 = vperm.xlu1 %4214, %v1999_v19   ;;  %v6163_v37 = vpop.xlane.xlu1 %1289  ;;  %v1877_v19 = vadd.s32 %v4247_v38, %v1749_v17  ;;  %v6182_v38 = vpop.xlane.xlu0 %1148  ;;  %v1498_v17 = vsel %vm1428_vm8, 4294967295, %v1369_v29  ;;  %v4252_v29 = vld [vmem:[%s8027_s1 + $0x248] sm:$0xff] }
 0x2a0   :  { %8171 = vst [vmem:[#allocation104_spill] sm:$0xff] %v6163_v37  ;;  %v2003_v37 = vsel %vm1619_vm12, 4294967295, %v1875_v33  ;;  %8174 = vst [vmem:[#allocation107_spill] sm:$0xff] %v6182_v38  ;;  %v1755_v38 = vmul.u32 5, %v1498_v17  ;;  %v1373_v10 = vrot.slane %v4252_v29, 7 }
 0x2a1   :  { %v2005_v33 = vsel %vm1621_vm13, 4294967295, %v1877_v19  ;;  %v1500_v19 = vsel %vm1428_vm8, 4294967295, %v1371_v62 }
 0x2a2   :  { %v1502_v62 = vsel %vm1428_vm8, 4294967295, %v1373_v10  ;;  %vm1629_vm1 = vcmp.lt.s32.totalorder %v1500_v19, 0 }
 0x2a3   :  { %2248 = vperm.xlu1 %4214, %v2001_v14   ;;  %v6172_v7 = vpop.xlane.xlu1 %1295  ;;  %vm1631_vm2 = vcmp.lt.s32.totalorder %v1502_v62, 0 }
 0x2a4   :  { %8173 = vst [vmem:[#allocation106_spill] sm:$0xff] %v6172_v7  ;;  %v1753_v7 = vmul.u32 5, %v1496_v35  ;;  %v4254_v35 = vld [vmem:[%s8027_s1 + $0x258] sm:$0xff] }
 0x2a6   :  { %v1881_v2 = vadd.s32 %v4249_v61, %v1753_v7  ;;  %v1883_v61 = vadd.s32 %v4250_v34, %v1755_v38 }
 0x2a7   :  { %2254 = vperm.xlu1 %4214, %v2003_v37   ;;  %v658_v14 = vpop.permute.xlu1 %657 }
 0x2a8   :  { %vm786_vm14 = vcmp.eq.s32.totalorder %v4918_v49, %v658_v14  ;;  %v2007_v14 = vsel %vm1623_vm15, 4294967295, %v1879_v46  ;;  %v1757_v46 = vmul.u32 5, %v1500_v19  ;;  %v4258_v19 = vld [vmem:[%s8027_s1 + $0x278] sm:$0xff] }
 0x2a9   :  { %v914_v22 = vsel %vm786_vm14, %v142_v27, 0.0  ;;  %v6198_v27 = vpop.xlane.xlu0 %1154  ;;  %v1379_v56 = vrot.slane %v4258_v19, 7 }
 0x2aa   :  { %v1297_v37 = vsel %vm915_vm4, %v914_v22, 0.0  ;;  %8175 = vst [vmem:[#allocation108_spill] sm:$0xff] %v6198_v27  ;;  %v1301_v22 = vrot.slane %v4253_v8, 7  ;;  %vm1627_vm4 = vcmp.lt.s32.totalorder %v1498_v17, 0  ;;  %v1885_v38 = vadd.s32 %v4251_v60, %v1757_v46  ;;  %v4256_v17 = vld [vmem:[%s8027_s1 + $0x268] sm:$0xff]  ;;  %v4257_v60 = vld [vmem:[%s8027_s1 + $0x30] sm:$0xff] }
 0x2ab   :  { %2260 = vperm.xlu1 %4214, %v2005_v33   ;;  %v6191_v39 = vpop.permute.xlu1 %2071  ;;  %1298 = vadd.xlane.f32.xlu0 %v1297_v37  ;;  %v2009_v33 = vsel %vm1625_vm0, 4294967295, %v1881_v2  ;;  %v1375_v37 = vrot.slane %v4254_v35, 7  ;;  %v1759_v2 = vmul.u32 5, %v1502_v62  ;;  %v2011_v1 = vsel %vm1627_vm4, 4294967295, %v1883_v61 }
 0x2ac   :  { %v1430_v27 = vsel %vm1428_vm8, 4294967295, %v1301_v22  ;;  %v1377_v22 = vrot.slane %v4256_v17, 7  ;;  %v1306_v46 = vrot.slane %v4257_v60, 7  ;;  %v2013_v48 = vsel %vm1629_vm1, 4294967295, %v1885_v38 }
 0x2ad   :  { %v6217_v10 = vpop.xlane.xlu0 %1160  ;;  %v1504_v6 = vsel %vm1428_vm8, 4294967295, %v1375_v37  ;;  %v1687_v41 = vmul.u32 5, %v1430_v27  ;;  %vm1559_vm3 = vcmp.lt.s32.totalorder %v1430_v27, 0  ;;  %v4261_v27 = vld [vmem:[%s8027_s1 + $0x50] sm:$0xff] }
 0x2ae   :  { %8176 = vst [vmem:[#allocation109_spill] sm:$0xff] %v6217_v10  ;;  %v1887_v10 = vadd.s32 %v4252_v29, %v1759_v2  ;;  %v1761_v37 = vmul.u32 5, %v1504_v6  ;;  %v1506_v47 = vsel %vm1428_vm8, 4294967295, %v1377_v22  ;;  %v4259_v29 = vld [vmem:[%s8027_s1 + $0x40] sm:$0xff]  ;;  %vm1633_vm5 = vcmp.lt.s32.totalorder %v1504_v6, 0 }
 0x2af   :  { %2266 = vperm.xlu1 %4214, %v2007_v14   ;;  %v6203_v7 = vpop.permute.xlu1 %2077  ;;  %v4255_v14 = vld [vmem:[%s8027_s1 + $0x20] sm:$0xff]  ;;  %v1308_v38 = vrot.slane %v4259_v29, 7  ;;  %v1763_v23 = vmul.u32 5, %v1506_v47  ;;  %vm1635_vm7 = vcmp.lt.s32.totalorder %v1506_v47, 0 }
 0x2b0   :  { %v1304_v3 = vrot.slane %v4255_v14, 7  ;;  %v1889_v22 = vadd.s32 %v4254_v35, %v1761_v37  ;;  %v2015_v45 = vsel %vm1631_vm2, 4294967295, %v1887_v10  ;;  %v1310_v35 = vrot.slane %v4261_v27, 7 }
 0x2b1   :  { %v6236_v30 = vpop.xlane.xlu0 %1166 }
 0x2b2   :  { %8177 = vst [vmem:[#allocation110_spill] sm:$0xff] %v6236_v30  ;;  %v2017_v6 = vsel %vm1633_vm5, 4294967295, %v1889_v22 }
 0x2b3   :  { %2272 = vperm.xlu1 %4214, %v2009_v33   ;;  %v6215_v34 = vpop.permute.xlu1 %2080  ;;  %v1433_v33 = vsel %vm1428_vm8, 4294967295, %v1304_v3  ;;  %v1815_v3 = vadd.s32 %v4253_v8, %v1687_v41  ;;  %v1508_v41 = vsel %vm1428_vm8, 4294967295, %v1379_v56  ;;  %v4260_v8 = vld [vmem:[%s8027_s1 + $0x288] sm:$0xff]  ;;  %v1891_v56 = vadd.s32 %v4256_v17, %v1763_v23  ;;  %v4263_v17 = vld [vmem:[%s8027_s1 + $0x60] sm:$0xff] }
 0x2b4   :  { %v1690_v40 = vmul.u32 5, %v1433_v33  ;;  %v1381_v62 = vrot.slane %v4260_v8, 7  ;;  %vm1562_vm6 = vcmp.lt.s32.totalorder %v1433_v33, 0  ;;  %v1765_v37 = vmul.u32 5, %v1508_v41 }
 0x2b5   :  { %v1943_v15 = vsel %vm1559_vm3, 4294967295, %v1815_v3  ;;  %v6257_v53 = vpop.xlane.xlu0 %1172  ;;  %v1439_v23 = vsel %vm1428_vm8, 4294967295, %v1310_v35  ;;  %v1312_v33 = vrot.slane %v4263_v17, 7  ;;  %v2019_v43 = vsel %vm1635_vm7, 4294967295, %v1891_v56 }
 0x2b6   :  { %8178 = vst [vmem:[#allocation111_spill] sm:$0xff] %v6257_v53  ;;  %vm1637_vm10 = vcmp.lt.s32.totalorder %v1508_v41, 0  ;;  %vm1568_vm13 = vcmp.lt.s32.totalorder %v1439_v23, 0 }
 0x2b7   :  { %2278 = vperm.xlu1 %4214, %v2011_v1   ;;  %v6229_v61 = vpop.permute.xlu1 %2086  ;;  %v1435_v1 = vsel %vm1428_vm8, 4294967295, %v1306_v46  ;;  %v1818_v46 = vadd.s32 %v4255_v14, %v1690_v40  ;;  %v1510_v40 = vsel %vm1428_vm8, 4294967295, %v1381_v62  ;;  %v4262_v14 = vld [vmem:[%s8027_s1 + $0x298] sm:$0xff]  ;;  %v1893_v62 = vadd.s32 %v4258_v19, %v1765_v37 }
 0x2b8   :  { %v1692_v30 = vmul.u32 5, %v1435_v1  ;;  %v1383_v3 = vrot.slane %v4262_v14, 7  ;;  %vm1564_vm9 = vcmp.lt.s32.totalorder %v1435_v1, 0  ;;  %v1767_v53 = vmul.u32 5, %v1510_v40  ;;  %v4265_v1 = vld [vmem:[%s8027_s1 + $0x70] sm:$0xff] }
 0x2b9   :  { %v1946_v20 = vsel %vm1562_vm6, 4294967295, %v1818_v46  ;;  %v1696_v46 = vmul.u32 5, %v1439_v23  ;;  %v6276_v35 = vpop.xlane.xlu0 %1178  ;;  %v1441_v19 = vsel %vm1428_vm8, 4294967295, %v1312_v33  ;;  %v1314_v56 = vrot.slane %v4265_v1, 7  ;;  %v4269_v23 = vld [vmem:[%s8027_s1 + $0x90] sm:$0xff] }
 0x2ba   :  { %8179 = vst [vmem:[#allocation112_spill] sm:$0xff] %v6276_v35  ;;  %v2021_v41 = vsel %vm1637_vm10, 4294967295, %v1893_v62  ;;  %vm1639_vm12 = vcmp.lt.s32.totalorder %v1510_v40, 0  ;;  %v1698_v35 = vmul.u32 5, %v1441_v19  ;;  %vm1570_vm15 = vcmp.lt.s32.totalorder %v1441_v19, 0  ;;  %v4271_v19 = vld [vmem:[%s8027_s1 + $0xa0] sm:$0xff] }
 0x2bb   :  { %2284 = vperm.xlu1 %4214, %v2013_v48   ;;  %v6243_v2 = vpop.permute.xlu1 %2092  ;;  %v1437_v48 = vsel %vm1428_vm8, 4294967295, %v1308_v38  ;;  %v1820_v38 = vadd.s32 %v4257_v60, %v1692_v30  ;;  %v4264_v30 = vld [vmem:[%s8027_s1 + $0x2a8] sm:$0xff]  ;;  %v1824_v33 = vadd.s32 %v4261_v27, %v1696_v46 }
 0x2bc   :  { %v1385_v47 = vrot.slane %v4264_v30, 7  ;;  %vm1566_vm11 = vcmp.lt.s32.totalorder %v1437_v48, 0 }
 0x2bd   :  { %v6297_v44 = vpop.xlane.xlu0 %1184 }
 0x2be   :  { %8180 = vst [vmem:[#allocation113_spill] sm:$0xff] %v6297_v44 }
 0x2bf   :  { %2290 = vperm.xlu1 %4214, %v2015_v45   ;;  %v6255_v10 = vpop.permute.xlu1 %2098  ;;  %v1694_v45 = vmul.u32 5, %v1437_v48 }
 0x2c1   :  { %2074 = vperm.xlu0 %4213, %v1943_v15   ;;  %v1512_v15 = vsel %vm1428_vm8, 4294967295, %v1383_v3  ;;  %v1822_v60 = vadd.s32 %v4259_v29, %v1694_v45  ;;  %v1895_v3 = vadd.s32 %v4260_v8, %v1767_v53  ;;  %v1514_v29 = vsel %vm1428_vm8, 4294967295, %v1385_v47  ;;  %v4267_v53 = vld [vmem:[%s8027_s1 + $0x80] sm:$0xff] }
 0x2c2   :  { %v1316_v8 = vrot.slane %v4267_v53, 7  ;;  %v1771_v47 = vmul.u32 5, %v1514_v29  ;;  %vm1641_vm14 = vcmp.lt.s32.totalorder %v1512_v15, 0  ;;  %vm1643_vm0 = vcmp.lt.s32.totalorder %v1514_v29, 0 }
 0x2c3   :  { %2296 = vperm.xlu1 %4214, %v2017_v6   ;;  %v6269_v22 = vpop.permute.xlu1 %2104  ;;  %v1948_v6 = vsel %vm1564_vm9, 4294967295, %v1820_v38  ;;  %v4266_v38 = vld [vmem:[%s8027_s1 + $0x2b8] sm:$0xff]  ;;  %v1950_v52 = vsel %vm1566_vm11, 4294967295, %v1822_v60  ;;  %v2023_v40 = vsel %vm1639_vm12, 4294967295, %v1895_v3  ;;  %v4268_v60 = vld [vmem:[%s8027_s1 + $0x2c8] sm:$0xff]  ;;  %v1318_v3 = vrot.slane %v4269_v23, 7 }
 0x2c4   :  { %v1387_v45 = vrot.slane %v4266_v38, 7  ;;  %v1389_v46 = vrot.slane %v4268_v60, 7 }
 0x2c5   :  { %2083 = vperm.xlu0 %4213, %v1946_v20   ;;  %v1769_v20 = vmul.u32 5, %v1512_v15 }
 0x2c6   :  { %v1516_v27 = vsel %vm1428_vm8, 4294967295, %v1387_v45  ;;  %v1899_v45 = vadd.s32 %v4264_v30, %v1771_v47  ;;  %v1447_v30 = vsel %vm1428_vm8, 4294967295, %v1318_v3 }
 0x2c7   :  { %2302 = vperm.xlu1 %4214, %v2019_v43   ;;  %v6283_v37 = vpop.permute.xlu1 %2110  ;;  %v1443_v43 = vsel %vm1428_vm8, 4294967295, %v1314_v56  ;;  %v1897_v62 = vadd.s32 %v4262_v14, %v1769_v20  ;;  %v1445_v14 = vsel %vm1428_vm8, 4294967295, %v1316_v8  ;;  %v1773_v44 = vmul.u32 5, %v1516_v27  ;;  %v6316_v8 = vpop.xlane.xlu0 %1190 }
 0x2c8   :  { %v1700_v56 = vmul.u32 5, %v1443_v43  ;;  %8181 = vst [vmem:[#allocation114_spill] sm:$0xff] %v6316_v8  ;;  %vm1572_vm4 = vcmp.lt.s32.totalorder %v1443_v43, 0  ;;  %v2027_v29 = vsel %vm1643_vm0, 4294967295, %v1899_v45  ;;  %vm1645_vm1 = vcmp.lt.s32.totalorder %v1516_v27, 0 }
 0x2c9   :  { %2089 = vperm.xlu0 %4213, %v1948_v6   ;;  %v1826_v6 = vadd.s32 %v4263_v17, %v1698_v35  ;;  %v2025_v36 = vsel %vm1641_vm14, 4294967295, %v1897_v62  ;;  %v4270_v17 = vld [vmem:[%s8027_s1 + $0x2d8] sm:$0xff]  ;;  %v1320_v62 = vrot.slane %v4271_v19, 7  ;;  %v1704_v8 = vmul.u32 5, %v1447_v30 }
 0x2ca   :  { %v1391_v15 = vrot.slane %v4270_v17, 7  ;;  %v1828_v35 = vadd.s32 %v4265_v1, %v1700_v56  ;;  %vm1574_vm2 = vcmp.lt.s32.totalorder %v1445_v14, 0  ;;  %vm1576_vm5 = vcmp.lt.s32.totalorder %v1447_v30, 0  ;;  %v4277_v30 = vld [vmem:[%s8027_s1 + $0xd0] sm:$0xff] }
 0x2cb   :  { %2308 = vperm.xlu1 %4214, %v2021_v41   ;;  %v6295_v48 = vpop.permute.xlu1 %2116  ;;  %v1952_v41 = vsel %vm1568_vm13, 4294967295, %v1824_v33  ;;  %v1702_v33 = vmul.u32 5, %v1445_v14  ;;  %v6337_v11 = vpop.xlane.xlu0 %1196  ;;  %v4275_v14 = vld [vmem:[%s8027_s1 + $0xc0] sm:$0xff] }
 0x2cc   :  { %v1520_v1 = vsel %vm1428_vm8, 4294967295, %v1391_v15  ;;  %v1956_v55 = vsel %vm1572_vm4, 4294967295, %v1828_v35  ;;  %8182 = vst [vmem:[#allocation115_spill] sm:$0xff] %v6337_v11  ;;  %v4274_v35 = vld [vmem:[%s8027_s1 + $0x2f8] sm:$0xff] }
 0x2cd   :  { %2095 = vperm.xlu0 %4213, %v1950_v52   ;;  %v1518_v52 = vsel %vm1428_vm8, 4294967295, %v1389_v46  ;;  %v1901_v46 = vadd.s32 %v4266_v38, %v1773_v44  ;;  %v1830_v3 = vadd.s32 %v4267_v53, %v1702_v33  ;;  %v4273_v44 = vld [vmem:[%s8027_s1 + $0xb0] sm:$0xff]  ;;  %v1777_v15 = vmul.u32 5, %v1520_v1 }
 0x2ce   :  { %v1322_v38 = vrot.slane %v4273_v44, 7  ;;  %v1395_v33 = vrot.slane %v4274_v35, 7  ;;  %vm1647_vm3 = vcmp.lt.s32.totalorder %v1518_v52, 0  ;;  %vm1649_vm6 = vcmp.lt.s32.totalorder %v1520_v1, 0 }
 0x2cf   :  { %2314 = vperm.xlu1 %4214, %v2023_v40   ;;  %v6309_v20 = vpop.permute.xlu1 %2122  ;;  %v1954_v40 = vsel %vm1570_vm15, 4294967295, %v1826_v6  ;;  %v4272_v6 = vld [vmem:[%s8027_s1 + $0x2e8] sm:$0xff]  ;;  %v2029_v27 = vsel %vm1645_vm1, 4294967295, %v1901_v46  ;;  %v1324_v46 = vrot.slane %v4275_v14, 7 }
 0x2d0   :  { %v1393_v56 = vrot.slane %v4272_v6, 7 }
 0x2d1   :  { %2101 = vperm.xlu0 %4213, %v1952_v41   ;;  %v1775_v41 = vmul.u32 5, %v1518_v52 }
 0x2d2   :  { %v1522_v53 = vsel %vm1428_vm8, 4294967295, %v1393_v56  ;;  %v1905_v56 = vadd.s32 %v4270_v17, %v1777_v15  ;;  %v1453_v17 = vsel %vm1428_vm8, 4294967295, %v1324_v46 }
 0x2d3   :  { %2320 = vperm.xlu1 %4214, %v2025_v36   ;;  %v6323_v47 = vpop.permute.xlu1 %2128  ;;  %v1449_v36 = vsel %vm1428_vm8, 4294967295, %v1320_v62  ;;  %v1903_v45 = vadd.s32 %v4268_v60, %v1775_v41  ;;  %v1451_v60 = vsel %vm1428_vm8, 4294967295, %v1322_v38  ;;  %v1779_v11 = vmul.u32 5, %v1522_v53  ;;  %v6356_v38 = vpop.xlane.xlu0 %1202 }
 0x2d4   :  { %v1706_v62 = vmul.u32 5, %v1449_v36  ;;  %8183 = vst [vmem:[#allocation116_spill] sm:$0xff] %v6356_v38  ;;  %vm1578_vm7 = vcmp.lt.s32.totalorder %v1449_v36, 0  ;;  %v2033_v1 = vsel %vm1649_vm6, 4294967295, %v1905_v56  ;;  %vm1651_vm9 = vcmp.lt.s32.totalorder %v1522_v53, 0 }
 0x2d5   :  { %2107 = vperm.xlu0 %4213, %v1954_v40   ;;  %v1832_v40 = vadd.s32 %v4269_v23, %v1704_v8  ;;  %v2031_v32 = vsel %vm1647_vm3, 4294967295, %v1903_v45  ;;  %v4276_v23 = vld [vmem:[%s8027_s1 + $0x308] sm:$0xff]  ;;  %v1326_v45 = vrot.slane %v4277_v30, 7  ;;  %v1710_v38 = vmul.u32 5, %v1453_v17 }
 0x2d6   :  { %v1397_v52 = vrot.slane %v4276_v23, 7  ;;  %v1834_v8 = vadd.s32 %v4271_v19, %v1706_v62  ;;  %vm1580_vm10 = vcmp.lt.s32.totalorder %v1451_v60, 0  ;;  %vm1582_vm12 = vcmp.lt.s32.totalorder %v1453_v17, 0  ;;  %v4283_v17 = vld [vmem:[%s8027_s1 + $0x100] sm:$0xff] }
 0x2d7   :  { %2326 = vperm.xlu1 %4214, %v2027_v29   ;;  %v6335_v43 = vpop.permute.xlu1 %2134  ;;  %v1958_v29 = vsel %vm1574_vm2, 4294967295, %v1830_v3  ;;  %v1708_v3 = vmul.u32 5, %v1451_v60  ;;  %v6377_v50 = vpop.xlane.xlu0 %1208  ;;  %v4281_v60 = vld [vmem:[%s8027_s1 + $0xf0] sm:$0xff] }
 0x2d8   :  { %v1526_v19 = vsel %vm1428_vm8, 4294967295, %v1397_v52  ;;  %v1962_v28 = vsel %vm1578_vm7, 4294967295, %v1834_v8  ;;  %8184 = vst [vmem:[#allocation117_spill] sm:$0xff] %v6377_v50 }
 0x2d9   :  { %2113 = vperm.xlu0 %4213, %v1956_v55   ;;  %v1524_v55 = vsel %vm1428_vm8, 4294967295, %v1395_v33  ;;  %v1907_v33 = vadd.s32 %v4272_v6, %v1779_v11  ;;  %v1836_v46 = vadd.s32 %v4273_v44, %v1708_v3  ;;  %v4279_v11 = vld [vmem:[%s8027_s1 + $0xe0] sm:$0xff]  ;;  %v1783_v52 = vmul.u32 5, %v1526_v19  ;;  %v4280_v44 = vld [vmem:[%s8027_s1 + $0x328] sm:$0xff] }
 0x2da   :  { %v1328_v6 = vrot.slane %v4279_v11, 7  ;;  %v1401_v8 = vrot.slane %v4280_v44, 7  ;;  %vm1653_vm11 = vcmp.lt.s32.totalorder %v1524_v55, 0  ;;  %vm1655_vm13 = vcmp.lt.s32.totalorder %v1526_v19, 0 }
 0x2db   :  { %2332 = vperm.xlu1 %4214, %v2029_v27   ;;  %v6349_v41 = vpop.permute.xlu1 %2140  ;;  %v1960_v27 = vsel %vm1576_vm5, 4294967295, %v1832_v40  ;;  %v4278_v40 = vld [vmem:[%s8027_s1 + $0x318] sm:$0xff]  ;;  %v2035_v53 = vsel %vm1651_vm9, 4294967295, %v1907_v33  ;;  %v1330_v33 = vrot.slane %v4281_v60, 7  ;;  %v6396_v59 = vpop.xlane.xlu0 %1214 }
 0x2dc   :  { %v1399_v62 = vrot.slane %v4278_v40, 7  ;;  %8185 = vst [vmem:[#allocation118_spill] sm:$0xff] %v6396_v59 }
 0x2dd   :  { %2119 = vperm.xlu0 %4213, %v1958_v29   ;;  %v1781_v29 = vmul.u32 5, %v1524_v55 }
 0x2de   :  { %v1528_v3 = vsel %vm1428_vm8, 4294967295, %v1399_v62  ;;  %v1530_v62 = vsel %vm1428_vm8, 4294967295, %v1401_v8 }
 0x2df   :  { %2338 = vperm.xlu1 %4214, %v2031_v32   ;;  %v6363_v15 = vpop.permute.xlu1 %2146  ;;  %v1455_v32 = vsel %vm1428_vm8, 4294967295, %v1326_v45  ;;  %v1909_v56 = vadd.s32 %v4274_v35, %v1781_v29  ;;  %v1457_v35 = vsel %vm1428_vm8, 4294967295, %v1328_v6  ;;  %v1785_v50 = vmul.u32 5, %v1528_v3 }
 0x2e0   :  { %v1712_v45 = vmul.u32 5, %v1455_v32  ;;  %v1714_v6 = vmul.u32 5, %v1457_v35  ;;  %vm1584_vm14 = vcmp.lt.s32.totalorder %v1455_v32, 0  ;;  %vm1657_vm15 = vcmp.lt.s32.totalorder %v1528_v3, 0 }
 0x2e1   :  { %2125 = vperm.xlu0 %4213, %v1960_v27   ;;  %v1838_v27 = vadd.s32 %v4275_v14, %v1710_v38  ;;  %v2037_v55 = vsel %vm1653_vm11, 4294967295, %v1909_v56  ;;  %v4282_v14 = vld [vmem:[%s8027_s1 + $0x338] sm:$0xff]  ;;  %v1332_v56 = vrot.slane %v4283_v17, 7  ;;  %v1787_v8 = vmul.u32 5, %v1530_v62 }
 0x2e2   :  { %v1403_v38 = vrot.slane %v4282_v14, 7  ;;  %vm1586_vm0 = vcmp.lt.s32.totalorder %v1457_v35, 0  ;;  %vm1659_vm4 = vcmp.lt.s32.totalorder %v1530_v62, 0 }
 0x2e3   :  { %2344 = vperm.xlu1 %4214, %v2033_v1   ;;  %v6375_v36 = vpop.permute.xlu1 %2152  ;;  %v1964_v1 = vsel %vm1580_vm10, 4294967295, %v1836_v46  ;;  %v1840_v46 = vadd.s32 %v4277_v30, %v1712_v45  ;;  %v4284_v30 = vld [vmem:[%s8027_s1 + $0x348] sm:$0xff] }
 0x2e4   :  { %v1532_v45 = vsel %vm1428_vm8, 4294967295, %v1403_v38 }
 0x2e5   :  { %2131 = vperm.xlu0 %4213, %v1962_v28   ;;  %v1911_v28 = vadd.s32 %v4276_v23, %v1783_v52  ;;  %v1459_v23 = vsel %vm1428_vm8, 4294967295, %v1330_v33  ;;  %v1842_v33 = vadd.s32 %v4279_v11, %v1714_v6  ;;  %v1968_v31 = vsel %vm1584_vm14, 4294967295, %v1840_v46  ;;  %v4286_v11 = vld [vmem:[%s8027_s1 + $0x358] sm:$0xff] }
 0x2e6   :  { %v1716_v59 = vmul.u32 5, %v1459_v23  ;;  %v1789_v38 = vmul.u32 5, %v1532_v45  ;;  %v1407_v46 = vrot.slane %v4286_v11, 7  ;;  %vm1588_vm1 = vcmp.lt.s32.totalorder %v1459_v23, 0 }
 0x2e7   :  { %2350 = vperm.xlu1 %4214, %v2035_v53   ;;  %v6389_v29 = vpop.permute.xlu1 %2158  ;;  %v1966_v53 = vsel %vm1582_vm12, 4294967295, %v1838_v27  ;;  %v2039_v19 = vsel %vm1655_vm13, 4294967295, %v1911_v28  ;;  %v1405_v27 = vrot.slane %v4284_v30, 7  ;;  %v6417_v28 = vpop.xlane.xlu0 %1220  ;;  %v1970_v26 = vsel %vm1586_vm0, 4294967295, %v1842_v33 }
 0x2e8   :  { %8186 = vst [vmem:[#allocation119_spill] sm:$0xff] %v6417_v28  ;;  %v1917_v62 = vadd.s32 %v4282_v14, %v1789_v38  ;;  %vm1661_vm2 = vcmp.lt.s32.totalorder %v1532_v45, 0  ;;  %v4289_v14 = vld [vmem:[%s8027_s1 + $0x130] sm:$0xff] }
 0x2e9   :  { %2137 = vperm.xlu0 %4213, %v1964_v1   ;;  %v1913_v1 = vadd.s32 %v4278_v40, %v1785_v50  ;;  %v4285_v50 = vld [vmem:[%s8027_s1 + $0x110] sm:$0xff]  ;;  %v1534_v6 = vsel %vm1428_vm8, 4294967295, %v1405_v27  ;;  %v1536_v27 = vsel %vm1428_vm8, 4294967295, %v1407_v46 }
 0x2ea   :  { %v1334_v40 = vrot.slane %v4285_v50, 7  ;;  %v1791_v28 = vmul.u32 5, %v1534_v6  ;;  %v1793_v46 = vmul.u32 5, %v1536_v27  ;;  %vm1663_vm5 = vcmp.lt.s32.totalorder %v1534_v6, 0 }
 0x2eb   :  { %2356 = vperm.xlu1 %4214, %v2037_v55   ;;  %v6403_v52 = vpop.permute.xlu1 %2164  ;;  %v1461_v55 = vsel %vm1428_vm8, 4294967295, %v1332_v56  ;;  %v2041_v3 = vsel %vm1657_vm15, 4294967295, %v1913_v1  ;;  %v1844_v56 = vadd.s32 %v4281_v60, %v1716_v59  ;;  %v4288_v59 = vld [vmem:[%s8027_s1 + $0x368] sm:$0xff]  ;;  %v6436_v21 = vpop.xlane.xlu0 %1226  ;;  %vm1665_vm7 = vcmp.lt.s32.totalorder %v1536_v27, 0 }
 0x2ec   :  { %v1463_v35 = vsel %vm1428_vm8, 4294967295, %v1334_v40  ;;  %v1409_v60 = vrot.slane %v4288_v59, 7  ;;  %8187 = vst [vmem:[#allocation120_spill] sm:$0xff] %v6436_v21  ;;  %vm1590_vm3 = vcmp.lt.s32.totalorder %v1461_v55, 0  ;;  %v1919_v45 = vadd.s32 %v4284_v30, %v1791_v28  ;;  %v4291_v30 = vld [vmem:[%s8027_s1 + $0x140] sm:$0xff] }
 0x2ed   :  { %2143 = vperm.xlu0 %4213, %v1966_v53   ;;  %v1915_v53 = vadd.s32 %v4280_v44, %v1787_v8  ;;  %v4287_v44 = vld [vmem:[%s8027_s1 + $0x120] sm:$0xff]  ;;  %v1720_v40 = vmul.u32 5, %v1463_v35  ;;  %vm1592_vm6 = vcmp.lt.s32.totalorder %v1463_v35, 0 }
 0x2ee   :  { %v1336_v1 = vrot.slane %v4287_v44, 7  ;;  %v2047_v6 = vsel %vm1663_vm5, 4294967295, %v1919_v45 }
 0x2ef   :  { %2362 = vperm.xlu1 %4214, %v2039_v19   ;;  %v6415_v32 = vpop.permute.xlu1 %2170  ;;  %v1718_v19 = vmul.u32 5, %v1461_v55  ;;  %v1340_v55 = vrot.slane %v4291_v30, 7 }
 0x2f0   :  { %v1465_v23 = vsel %vm1428_vm8, 4294967295, %v1336_v1  ;;  %v1848_v1 = vadd.s32 %v4285_v50, %v1720_v40  ;;  %v4292_v50 = vld [vmem:[%s8027_s1 + $0x388] sm:$0xff] }
 0x2f1   :  { %2149 = vperm.xlu0 %4213, %v1968_v31   ;;  %v2043_v31 = vsel %vm1659_vm4, 4294967295, %v1915_v53  ;;  %v1846_v33 = vadd.s32 %v4283_v17, %v1718_v19  ;;  %v1338_v53 = vrot.slane %v4289_v14, 7  ;;  %v4290_v17 = vld [vmem:[%s8027_s1 + $0x378] sm:$0xff]  ;;  %v1538_v19 = vsel %vm1428_vm8, 4294967295, %v1409_v60 }
 0x2f2   :  { %v1722_v21 = vmul.u32 5, %v1465_v23  ;;  %v1795_v60 = vmul.u32 5, %v1538_v19  ;;  %v1976_v0 = vsel %vm1592_vm6, 4294967295, %v1848_v1  ;;  %v1469_v35 = vsel %vm1428_vm8, 4294967295, %v1340_v55 }
 0x2f3   :  { %2368 = vperm.xlu1 %4214, %v2041_v3   ;;  %v6429_v8 = vpop.permute.xlu1 %2176  ;;  %v1972_v3 = vsel %vm1588_vm1, 4294967295, %v1844_v56  ;;  %v1411_v56 = vrot.slane %v4290_v17, 7  ;;  %v1974_v18 = vsel %vm1590_vm3, 4294967295, %v1846_v33  ;;  %v1413_v33 = vrot.slane %v4292_v50, 7 }
 0x2f4   :  { %vm1594_vm9 = vcmp.lt.s32.totalorder %v1465_v23, 0  ;;  %v1923_v27 = vadd.s32 %v4288_v59, %v1795_v60  ;;  %vm1667_vm10 = vcmp.lt.s32.totalorder %v1538_v19, 0  ;;  %v1726_v55 = vmul.u32 5, %v1469_v35  ;;  %v4295_v59 = vld [vmem:[%s8027_s1 + $0x160] sm:$0xff] }
 0x2f5   :  { %2155 = vperm.xlu0 %4213, %v1970_v26   ;;  %v2045_v26 = vsel %vm1661_vm2, 4294967295, %v1917_v62  ;;  %v6457_v62 = vpop.xlane.xlu0 %1232  ;;  %v1540_v40 = vsel %vm1428_vm8, 4294967295, %v1411_v56  ;;  %v1542_v56 = vsel %vm1428_vm8, 4294967295, %v1413_v33  ;;  %vm1598_vm13 = vcmp.lt.s32.totalorder %v1469_v35, 0 }
 0x2f6   :  { %8188 = vst [vmem:[#allocation121_spill] sm:$0xff] %v6457_v62  ;;  %v1797_v62 = vmul.u32 5, %v1540_v40  ;;  %v1799_v33 = vmul.u32 5, %v1542_v56  ;;  %vm1669_vm12 = vcmp.lt.s32.totalorder %v1540_v40, 0  ;;  %vm1671_vm14 = vcmp.lt.s32.totalorder %v1542_v56, 0 }
 0x2f7   :  { %2374 = vperm.xlu1 %4214, %v2043_v31   ;;  %v6443_v38 = vpop.permute.xlu1 %2182  ;;  %v1467_v31 = vsel %vm1428_vm8, 4294967295, %v1338_v53  ;;  %v1850_v53 = vadd.s32 %v4287_v44, %v1722_v21  ;;  %v4294_v21 = vld [vmem:[%s8027_s1 + $0x398] sm:$0xff] }
 0x2f8   :  { %v1415_v44 = vrot.slane %v4294_v21, 7  ;;  %vm1596_vm11 = vcmp.lt.s32.totalorder %v1467_v31, 0  ;;  %v1925_v19 = vadd.s32 %v4290_v17, %v1797_v62  ;;  %v4297_v17 = vld [vmem:[%s8027_s1 + $0x170] sm:$0xff] }
 0x2f9   :  { %2161 = vperm.xlu0 %4213, %v1972_v3   ;;  %v1921_v3 = vadd.s32 %v4286_v11, %v1793_v46  ;;  %v4293_v11 = vld [vmem:[%s8027_s1 + $0x150] sm:$0xff]  ;;  %v6476_v4 = vpop.xlane.xlu0 %1238 }
 0x2fa   :  { %v1342_v45 = vrot.slane %v4293_v11, 7  ;;  %8189 = vst [vmem:[#allocation122_spill] sm:$0xff] %v6476_v4  ;;  %v2053_v40 = vsel %vm1669_vm12, 4294967295, %v1925_v19 }
 0x2fb   :  { %2380 = vperm.xlu1 %4214, %v2045_v26   ;;  %v6455_v28 = vpop.permute.xlu1 %2188  ;;  %v1724_v26 = vmul.u32 5, %v1467_v31  ;;  %v1346_v31 = vrot.slane %v4297_v17, 7 }
 0x2fc   :  { %v1471_v23 = vsel %vm1428_vm8, 4294967295, %v1342_v45  ;;  %v1854_v45 = vadd.s32 %v4291_v30, %v1726_v55  ;;  %v4298_v30 = vld [vmem:[%s8027_s1 + $0x3b8] sm:$0xff] }
 0x2fd   :  { %2167 = vperm.xlu0 %4213, %v1974_v18   ;;  %v2049_v18 = vsel %vm1665_vm7, 4294967295, %v1921_v3  ;;  %v1852_v1 = vadd.s32 %v4289_v14, %v1724_v26  ;;  %v1344_v3 = vrot.slane %v4295_v59, 7  ;;  %v4296_v14 = vld [vmem:[%s8027_s1 + $0x3a8] sm:$0xff]  ;;  %v1544_v26 = vsel %vm1428_vm8, 4294967295, %v1415_v44 }
 0x2fe   :  { %v1728_v4 = vmul.u32 5, %v1471_v23  ;;  %v1801_v44 = vmul.u32 5, %v1544_v26  ;;  %v1982_v63 = vsel %vm1598_vm13, 4294967295, %v1854_v45  ;;  %v1475_v35 = vsel %vm1428_vm8, 4294967295, %v1346_v31 }
 0x2ff   :  { %2386 = vperm.xlu1 %4214, %v2047_v6   ;;  %v6469_v46 = vpop.permute.xlu1 %2194  ;;  %v1978_v6 = vsel %vm1594_vm9, 4294967295, %v1850_v53  ;;  %v1417_v53 = vrot.slane %v4296_v14, 7  ;;  %v1980_v24 = vsel %vm1596_vm11, 4294967295, %v1852_v1  ;;  %v1419_v1 = vrot.slane %v4298_v30, 7 }
 0x300   :  { %vm1600_vm15 = vcmp.lt.s32.totalorder %v1471_v23, 0  ;;  %v1929_v56 = vadd.s32 %v4294_v21, %v1801_v44  ;;  %vm1673_vm0 = vcmp.lt.s32.totalorder %v1544_v26, 0  ;;  %v1732_v31 = vmul.u32 5, %v1475_v35  ;;  %v4301_v21 = vld [vmem:[%s8027_s1 + $0x190] sm:$0xff] }
 0x301   :  { %2173 = vperm.xlu0 %4213, %v1976_v0   ;;  %v2051_v0 = vsel %vm1667_vm10, 4294967295, %v1923_v27  ;;  %v6497_v27 = vpop.xlane.xlu0 %1244  ;;  %v1546_v55 = vsel %vm1428_vm8, 4294967295, %v1417_v53  ;;  %v1548_v53 = vsel %vm1428_vm8, 4294967295, %v1419_v1  ;;  %vm1604_vm2 = vcmp.lt.s32.totalorder %v1475_v35, 0 }
 0x302   :  { %8190 = vst [vmem:[#allocation123_spill] sm:$0xff] %v6497_v27  ;;  %v1803_v27 = vmul.u32 5, %v1546_v55  ;;  %v1805_v1 = vmul.u32 5, %v1548_v53  ;;  %vm1675_vm1 = vcmp.lt.s32.totalorder %v1546_v55, 0  ;;  %vm1677_vm3 = vcmp.lt.s32.totalorder %v1548_v53, 0 }
 0x303   :  { %2392 = vperm.xlu1 %4214, %v2049_v18   ;;  %v6483_v60 = vpop.permute.xlu1 %2200  ;;  %v1473_v18 = vsel %vm1428_vm8, 4294967295, %v1344_v3  ;;  %v1856_v3 = vadd.s32 %v4293_v11, %v1728_v4  ;;  %v4300_v4 = vld [vmem:[%s8027_s1 + $0x3c8] sm:$0xff] }
 0x304   :  { %v1421_v11 = vrot.slane %v4300_v4, 7  ;;  %vm1602_vm4 = vcmp.lt.s32.totalorder %v1473_v18, 0  ;;  %v1931_v26 = vadd.s32 %v4296_v14, %v1803_v27  ;;  %v4303_v14 = vld [vmem:[%s8027_s1 + $0x1a0] sm:$0xff] }
 0x305   :  { %2179 = vperm.xlu0 %4213, %v1978_v6   ;;  %v1927_v6 = vadd.s32 %v4292_v50, %v1799_v33  ;;  %v4299_v50 = vld [vmem:[%s8027_s1 + $0x180] sm:$0xff]  ;;  %v6516_v9 = vpop.xlane.xlu0 %1250 }
 0x306   :  { %v1348_v19 = vrot.slane %v4299_v50, 7  ;;  %8191 = vst [vmem:[#allocation124_spill] sm:$0xff] %v6516_v9  ;;  %v2059_v55 = vsel %vm1675_vm1, 4294967295, %v1931_v26 }
 0x307   :  { %2398 = vperm.xlu1 %4214, %v2051_v0   ;;  %v6495_v62 = vpop.permute.xlu1 %2206  ;;  %v1730_v0 = vmul.u32 5, %v1473_v18  ;;  %v1352_v18 = vrot.slane %v4303_v14, 7 }
 0x308   :  { %v1477_v23 = vsel %vm1428_vm8, 4294967295, %v1348_v19  ;;  %v1860_v19 = vadd.s32 %v4297_v17, %v1732_v31  ;;  %v4304_v17 = vld [vmem:[%s8027_s1 + $0x3e8] sm:$0xff] }
 0x309   :  { %2185 = vperm.xlu0 %4213, %v1980_v24   ;;  %v2055_v24 = vsel %vm1671_vm14, 4294967295, %v1927_v6  ;;  %v1858_v45 = vadd.s32 %v4295_v59, %v1730_v0  ;;  %v1350_v6 = vrot.slane %v4301_v21, 7  ;;  %v4302_v59 = vld [vmem:[%s8027_s1 + $0x3d8] sm:$0xff]  ;;  %v1550_v0 = vsel %vm1428_vm8, 4294967295, %v1421_v11 }
 0x30a   :  { %v1734_v9 = vmul.u32 5, %v1477_v23  ;;  %v1807_v11 = vmul.u32 5, %v1550_v0  ;;  %v1988_v58 = vsel %vm1604_vm2, 4294967295, %v1860_v19  ;;  %v1481_v35 = vsel %vm1428_vm8, 4294967295, %v1352_v18 }
 0x30b   :  { %2404 = vperm.xlu1 %4214, %v2053_v40   ;;  %v6509_v33 = vpop.permute.xlu1 %2212  ;;  %v1984_v40 = vsel %vm1600_vm15, 4294967295, %v1856_v3  ;;  %v1423_v3 = vrot.slane %v4302_v59, 7  ;;  %v1986_v25 = vsel %vm1602_vm4, 4294967295, %v1858_v45  ;;  %v1425_v45 = vrot.slane %v4304_v17, 7 }
 0x30c   :  { %vm1606_vm5 = vcmp.lt.s32.totalorder %v1477_v23, 0  ;;  %v1935_v53 = vadd.s32 %v4300_v4, %v1807_v11  ;;  %vm1679_vm6 = vcmp.lt.s32.totalorder %v1550_v0, 0  ;;  %v1738_v18 = vmul.u32 5, %v1481_v35  ;;  %v4307_v4 = vld [vmem:[%s8027_s1 + $0x1c0] sm:$0xff] }
 0x30d   :  { %2191 = vperm.xlu0 %4213, %v1982_v63   ;;  %v2057_v63 = vsel %vm1673_vm0, 4294967295, %v1929_v56  ;;  %v6537_v56 = vpop.xlane.xlu0 %1256  ;;  %v1552_v31 = vsel %vm1428_vm8, 4294967295, %v1423_v3  ;;  %v1554_v3 = vsel %vm1428_vm8, 4294967295, %v1425_v45  ;;  %vm1610_vm10 = vcmp.lt.s32.totalorder %v1481_v35, 0 }
 0x30e   :  { %8192 = vst [vmem:[#allocation125_spill] sm:$0xff] %v6537_v56  ;;  %v1809_v56 = vmul.u32 5, %v1552_v31  ;;  %v1811_v45 = vmul.u32 5, %v1554_v3  ;;  %vm1681_vm9 = vcmp.lt.s32.totalorder %v1552_v31, 0  ;;  %vm1683_vm11 = vcmp.lt.s32.totalorder %v1554_v3, 0 }
 0x30f   :  { %2410 = vperm.xlu1 %4214, %v2055_v24   ;;  %v6523_v44 = vpop.permute.xlu1 %2218  ;;  %v1479_v24 = vsel %vm1428_vm8, 4294967295, %v1350_v6  ;;  %v1862_v6 = vadd.s32 %v4299_v50, %v1734_v9  ;;  %v4306_v9 = vld [vmem:[%s8027_s1 + $0x3f8] sm:$0xff] }
 0x310   :  { %v1427_v50 = vrot.slane %v4306_v9, 7  ;;  %vm1608_vm7 = vcmp.lt.s32.totalorder %v1479_v24, 0  ;;  %v1937_v0 = vadd.s32 %v4302_v59, %v1809_v56  ;;  %v1939_v31 = vadd.s32 %v4304_v17, %v1811_v45 }
 0x311   :  { %2197 = vperm.xlu0 %4213, %v1984_v40   ;;  %v1933_v40 = vadd.s32 %v4298_v30, %v1805_v1  ;;  %v4305_v30 = vld [vmem:[%s8027_s1 + $0x1b0] sm:$0xff]  ;;  %v6556_v57 = vpop.xlane.xlu0 %1262 }
 0x312   :  { %v1354_v26 = vrot.slane %v4305_v30, 7  ;;  %8193 = vst [vmem:[#allocation126_spill] sm:$0xff] %v6556_v57  ;;  %v2065_v56 = vsel %vm1681_vm9, 4294967295, %v1937_v0 }
 0x313   :  { %2416 = vperm.xlu1 %4214, %v2057_v63   ;;  %v6535_v27 = vpop.permute.xlu1 %2224  ;;  %v1736_v63 = vmul.u32 5, %v1479_v24 }
 0x314   :  { %v1483_v23 = vsel %vm1428_vm8, 4294967295, %v1354_v26 }
 0x315   :  { %2203 = vperm.xlu0 %4213, %v1986_v25   ;;  %v2061_v25 = vsel %vm1677_vm3, 4294967295, %v1933_v40  ;;  %v1864_v19 = vadd.s32 %v4301_v21, %v1736_v63  ;;  %v1356_v40 = vrot.slane %v4307_v4, 7  ;;  %v1556_v21 = vsel %vm1428_vm8, 4294967295, %v1427_v50  ;;  %v6574_v59 = vpop.xlane.xlu0 %1268 }
 0x316   :  { %v1740_v63 = vmul.u32 5, %v1483_v23  ;;  %8194 = vst [vmem:[#allocation127_spill] sm:$0xff] %v6574_v59  ;;  %vm1612_vm12 = vcmp.lt.s32.totalorder %v1483_v23, 0  ;;  %vm1685_vm13 = vcmp.lt.s32.totalorder %v1556_v21, 0 }
 0x317   :  { %2422 = vperm.xlu1 %4214, %v2059_v55   ;;  %v6549_v1 = vpop.permute.xlu1 %2230  ;;  %v1990_v55 = vsel %vm1606_vm5, 4294967295, %v1862_v6  ;;  %v1866_v6 = vadd.s32 %v4303_v14, %v1738_v18  ;;  %v1992_v26 = vsel %vm1608_vm7, 4294967295, %v1864_v19  ;;  %v1485_v57 = vsel %vm1428_vm8, 4294967295, %v1356_v40 }
 0x318   :  { %v1868_v14 = vadd.s32 %v4305_v30, %v1740_v63  ;;  %v1742_v50 = vmul.u32 5, %v1485_v57  ;;  %vm1614_vm14 = vcmp.lt.s32.totalorder %v1485_v57, 0 }
 0x319   :  { %2209 = vperm.xlu0 %4213, %v1988_v58   ;;  %v2063_v58 = vsel %vm1679_vm6, 4294967295, %v1935_v53  ;;  %v1813_v53 = vmul.u32 5, %v1556_v21  ;;  %v1994_v19 = vsel %vm1610_vm10, 4294967295, %v1866_v6  ;;  %v6583_v0 = vpop.xlane.xlu0 %1274  ;;  %v4310_v6 = vld [vmem:[%s8027_s1 + $0x1f0] sm:$0xff] }
 0x31a   :  { %v1870_v3 = vadd.s32 %v4307_v4, %v1742_v50  ;;  %8195 = vst [vmem:[#allocation128_spill] sm:$0xff] %v6583_v0  ;;  %v1996_v45 = vsel %vm1612_vm12, 4294967295, %v1868_v14  ;;  %v1362_v63 = vrot.slane %v4310_v6, 7 }
 0x31b   :  { %2428 = vperm.xlu1 %4214, %v2061_v25   ;;  %v6563_v11 = vpop.permute.xlu1 %2236  ;;  %v4308_v25 = vld [vmem:[%s8027_s1 + $0x1d0] sm:$0xff]  ;;  %v1941_v17 = vadd.s32 %v4306_v9, %v1813_v53 }
 0x31c   :  { %v1358_v16 = vrot.slane %v4308_v25, 7  ;;  %v1998_v21 = vsel %vm1614_vm14, 4294967295, %v1870_v3 }
 0x31d   :  { %2215 = vperm.xlu0 %4213, %v1990_v55   ;;  %v4309_v55 = vld [vmem:[%s8027_s1 + $0x1e0] sm:$0xff]  ;;  %v2069_v9 = vsel %vm1685_vm13, 4294967295, %v1941_v17  ;;  %v6599_v50 = vpop.xlane.xlu0 %1280 }
 0x31e   :  { %v1487_v18 = vsel %vm1428_vm8, 4294967295, %v1358_v16  ;;  %v1360_v40 = vrot.slane %v4309_v55, 7  ;;  %8197 = vst [vmem:[#allocation130_spill] sm:$0xff] %v6599_v50 }
 0x31f   :  { %2434 = vperm.xlu1 %4214, %v2063_v58   ;;  %v6572_v24 = vpop.permute.xlu1 %2242  ;;  %v2067_v58 = vsel %vm1683_vm11, 4294967295, %v1939_v31  ;;  %v1744_v30 = vmul.u32 5, %v1487_v18  ;;  %v4311_v31 = vld [vmem:[%s8027_s1 + $0x200] sm:$0xff]  ;;  %vm1616_vm15 = vcmp.lt.s32.totalorder %v1487_v18, 0  ;;  %vm2716_vm11 = vcmask 203776  }
 0x320   :  { %v1489_v16 = vsel %vm1428_vm8, 4294967295, %v1360_v40  ;;  %v1364_v53 = vrot.slane %v4311_v31, 7 }
 0x321   :  { %2221 = vperm.xlu0 %4213, %v1992_v26   ;;  %v1872_v23 = vadd.s32 %v4308_v25, %v1744_v30  ;;  %v1746_v4 = vmul.u32 5, %v1489_v16  ;;  %vm1618_vm0 = vcmp.lt.s32.totalorder %v1489_v16, 0 }
 0x322   :  { %v1493_v40 = vsel %vm1428_vm8, 4294967295, %v1364_v53 }
 0x323   :  { %2440 = vperm.xlu1 %4214, %v2065_v56   ;;  %v6581_v35 = vpop.permute.xlu1 %2248  ;;  %v1491_v56 = vsel %vm1428_vm8, 4294967295, %v1362_v63  ;;  %v1874_v57 = vadd.s32 %v4309_v55, %v1746_v4  ;;  %v2000_v25 = vsel %vm1616_vm15, 4294967295, %v1872_v23  ;;  %v1750_v18 = vmul.u32 5, %v1493_v40 }
 0x324   :  { %vm1620_vm4 = vcmp.lt.s32.totalorder %v1491_v56, 0  ;;  %vm1622_vm1 = vcmp.lt.s32.totalorder %v1493_v40, 0 }
 0x325   :  { %2227 = vperm.xlu0 %4213, %v1994_v19   ;;  %v1748_v19 = vmul.u32 5, %v1491_v56  ;;  %v2002_v63 = vsel %vm1618_vm0, 4294967295, %v1874_v57  ;;  %v4314_v57 = vld [vmem:[%s8027_s1 + $0x230] sm:$0xff] }
 0x327   :  { %2446 = vperm.xlu1 %4214, %v2067_v58   ;;  %v6590_v26 = vpop.permute.xlu1 %2254  ;;  %v4312_v58 = vld [vmem:[%s8027_s1 + $0x210] sm:$0xff]  ;;  %v1876_v30 = vadd.s32 %v4310_v6, %v1748_v19  ;;  %v1370_v19 = vrot.slane %v4314_v57, 7 }
 0x328   :  { %v1366_v17 = vrot.slane %v4312_v58, 7 }
 0x329   :  { %2233 = vperm.xlu0 %4213, %v1996_v45   ;;  %v6608_v45 = vpop.xlane.xlu0 %1286  ;;  %v2004_v53 = vsel %vm1620_vm4, 4294967295, %v1876_v30  ;;  %v4315_v30 = vld [vmem:[%s8027_s1 + $0x240] sm:$0xff] }
 0x32a   :  { %8198 = vst [vmem:[#allocation131_spill] sm:$0xff] %v6608_v45  ;;  %v1495_v55 = vsel %vm1428_vm8, 4294967295, %v1366_v17 }
 0x32b   :  { %2452 = vperm.xlu1 %4214, %v2069_v9   ;;  %v6597_v14 = vpop.permute.xlu1 %2260  ;;  %v4313_v9 = vld [vmem:[%s8027_s1 + $0x220] sm:$0xff]  ;;  %v1752_v16 = vmul.u32 5, %v1495_v55  ;;  %vm1624_vm2 = vcmp.lt.s32.totalorder %v1495_v55, 0 }
 0x32c   :  { %8196 = vst [vmem:[#allocation129_spill] sm:$0xff] %v6597_v14  ;;  %v1368_v23 = vrot.slane %v4313_v9, 7 }
 0x32d   :  { %2239 = vperm.xlu0 %4213, %v1998_v21   ;;  %v1878_v21 = vadd.s32 %v4311_v31, %v1750_v18  ;;  %v6624_v17 = vpop.xlane.xlu0 %1292  ;;  %v1880_v0 = vadd.s32 %v4312_v58, %v1752_v16  ;;  %v1499_v31 = vsel %vm1428_vm8, 4294967295, %v1370_v19  ;;  %v1372_v18 = vrot.slane %v4315_v30, 7 }
 0x32e   :  { %v1497_v6 = vsel %vm1428_vm8, 4294967295, %v1368_v23  ;;  %8200 = vst [vmem:[#allocation133_spill] sm:$0xff] %v6624_v17  ;;  %v1756_v17 = vmul.u32 5, %v1499_v31  ;;  %vm1628_vm5 = vcmp.lt.s32.totalorder %v1499_v31, 0 }
 0x32f   :  { %v6606_v3 = vpop.permute.xlu1 %2266  ;;  %v1754_v56 = vmul.u32 5, %v1497_v6  ;;  %v1501_v58 = vsel %vm1428_vm8, 4294967295, %v1372_v18  ;;  %vm1626_vm3 = vcmp.lt.s32.totalorder %v1497_v6, 0 }
 0x330   :  { %v1884_v55 = vadd.s32 %v4314_v57, %v1756_v17  ;;  %v1758_v50 = vmul.u32 5, %v1501_v58  ;;  %v4318_v17 = vld [vmem:[%s8027_s1 + $0x270] sm:$0xff]  ;;  %vm1630_vm6 = vcmp.lt.s32.totalorder %v1501_v58, 0 }
 0x331   :  { %2245 = vperm.xlu0 %4213, %v2000_v25   ;;  %v1882_v40 = vadd.s32 %v4313_v9, %v1754_v56 }
 0x332   :  { %v1886_v18 = vadd.s32 %v4315_v30, %v1758_v50  ;;  %v2012_v14 = vsel %vm1628_vm5, 4294967295, %v1884_v55  ;;  %v6658_v30 = vld [vmem:[%s8028_s2] ss:$0 sm:$0xff] }
 0x333   :  { %v6615_v4 = vpop.permute.xlu1 %2272  ;;  %v4319_v55 = vld [vmem:[%s8027_s1 + $0x280] sm:$0xff] }
 0x334   :  { %v2014_v50 = vsel %vm1630_vm6, 4294967295, %v1886_v18  ;;  %v1380_v58 = vrot.slane %v4319_v55, 7 }
 0x335   :  { %2251 = vperm.xlu0 %4213, %v2002_v63   ;;  %v2006_v63 = vsel %vm1622_vm1, 4294967295, %v1878_v21  ;;  %v4316_v21 = vld [vmem:[%s8027_s1 + $0x250] sm:$0xff] }
 0x336   :  { %v1374_v16 = vrot.slane %v4316_v21, 7  ;;  %v1509_v54 = vsel %vm1428_vm8, 4294967295, %v1380_v58 }
 0x337   :  { %v6622_v25 = vpop.permute.xlu1 %2278  ;;  %vm1638_vm0 = vcmp.lt.s32.totalorder %v1509_v54, 0 }
 0x338   :  { %8199 = vst [vmem:[#allocation132_spill] sm:$0xff] %v6622_v25  ;;  %v6633_v59 = vpop.xlane.xlu0 %1298  ;;  %v1503_v9 = vsel %vm1428_vm8, 4294967295, %v1374_v16 }
 0x339   :  { %2257 = vperm.xlu0 %4213, %v2004_v53   ;;  %8202 = vst [vmem:[#allocation135_spill] sm:$0xff] %v6633_v59  ;;  %v2008_v53 = vsel %vm1624_vm2, 4294967295, %v1880_v0  ;;  %v2010_v59 = vsel %vm1626_vm3, 4294967295, %v1882_v40  ;;  %v4317_v0 = vld [vmem:[%s8027_s1 + $0x260] sm:$0xff]  ;;  %v1760_v6 = vmul.u32 5, %v1503_v9  ;;  %v1378_v40 = vrot.slane %v4318_v17, 7 }
 0x33a   :  { %v1376_v56 = vrot.slane %v4317_v0, 7  ;;  %vm1632_vm9 = vcmp.lt.s32.totalorder %v1503_v9, 0  ;;  %v1382_v9 = vrot.slane %v4320_v13, 7 }
 0x33b   :  { %v6631_v23 = vpop.permute.xlu1 %2284  ;;  %v1888_v31 = vadd.s32 %v4316_v21, %v1760_v6  ;;  %v1507_v16 = vsel %vm1428_vm8, 4294967295, %v1378_v40 }
 0x33c   :  { %8201 = vst [vmem:[#allocation134_spill] sm:$0xff] %v6631_v23  ;;  %v1505_v57 = vsel %vm1428_vm8, 4294967295, %v1376_v56  ;;  %v1764_v18 = vmul.u32 5, %v1507_v16  ;;  %vm1636_vm14 = vcmp.lt.s32.totalorder %v1507_v16, 0 }
 0x33d   :  { %2263 = vperm.xlu0 %4213, %v2006_v63   ;;  %v2016_v40 = vsel %vm1632_vm9, 4294967295, %v1888_v31  ;;  %vm1634_vm12 = vcmp.lt.s32.totalorder %v1505_v57, 0 }
 0x33f   :  { %v6640_v19 = vpop.permute.xlu1 %2290 }
 0x340   :  { %v2075_v45 = vpop.permute.xlu0 %2074 }
 0x341   :  { %2269 = vperm.xlu0 %4213, %v2008_v53   ;;  %vm2455_vm7 = vcmp.eq.s32.totalorder %v4918_v49, %v2075_v45 }
 0x342   :  { %v2589_v45 = vsel %vm2455_vm7, %v6658_v30, 0.0 }
 0x343   :  { %v6647_v23 = vpop.permute.xlu1 %2296  ;;  %v2720_v6 = vsel %vm2716_vm11, %v2589_v45, 0.0 }
 0x344   :  { %v2084_v63 = vpop.permute.xlu0 %2083 }
 0x345   :  { %2275 = vperm.xlu0 %4213, %v2010_v59   ;;  %v1762_v59 = vmul.u32 5, %v1505_v57  ;;  %vm2458_vm10 = vcmp.eq.s32.totalorder %v4918_v49, %v2084_v63 }
 0x346   :  { %v2592_v63 = vsel %vm2458_vm10, %v6658_v30, 0.0 }
 0x347   :  { %v1890_v56 = vadd.s32 %v4317_v0, %v1762_v59  ;;  %v1892_v0 = vadd.s32 %v4318_v17, %v1764_v18  ;;  %v1766_v59 = vmul.u32 5, %v1509_v54  ;;  %v2729_v31 = vsel %vm2716_vm11, %v2592_v63, 0.0  ;;  %v4322_v63 = vld [vmem:[%s8027_s1 + $0x2b0] sm:$0xff] }
 0x348   :  { %v2090_v53 = vpop.permute.xlu0 %2089 }
 0x349   :  { %2281 = vperm.xlu0 %4213, %v2012_v14   ;;  %v6667_v14 = vpop.permute.xlu1 %2302  ;;  %vm2460_vm13 = vcmp.eq.s32.totalorder %v4918_v49, %v2090_v53  ;;  %v2018_v58 = vsel %vm1634_vm12, 4294967295, %v1890_v56  ;;  %v1894_v53 = vadd.s32 %v4319_v55, %v1766_v59 }
 0x34a   :  { %8203 = vst [vmem:[#allocation136_spill] sm:$0xff] %v6667_v14  ;;  %v1511_v14 = vsel %vm1428_vm8, 4294967295, %v1382_v9  ;;  %v2594_v57 = vsel %vm2460_vm13, %v6658_v30, 0.0 }
 0x34b   :  { %v1768_v18 = vmul.u32 5, %v1511_v14  ;;  %v2735_v56 = vsel %vm2716_vm11, %v2594_v57, 0.0  ;;  %vm1640_vm1 = vcmp.lt.s32.totalorder %v1511_v14, 0 }
 0x34c   :  { %v2096_v21 = vpop.permute.xlu0 %2095 }
 0x34d   :  { %2287 = vperm.xlu0 %4213, %v2014_v50   ;;  %v6677_v45 = vpop.permute.xlu1 %2308  ;;  %vm2462_vm15 = vcmp.eq.s32.totalorder %v4918_v49, %v2096_v21  ;;  %v1896_v59 = vadd.s32 %v4320_v13, %v1768_v18 }
 0x34e   :  { %8204 = vst [vmem:[#allocation137_spill] sm:$0xff] %v6677_v45  ;;  %v2596_v16 = vsel %vm2462_vm15, %v6658_v30, 0.0 }
 0x34f   :  { %2721 = vadd.xlane.f32.xlu1 %v2720_v6  ;;  %v4321_v6 = vld [vmem:[%s8027_s1 + $0x2a0] sm:$0xff] }
 0x350   :  { %v2102_v50 = vpop.permute.xlu0 %2101  ;;  %v1384_v25 = vrot.slane %v4321_v6, 7 }
 0x351   :  { %2293 = vperm.xlu0 %4213, %v2016_v40   ;;  %v2020_v40 = vsel %vm1636_vm14, 4294967295, %v1892_v0  ;;  %v6694_v21 = vpop.permute.xlu1 %2314  ;;  %vm2464_vm4 = vcmp.eq.s32.totalorder %v4918_v49, %v2102_v50 }
 0x352   :  { %v1513_v9 = vsel %vm1428_vm8, 4294967295, %v1384_v25  ;;  %8205 = vst [vmem:[#allocation138_spill] sm:$0xff] %v6694_v21  ;;  %v2022_v25 = vsel %vm1638_vm0, 4294967295, %v1894_v53  ;;  %v2598_v54 = vsel %vm2464_vm4, %v6658_v30, 0.0 }
 0x353   :  { %2730 = vadd.xlane.f32.xlu1 %v2729_v31  ;;  %v1386_v31 = vrot.slane %v4322_v63, 7  ;;  %v1770_v0 = vmul.u32 5, %v1513_v9  ;;  %v2747_v53 = vsel %vm2716_vm11, %v2598_v54, 0.0  ;;  %vm1642_vm3 = vcmp.lt.s32.totalorder %v1513_v9, 0  ;;  %v4325_v54 = vld [vmem:[%s8027_s1 + $0x2e0] sm:$0xff] }
 0x354   :  { %v2108_v17 = vpop.permute.xlu0 %2107 }
 0x355   :  { %2299 = vperm.xlu0 %4213, %v2018_v58   ;;  %v2741_v58 = vsel %vm2716_vm11, %v2596_v16, 0.0  ;;  %v1515_v57 = vsel %vm1428_vm8, 4294967295, %v1386_v31  ;;  %vm2466_vm2 = vcmp.eq.s32.totalorder %v4918_v49, %v2108_v17  ;;  %v1898_v13 = vadd.s32 %v4321_v6, %v1770_v0 }
 0x356   :  { %v1772_v18 = vmul.u32 5, %v1515_v57  ;;  %v2024_v31 = vsel %vm1640_vm1, 4294967295, %v1896_v59  ;;  %v2600_v14 = vsel %vm2466_vm2, %v6658_v30, 0.0  ;;  %vm1644_vm6 = vcmp.lt.s32.totalorder %v1515_v57, 0 }
 0x357   :  { %2736 = vadd.xlane.f32.xlu1 %v2735_v56  ;;  %v4323_v56 = vld [vmem:[%s8027_s1 + $0x2c0] sm:$0xff]  ;;  %v2753_v59 = vsel %vm2716_vm11, %v2600_v14, 0.0 }
 0x358   :  { %v2114_v55 = vpop.permute.xlu0 %2113  ;;  %v1388_v45 = vrot.slane %v4323_v56, 7  ;;  %v1900_v17 = vadd.s32 %v4322_v63, %v1772_v18 }
 0x359   :  { %2305 = vperm.xlu0 %4213, %v2020_v40   ;;  %v6705_v40 = vpop.permute.xlu1 %2320  ;;  %vm2468_vm5 = vcmp.eq.s32.totalorder %v4918_v49, %v2114_v55 }
 0x35a   :  { %8206 = vst [vmem:[#allocation139_spill] sm:$0xff] %v6705_v40  ;;  %v1517_v16 = vsel %vm1428_vm8, 4294967295, %v1388_v45  ;;  %v2602_v9 = vsel %vm2468_vm5, %v6658_v30, 0.0 }
 0x35b   :  { %2742 = vadd.xlane.f32.xlu1 %v2741_v58  ;;  %v4324_v58 = vld [vmem:[%s8027_s1 + $0x2d0] sm:$0xff]  ;;  %v1774_v0 = vmul.u32 5, %v1517_v16  ;;  %vm1646_vm9 = vcmp.lt.s32.totalorder %v1517_v16, 0 }
 0x35c   :  { %v2120_v50 = vpop.permute.xlu0 %2119  ;;  %v1390_v12 = vrot.slane %v4324_v58, 7 }
 0x35d   :  { %2311 = vperm.xlu0 %4213, %v2022_v25   ;;  %v2026_v25 = vsel %vm1642_vm3, 4294967295, %v1898_v13  ;;  %v6722_v55 = vpop.permute.xlu1 %2326  ;;  %vm2470_vm7 = vcmp.eq.s32.totalorder %v4918_v49, %v2120_v50  ;;  %v1902_v18 = vadd.s32 %v4323_v56, %v1774_v0 }
 0x35e   :  { %v1519_v45 = vsel %vm1428_vm8, 4294967295, %v1390_v12  ;;  %8207 = vst [vmem:[#allocation140_spill] sm:$0xff] %v6722_v55  ;;  %v2028_v12 = vsel %vm1644_vm6, 4294967295, %v1900_v17  ;;  %v2604_v57 = vsel %vm2470_vm7, %v6658_v30, 0.0 }
 0x35f   :  { %2748 = vadd.xlane.f32.xlu1 %v2747_v53  ;;  %v1392_v53 = vrot.slane %v4325_v54, 7  ;;  %v1776_v13 = vmul.u32 5, %v1519_v45  ;;  %v2765_v17 = vsel %vm2716_vm11, %v2604_v57, 0.0  ;;  %vm1648_vm12 = vcmp.lt.s32.totalorder %v1519_v45, 0  ;;  %v4328_v57 = vld [vmem:[%s8027_s1 + $0x310] sm:$0xff] }
 0x360   :  { %v2126_v6 = vpop.permute.xlu0 %2125 }
 0x361   :  { %2317 = vperm.xlu0 %4213, %v2024_v31   ;;  %v2759_v31 = vsel %vm2716_vm11, %v2602_v9, 0.0  ;;  %v1521_v14 = vsel %vm1428_vm8, 4294967295, %v1392_v53  ;;  %vm2472_vm10 = vcmp.eq.s32.totalorder %v4918_v49, %v2126_v6  ;;  %v1904_v56 = vadd.s32 %v4324_v58, %v1776_v13 }
 0x362   :  { %v1778_v0 = vmul.u32 5, %v1521_v14  ;;  %v2030_v53 = vsel %vm1646_vm9, 4294967295, %v1902_v18  ;;  %v2606_v16 = vsel %vm2472_vm10, %v6658_v30, 0.0  ;;  %vm1650_vm14 = vcmp.lt.s32.totalorder %v1521_v14, 0 }
 0x363   :  { %2754 = vadd.xlane.f32.xlu1 %v2753_v59  ;;  %v4326_v59 = vld [vmem:[%s8027_s1 + $0x2f0] sm:$0xff]  ;;  %v2771_v18 = vsel %vm2716_vm11, %v2606_v16, 0.0  ;;  %v4329_v16 = vld [vmem:[%s8027_s1 + $0x320] sm:$0xff] }
 0x364   :  { %v2132_v63 = vpop.permute.xlu0 %2131  ;;  %v1394_v40 = vrot.slane %v4326_v59, 7  ;;  %v1906_v6 = vadd.s32 %v4325_v54, %v1778_v0 }
 0x365   :  { %2323 = vperm.xlu0 %4213, %v2026_v25   ;;  %v6733_v25 = vpop.permute.xlu1 %2332  ;;  %vm2474_vm13 = vcmp.eq.s32.totalorder %v4918_v49, %v2132_v63 }
 0x366   :  { %8208 = vst [vmem:[#allocation141_spill] sm:$0xff] %v6733_v25  ;;  %v1523_v9 = vsel %vm1428_vm8, 4294967295, %v1394_v40  ;;  %v2608_v45 = vsel %vm2474_vm13, %v6658_v30, 0.0  ;;  %v1400_v25 = vrot.slane %v4329_v16, 7 }
 0x367   :  { %2760 = vadd.xlane.f32.xlu1 %v2759_v31  ;;  %v4327_v31 = vld [vmem:[%s8027_s1 + $0x300] sm:$0xff]  ;;  %v1780_v13 = vmul.u32 5, %v1523_v9  ;;  %vm1652_vm0 = vcmp.lt.s32.totalorder %v1523_v9, 0 }
 0x368   :  { %v2138_v50 = vpop.permute.xlu0 %2137  ;;  %v1396_v55 = vrot.slane %v4327_v31, 7 }
 0x369   :  { %2329 = vperm.xlu0 %4213, %v2028_v12   ;;  %v2032_v12 = vsel %vm1648_vm12, 4294967295, %v1904_v56  ;;  %v6750_v63 = vpop.permute.xlu1 %2338  ;;  %vm2476_vm15 = vcmp.eq.s32.totalorder %v4918_v49, %v2138_v50  ;;  %v1908_v0 = vadd.s32 %v4326_v59, %v1780_v13 }
 0x36a   :  { %v1525_v40 = vsel %vm1428_vm8, 4294967295, %v1396_v55  ;;  %8209 = vst [vmem:[#allocation142_spill] sm:$0xff] %v6750_v63  ;;  %v2034_v55 = vsel %vm1650_vm14, 4294967295, %v1906_v6 }
 0x36b   :  { %2766 = vadd.xlane.f32.xlu1 %v2765_v17  ;;  %v1398_v17 = vrot.slane %v4328_v57, 7  ;;  %v1782_v56 = vmul.u32 5, %v1525_v40  ;;  %vm1654_vm1 = vcmp.lt.s32.totalorder %v1525_v40, 0 }
 0x36c   :  { %v2144_v58 = vpop.permute.xlu0 %2143 }
 0x36d   :  { %2335 = vperm.xlu0 %4213, %v2030_v53   ;;  %v2777_v53 = vsel %vm2716_vm11, %v2608_v45, 0.0  ;;  %v1527_v14 = vsel %vm1428_vm8, 4294967295, %v1398_v17  ;;  %vm2478_vm4 = vcmp.eq.s32.totalorder %v4918_v49, %v2144_v58  ;;  %v1910_v59 = vadd.s32 %v4327_v31, %v1782_v56  ;;  %v6761_v13 = vpop.permute.xlu1 %2344 }
 0x36e   :  { %8210 = vst [vmem:[#allocation143_spill] sm:$0xff] %v6761_v13  ;;  %v1784_v45 = vmul.u32 5, %v1527_v14  ;;  %v2612_v9 = vsel %vm2478_vm4, %v6658_v30, 0.0  ;;  %v1529_v58 = vsel %vm1428_vm8, 4294967295, %v1400_v25  ;;  %vm1656_vm3 = vcmp.lt.s32.totalorder %v1527_v14, 0 }
 0x36f   :  { %2772 = vadd.xlane.f32.xlu1 %v2771_v18  ;;  %v2610_v18 = vsel %vm2476_vm15, %v6658_v30, 0.0  ;;  %v2789_v17 = vsel %vm2716_vm11, %v2612_v9, 0.0  ;;  %vm1658_vm6 = vcmp.lt.s32.totalorder %v1529_v58, 0 }
 0x370   :  { %v2150_v54 = vpop.permute.xlu0 %2149  ;;  %v2783_v6 = vsel %vm2716_vm11, %v2610_v18, 0.0  ;;  %v1912_v56 = vadd.s32 %v4328_v57, %v1784_v45  ;;  %v4331_v18 = vld [vmem:[%s8027_s1 + $0x340] sm:$0xff] }
 0x371   :  { %2341 = vperm.xlu0 %4213, %v2032_v12   ;;  %v2036_v12 = vsel %vm1652_vm0, 4294967295, %v1908_v0  ;;  %vm2480_vm2 = vcmp.eq.s32.totalorder %v4918_v49, %v2150_v54  ;;  %v2038_v0 = vsel %vm1654_vm1, 4294967295, %v1910_v59  ;;  %v6778_v54 = vpop.permute.xlu1 %2350 }
 0x372   :  { %v2614_v40 = vsel %vm2480_vm2, %v6658_v30, 0.0  ;;  %8211 = vst [vmem:[#allocation144_spill] sm:$0xff] %v6778_v54  ;;  %v2040_v59 = vsel %vm1656_vm3, 4294967295, %v1912_v56 }
 0x373   :  { %2778 = vadd.xlane.f32.xlu1 %v2777_v53  ;;  %v4330_v53 = vld [vmem:[%s8027_s1 + $0x330] sm:$0xff]  ;;  %v2795_v57 = vsel %vm2716_vm11, %v2614_v40, 0.0 }
 0x374   :  { %v2156_v50 = vpop.permute.xlu0 %2155  ;;  %v1402_v51 = vrot.slane %v4330_v53, 7 }
 0x375   :  { %2347 = vperm.xlu0 %4213, %v2034_v55   ;;  %v1786_v55 = vmul.u32 5, %v1529_v58  ;;  %vm2482_vm5 = vcmp.eq.s32.totalorder %v4918_v49, %v2156_v50 }
 0x376   :  { %v1531_v25 = vsel %vm1428_vm8, 4294967295, %v1402_v51  ;;  %v2616_v14 = vsel %vm2482_vm5, %v6658_v30, 0.0 }
 0x377   :  { %2784 = vadd.xlane.f32.xlu1 %v2783_v6  ;;  %v1404_v6 = vrot.slane %v4331_v18, 7  ;;  %v1914_v45 = vadd.s32 %v4329_v16, %v1786_v55  ;;  %v1788_v9 = vmul.u32 5, %v1531_v25  ;;  %v2801_v16 = vsel %vm2716_vm11, %v2616_v14, 0.0  ;;  %v4334_v14 = vld [vmem:[%s8027_s1 + $0x370] sm:$0xff] }
 0x378   :  { %v2162_v31 = vpop.permute.xlu0 %2161  ;;  %vm1660_vm9 = vcmp.lt.s32.totalorder %v1531_v25, 0 }
 0x379   :  { %2353 = vperm.xlu0 %4213, %v2036_v12   ;;  %v1533_v51 = vsel %vm1428_vm8, 4294967295, %v1404_v6  ;;  %vm2484_vm7 = vcmp.eq.s32.totalorder %v4918_v49, %v2162_v31  ;;  %v2042_v56 = vsel %vm1658_vm6, 4294967295, %v1914_v45  ;;  %v1916_v55 = vadd.s32 %v4330_v53, %v1788_v9 }
 0x37a   :  { %v1790_v40 = vmul.u32 5, %v1533_v51  ;;  %v2618_v58 = vsel %vm2484_vm7, %v6658_v30, 0.0  ;;  %vm1662_vm12 = vcmp.lt.s32.totalorder %v1533_v51, 0 }
 0x37b   :  { %2790 = vadd.xlane.f32.xlu1 %v2789_v17  ;;  %v4332_v17 = vld [vmem:[%s8027_s1 + $0x350] sm:$0xff]  ;;  %v2044_v53 = vsel %vm1660_vm9, 4294967295, %v1916_v55 }
 0x37c   :  { %v2168_v12 = vpop.permute.xlu0 %2167  ;;  %v1406_v13 = vrot.slane %v4332_v17, 7  ;;  %v1918_v45 = vadd.s32 %v4331_v18, %v1790_v40 }
 0x37d   :  { %2359 = vperm.xlu0 %4213, %v2038_v0   ;;  %v6789_v0 = vpop.permute.xlu1 %2356  ;;  %vm2486_vm10 = vcmp.eq.s32.totalorder %v4918_v49, %v2168_v12 }
 0x37e   :  { %8212 = vst [vmem:[#allocation145_spill] sm:$0xff] %v6789_v0  ;;  %v1535_v31 = vsel %vm1428_vm8, 4294967295, %v1406_v13  ;;  %v2620_v25 = vsel %vm2486_vm10, %v6658_v30, 0.0  ;;  %v2046_v55 = vsel %vm1662_vm12, 4294967295, %v1918_v45 }
 0x37f   :  { %2796 = vadd.xlane.f32.xlu1 %v2795_v57  ;;  %v4333_v57 = vld [vmem:[%s8027_s1 + $0x360] sm:$0xff]  ;;  %v1792_v9 = vmul.u32 5, %v1535_v31  ;;  %v2813_v18 = vsel %vm2716_vm11, %v2620_v25, 0.0  ;;  %vm1664_vm14 = vcmp.lt.s32.totalorder %v1535_v31, 0 }
 0x380   :  { %v2174_v50 = vpop.permute.xlu0 %2173  ;;  %v1408_v54 = vrot.slane %v4333_v57, 7 }
 0x381   :  { %2365 = vperm.xlu0 %4213, %v2040_v59   ;;  %v2807_v59 = vsel %vm2716_vm11, %v2618_v58, 0.0  ;;  %v6806_v12 = vpop.permute.xlu1 %2362  ;;  %vm2488_vm13 = vcmp.eq.s32.totalorder %v4918_v49, %v2174_v50  ;;  %v1920_v40 = vadd.s32 %v4332_v17, %v1792_v9 }
 0x382   :  { %v1537_v13 = vsel %vm1428_vm8, 4294967295, %v1408_v54  ;;  %v2622_v51 = vsel %vm2488_vm13, %v6658_v30, 0.0 }
 0x383   :  { %2802 = vadd.xlane.f32.xlu1 %v2801_v16  ;;  %v1410_v16 = vrot.slane %v4334_v14, 7  ;;  %v1794_v58 = vmul.u32 5, %v1537_v13  ;;  %v2819_v17 = vsel %vm2716_vm11, %v2622_v51, 0.0  ;;  %v2048_v45 = vsel %vm1664_vm14, 4294967295, %v1920_v40  ;;  %v4337_v51 = vld [vmem:[%s8027_s1 + $0x3a0] sm:$0xff] }
 0x384   :  { %v2180_v6 = vpop.permute.xlu0 %2179  ;;  %vm1666_vm0 = vcmp.lt.s32.totalorder %v1537_v13, 0 }
 0x385   :  { %2371 = vperm.xlu0 %4213, %v2042_v56   ;;  %v1539_v54 = vsel %vm1428_vm8, 4294967295, %v1410_v16  ;;  %vm2490_vm15 = vcmp.eq.s32.totalorder %v4918_v49, %v2180_v6  ;;  %v1922_v9 = vadd.s32 %v4333_v57, %v1794_v58 }
 0x386   :  { %v1796_v25 = vmul.u32 5, %v1539_v54  ;;  %v2624_v31 = vsel %vm2490_vm15, %v6658_v30, 0.0  ;;  %vm1668_vm1 = vcmp.lt.s32.totalorder %v1539_v54, 0 }
 0x387   :  { %2808 = vadd.xlane.f32.xlu1 %v2807_v59  ;;  %v4335_v59 = vld [vmem:[%s8027_s1 + $0x380] sm:$0xff]  ;;  %v2050_v57 = vsel %vm1666_vm0, 4294967295, %v1922_v9 }
 0x388   :  { %v2186_v56 = vpop.permute.xlu0 %2185  ;;  %v1412_v0 = vrot.slane %v4335_v59, 7  ;;  %v1924_v40 = vadd.s32 %v4334_v14, %v1796_v25 }
 0x389   :  { %2377 = vperm.xlu0 %4213, %v2044_v53   ;;  %v6817_v53 = vpop.permute.xlu1 %2368  ;;  %vm2492_vm4 = vcmp.eq.s32.totalorder %v4918_v49, %v2186_v56 }
 0x38a   :  { %8213 = vst [vmem:[#allocation146_spill] sm:$0xff] %v6817_v53  ;;  %v1541_v6 = vsel %vm1428_vm8, 4294967295, %v1412_v0  ;;  %v2626_v13 = vsel %vm2492_vm4, %v6658_v30, 0.0  ;;  %v2052_v9 = vsel %vm1668_vm1, 4294967295, %v1924_v40 }
 0x38b   :  { %2814 = vadd.xlane.f32.xlu1 %v2813_v18  ;;  %v4336_v18 = vld [vmem:[%s8027_s1 + $0x390] sm:$0xff]  ;;  %v1798_v58 = vmul.u32 5, %v1541_v6  ;;  %v2831_v14 = vsel %vm2716_vm11, %v2626_v13, 0.0  ;;  %vm1670_vm3 = vcmp.lt.s32.totalorder %v1541_v6, 0 }
 0x38c   :  { %v2192_v50 = vpop.permute.xlu0 %2191  ;;  %v1414_v63 = vrot.slane %v4336_v18, 7 }
 0x38d   :  { %2383 = vperm.xlu0 %4213, %v2046_v55   ;;  %v2825_v55 = vsel %vm2716_vm11, %v2624_v31, 0.0  ;;  %v6834_v56 = vpop.permute.xlu1 %2374  ;;  %vm2494_vm2 = vcmp.eq.s32.totalorder %v4918_v49, %v2192_v50  ;;  %v1926_v25 = vadd.s32 %v4335_v59, %v1798_v58 }
 0x38e   :  { %v1543_v0 = vsel %vm1428_vm8, 4294967295, %v1414_v63  ;;  %8214 = vst [vmem:[#allocation147_spill] sm:$0xff] %v6834_v56  ;;  %v2628_v54 = vsel %vm2494_vm2, %v6658_v30, 0.0 }
 0x38f   :  { %2820 = vadd.xlane.f32.xlu1 %v2819_v17  ;;  %v1416_v17 = vrot.slane %v4337_v51, 7  ;;  %v1800_v31 = vmul.u32 5, %v1543_v0  ;;  %v2837_v59 = vsel %vm2716_vm11, %v2628_v54, 0.0  ;;  %v2054_v40 = vsel %vm1670_vm3, 4294967295, %v1926_v25  ;;  %v4340_v54 = vld [vmem:[%s8027_s1 + $0x3d0] sm:$0xff] }
 0x390   :  { %v2198_v16 = vpop.permute.xlu0 %2197  ;;  %vm1672_vm6 = vcmp.lt.s32.totalorder %v1543_v0, 0 }
 0x391   :  { %2389 = vperm.xlu0 %4213, %v2048_v45   ;;  %v1545_v63 = vsel %vm1428_vm8, 4294967295, %v1416_v17  ;;  %vm2496_vm5 = vcmp.eq.s32.totalorder %v4918_v49, %v2198_v16  ;;  %v1928_v58 = vadd.s32 %v4336_v18, %v1800_v31 }
 0x392   :  { %v1802_v13 = vmul.u32 5, %v1545_v63  ;;  %v2630_v6 = vsel %vm2496_vm5, %v6658_v30, 0.0  ;;  %vm1674_vm9 = vcmp.lt.s32.totalorder %v1545_v63, 0 }
 0x393   :  { %2826 = vadd.xlane.f32.xlu1 %v2825_v55  ;;  %v4338_v55 = vld [vmem:[%s8027_s1 + $0x3b0] sm:$0xff]  ;;  %v2056_v18 = vsel %vm1672_vm6, 4294967295, %v1928_v58 }
 0x394   :  { %v2204_v45 = vpop.permute.xlu0 %2203  ;;  %v1418_v53 = vrot.slane %v4338_v55, 7  ;;  %v1930_v25 = vadd.s32 %v4337_v51, %v1802_v13 }
 0x395   :  { %2395 = vperm.xlu0 %4213, %v2050_v57   ;;  %v6845_v57 = vpop.permute.xlu1 %2380  ;;  %vm2498_vm7 = vcmp.eq.s32.totalorder %v4918_v49, %v2204_v45 }
 0x396   :  { %v1547_v16 = vsel %vm1428_vm8, 4294967295, %v1418_v53  ;;  %v2632_v0 = vsel %vm2498_vm7, %v6658_v30, 0.0  ;;  %v2058_v58 = vsel %vm1674_vm9, 4294967295, %v1930_v25  ;;  %vm2527_vm9 = vcmp.eq.s32.totalorder %v4918_v49, %v6640_v19 }
 0x397   :  { %2832 = vadd.xlane.f32.xlu1 %v2831_v14  ;;  %v4339_v14 = vld [vmem:[%s8027_s1 + $0x3c0] sm:$0xff]  ;;  %v1804_v31 = vmul.u32 5, %v1547_v16  ;;  %v2849_v51 = vsel %vm2716_vm11, %v2632_v0, 0.0  ;;  %vm1676_vm12 = vcmp.lt.s32.totalorder %v1547_v16, 0 }
 0x398   :  { %v2210_v50 = vpop.permute.xlu0 %2209  ;;  %v1420_v56 = vrot.slane %v4339_v14, 7 }
 0x399   :  { %2401 = vperm.xlu0 %4213, %v2052_v9   ;;  %v2843_v9 = vsel %vm2716_vm11, %v2630_v6, 0.0  ;;  %v6862_v45 = vpop.permute.xlu1 %2386  ;;  %vm2500_vm10 = vcmp.eq.s32.totalorder %v4918_v49, %v2210_v50  ;;  %v1932_v13 = vadd.s32 %v4338_v55, %v1804_v31 }
 0x39a   :  { %v1549_v53 = vsel %vm1428_vm8, 4294967295, %v1420_v56  ;;  %v2634_v63 = vsel %vm2500_vm10, %v6658_v30, 0.0  ;;  %vm2521_vm10 = vcmp.eq.s32.totalorder %v4918_v49, %v6615_v4 }
 0x39b   :  { %2838 = vadd.xlane.f32.xlu1 %v2837_v59  ;;  %v1422_v59 = vrot.slane %v4340_v54, 7  ;;  %v1806_v6 = vmul.u32 5, %v1549_v53  ;;  %v2855_v55 = vsel %vm2716_vm11, %v2634_v63, 0.0  ;;  %v2060_v25 = vsel %vm1676_vm12, 4294967295, %v1932_v13 }
 0x39c   :  { %v2216_v17 = vpop.permute.xlu0 %2215  ;;  %vm1678_vm14 = vcmp.lt.s32.totalorder %v1549_v53, 0  ;;  %v2655_v19 = vsel %vm2521_vm10, %v6658_v30, 0.0  ;;  %vm2454_vm12 = vcmp.eq.s32.totalorder %v4918_v49, %v6191_v39 }
 0x39d   :  { %2407 = vperm.xlu0 %4213, %v2054_v40   ;;  %v1551_v56 = vsel %vm1428_vm8, 4294967295, %v1422_v59  ;;  %vm2502_vm13 = vcmp.eq.s32.totalorder %v4918_v49, %v2216_v17  ;;  %v1934_v31 = vadd.s32 %v4339_v14, %v1806_v6 }
 0x39e   :  { %v1808_v0 = vmul.u32 5, %v1551_v56  ;;  %v2636_v16 = vsel %vm2502_vm13, %v6658_v30, 0.0  ;;  %vm1680_vm0 = vcmp.lt.s32.totalorder %v1551_v56, 0  ;;  %vm2456_vm13 = vcmp.eq.s32.totalorder %v4918_v49, %v6203_v7 }
 0x39f   :  { %2844 = vadd.xlane.f32.xlu1 %v2843_v9  ;;  %v4341_v9 = vld [vmem:[%s8027_s1 + $0x3e0] sm:$0xff]  ;;  %v2062_v14 = vsel %vm1678_vm14, 4294967295, %v1934_v31  ;;  %vm2457_vm14 = vcmp.eq.s32.totalorder %v4918_v49, %v6215_v34 }
 0x3a0   :  { %v2222_v40 = vpop.permute.xlu0 %2221  ;;  %v1424_v5 = vrot.slane %v4341_v9, 7  ;;  %v1936_v13 = vadd.s32 %v4340_v54, %v1808_v0  ;;  %v2591_v7 = vsel %vm2457_vm14, %v6658_v30, 0.0  ;;  %vm2473_vm14 = vcmp.eq.s32.totalorder %v4918_v49, %v6323_v47 }
 0x3a1   :  { %2413 = vperm.xlu0 %4213, %v2056_v18   ;;  %v6873_v18 = vpop.permute.xlu1 %2392  ;;  %vm2504_vm15 = vcmp.eq.s32.totalorder %v4918_v49, %v2222_v40  ;;  %v2726_v34 = vsel %vm2716_vm11, %v2591_v7, 0.0 }
 0x3a2   :  { %v1553_v17 = vsel %vm1428_vm8, 4294967295, %v1424_v5  ;;  %v2638_v63 = vsel %vm2504_vm15, %v6658_v30, 0.0  ;;  %vm2459_vm15 = vcmp.eq.s32.totalorder %v4918_v49, %v6229_v61 }
 0x3a3   :  { %2850 = vadd.xlane.f32.xlu1 %v2849_v51  ;;  %v4342_v51 = vld [vmem:[%s8027_s1 + $0x3f0] sm:$0xff]  ;;  %v1810_v6 = vmul.u32 5, %v1553_v17  ;;  %v2867_v40 = vsel %vm2716_vm11, %v2638_v63, 0.0  ;;  %vm1682_vm1 = vcmp.lt.s32.totalorder %v1553_v17, 0 }
 0x3a4   :  { %v2228_v50 = vpop.permute.xlu0 %2227  ;;  %v1426_v21 = vrot.slane %v4342_v51, 7 }
 0x3a5   :  { %2419 = vperm.xlu0 %4213, %v2058_v58   ;;  %v2861_v58 = vsel %vm2716_vm11, %v2636_v16, 0.0  ;;  %v6887_v53 = vpop.permute.xlu1 %2398  ;;  %vm2506_vm4 = vcmp.eq.s32.totalorder %v4918_v49, %v2228_v50  ;;  %v1938_v16 = vadd.s32 %v4341_v9, %v1810_v6 }
 0x3a6   :  { %v2640_v54 = vsel %vm2506_vm4, %v6658_v30, 0.0 }
 0x3a7   :  { %2856 = vadd.xlane.f32.xlu1 %v2855_v55  ;;  %v1555_v55 = vsel %vm1428_vm8, 4294967295, %v1426_v21  ;;  %v2873_v0 = vsel %vm2716_vm11, %v2640_v54, 0.0  ;;  %v2066_v50 = vsel %vm1682_vm1, 4294967295, %v1938_v16  ;;  %vm2461_vm1 = vcmp.eq.s32.totalorder %v4918_v49, %v6243_v2 }
 0x3a8   :  { %v2234_v59 = vpop.permute.xlu0 %2233  ;;  %v1812_v31 = vmul.u32 5, %v1555_v55  ;;  %vm1684_vm8 = vcmp.lt.s32.totalorder %v1555_v55, 0  ;;  %v2595_v7 = vsel %vm2461_vm1, %v6658_v30, 0.0  ;;  %vm2477_vm1 = vcmp.eq.s32.totalorder %v4918_v49, %v6349_v41 }
 0x3a9   :  { %2425 = vperm.xlu0 %4213, %v2060_v25   ;;  %v2064_v25 = vsel %vm1680_vm0, 4294967295, %v1936_v13  ;;  %vm2508_vm2 = vcmp.eq.s32.totalorder %v4918_v49, %v2234_v59  ;;  %v6893_v21 = vpop.permute.xlu1 %2404  ;;  %vm2515_vm0 = vcmp.eq.s32.totalorder %v4918_v49, %v6590_v26 }
 0x3ab   :  { %2862 = vadd.xlane.f32.xlu1 %v2861_v58  ;;  %v1940_v58 = vadd.s32 %v4342_v51, %v1812_v31 }
 0x3ac   :  { %v2240_v5 = vpop.permute.xlu0 %2239 }
 0x3ad   :  { %2431 = vperm.xlu0 %4213, %v2062_v14   ;;  %v2642_v14 = vsel %vm2508_vm2, %v6658_v30, 0.0  ;;  %vm2510_vm3 = vcmp.eq.s32.totalorder %v4918_v49, %v2240_v5  ;;  %v2068_v59 = vsel %vm1684_vm8, 4294967295, %v1940_v58  ;;  %v6902_v6 = vpop.permute.xlu1 %2410  ;;  %vm2529_vm2 = vcmp.eq.s32.totalorder %v4918_v49, %v6647_v23 }
 0x3ae   :  { %v2879_v17 = vsel %vm2716_vm11, %v2642_v14, 0.0  ;;  %v2644_v13 = vsel %vm2510_vm3, %v6658_v30, 0.0  ;;  %v2661_v14 = vsel %vm2527_vm9, %v6658_v30, 0.0  ;;  %vm2463_vm8 = vcmp.eq.s32.totalorder %v4918_v49, %v6255_v10 }
 0x3af   :  { %2868 = vadd.xlane.f32.xlu1 %v2867_v40  ;;  %v2885_v63 = vsel %vm2716_vm11, %v2644_v13, 0.0  ;;  %v2936_v13 = vsel %vm2716_vm11, %v2661_v14, 0.0  ;;  %v2738_v23 = vsel %vm2716_vm11, %v2595_v7, 0.0  ;;  %vm2465_vm3 = vcmp.eq.s32.totalorder %v4918_v49, %v6269_v22 }
 0x3b0   :  { %v2246_v56 = vpop.permute.xlu0 %2245  ;;  %vm2469_vm9 = vcmp.eq.s32.totalorder %v4918_v49, %v6295_v48 }
 0x3b1   :  { %2437 = vperm.xlu0 %4213, %v2064_v25   ;;  %vm2512_vm5 = vcmp.eq.s32.totalorder %v4918_v49, %v2246_v56  ;;  %v6910_v40 = vpop.permute.xlu1 %2416 }
 0x3b2   :  { %v2646_v55 = vsel %vm2512_vm5, %v6658_v30, 0.0  ;;  %vm2467_vm5 = vcmp.eq.s32.totalorder %v4918_v49, %v6283_v37 }
 0x3b3   :  { %2874 = vadd.xlane.f32.xlu1 %v2873_v0  ;;  %v2891_v25 = vsel %vm2716_vm11, %v2646_v55, 0.0  ;;  %v2918_v55 = vsel %vm2716_vm11, %v2655_v19, 0.0 }
 0x3b4   :  { %v6898_v9 = vpop.permute.xlu0 %2251 }
 0x3b5   :  { %2443 = vperm.xlu0 %4213, %v2066_v50   ;;  %v6919_v0 = vpop.permute.xlu1 %2422 }
 0x3b7   :  { %2880 = vadd.xlane.f32.xlu1 %v2879_v17 }
 0x3b8   :  { %v6905_v51 = vpop.permute.xlu0 %2257 }
 0x3b9   :  { %2449 = vperm.xlu0 %4213, %v2068_v59   ;;  %v6929_v59 = vpop.permute.xlu1 %2428 }
 0x3bb   :  { %2886 = vadd.xlane.f32.xlu1 %v2885_v63 }
 0x3bc   :  { %v2264_v5 = vpop.permute.xlu0 %2263 }
 0x3bd   :  { %vm2518_vm6 = vcmp.eq.s32.totalorder %v4918_v49, %v2264_v5  ;;  %v6936_v5 = vpop.permute.xlu1 %2434 }
 0x3be   :  { %v2652_v16 = vsel %vm2518_vm6, %v6658_v30, 0.0  ;;  %vm2516_vm6 = vcmp.eq.s32.totalorder %v4918_v49, %v6905_v51 }
 0x3bf   :  { %2892 = vadd.xlane.f32.xlu1 %v2891_v25  ;;  %v2909_v54 = vsel %vm2716_vm11, %v2652_v16, 0.0  ;;  %v2588_v16 = vsel %vm2454_vm12, %v6658_v30, 0.0  ;;  %vm2471_vm12 = vcmp.eq.s32.totalorder %v4918_v49, %v6309_v20 }
 0x3c0   :  { %v2270_v31 = vpop.permute.xlu0 %2269 }
 0x3c1   :  { %vm2520_vm7 = vcmp.eq.s32.totalorder %v4918_v49, %v2270_v31  ;;  %v6947_v31 = vpop.permute.xlu1 %2440 }
 0x3c2   :  { %v2654_v56 = vsel %vm2520_vm7, %v6658_v30, 0.0 }
 0x3c3   :  { %2910 = vadd.xlane.f32.xlu1 %v2909_v54  ;;  %v2915_v58 = vsel %vm2716_vm11, %v2654_v56, 0.0  ;;  %v2717_v54 = vsel %vm2716_vm11, %v2588_v16, 0.0 }
 0x3c4   :  { %v6921_v50 = vpop.permute.xlu0 %2275 }
 0x3c5   :  { %v6956_v14 = vpop.permute.xlu1 %2446 }
 0x3c7   :  { %2916 = vadd.xlane.f32.xlu1 %v2915_v58  ;;  %v2590_v58 = vsel %vm2456_vm13, %v6658_v30, 0.0 }
 0x3c8   :  { %v6927_v17 = vpop.permute.xlu0 %2281  ;;  %v2723_v39 = vsel %vm2716_vm11, %v2590_v58, 0.0  ;;  %v2649_v58 = vsel %vm2515_vm0, %v6658_v30, 0.0  ;;  %vm2475_vm0 = vcmp.eq.s32.totalorder %v4918_v49, %v6335_v43 }
 0x3c9   :  { %v6975_v61 = vpop.permute.xlu1 %2452 }
 0x3cb   :  { %2937 = vadd.xlane.f32.xlu1 %v2936_v13 }
 0x3cc   :  { %v6933_v63 = vpop.permute.xlu0 %2287 }
 0x3cf   :  { %2919 = vadd.xlane.f32.xlu1 %v2918_v55 }
 0x3d0   :  { %v6938_v25 = vpop.permute.xlu0 %2293 }
 0x3d4   :  { %v6942_v4 = vpop.permute.xlu0 %2299 }
 0x3d5   :  { %vm2530_vm10 = vcmp.eq.s32.totalorder %v4918_v49, %v6942_v4 }
 0x3d8   :  { %2718 = vadd.xlane.f32.xlu0 %v2717_v54  ;;  %v6950_v56 = vpop.permute.xlu0 %2305  ;;  %v2593_v54 = vsel %vm2459_vm15, %v6658_v30, 0.0  ;;  %vm2551_vm15 = vcmp.eq.s32.totalorder %v4918_v49, %v6806_v12 }
 0x3d9   :  { %v2732_v26 = vsel %vm2716_vm11, %v2593_v54, 0.0  ;;  %v2597_v54 = vsel %vm2463_vm8, %v6658_v30, 0.0  ;;  %vm2479_vm8 = vcmp.eq.s32.totalorder %v4918_v49, %v6363_v15 }
 0x3dc   :  { %2724 = vadd.xlane.f32.xlu0 %v2723_v39  ;;  %v2312_v13 = vpop.permute.xlu0 %2311  ;;  %v2900_v39 = vsel %vm2716_vm11, %v2649_v58, 0.0  ;;  %v6985_v2 = vpop.xlane.xlu1 %2721  ;;  %v2744_v58 = vsel %vm2716_vm11, %v2597_v54, 0.0  ;;  %v2650_v54 = vsel %vm2516_vm6, %v6658_v30, 0.0  ;;  %vm2559_vm6 = vcmp.eq.s32.totalorder %v4918_v49, %v6862_v45 }
 0x3dd   :  { %vm2534_vm4 = vcmp.eq.s32.totalorder %v4918_v49, %v2312_v13 }
 0x3de   :  { %v2668_v19 = vsel %vm2534_vm4, %v6658_v30, 0.0  ;;  %vm2524_vm4 = vcmp.eq.s32.totalorder %v4918_v49, %v6927_v17 }
 0x3df   :  { %v2957_v55 = vsel %vm2716_vm11, %v2668_v19, 0.0  ;;  %v2663_v19 = vsel %vm2529_vm2, %v6658_v30, 0.0 }
 0x3e0   :  { %2727 = vadd.xlane.f32.xlu0 %v2726_v34  ;;  %2958 = vadd.xlane.f32.xlu1 %v2957_v55  ;;  %v6967_v16 = vpop.permute.xlu0 %2317  ;;  %v2942_v34 = vsel %vm2716_vm11, %v2663_v19, 0.0 }
 0x3e4   :  { %2733 = vadd.xlane.f32.xlu0 %v2732_v26  ;;  %2901 = vadd.xlane.f32.xlu1 %v2900_v39  ;;  %v6979_v13 = vpop.permute.xlu0 %2323  ;;  %v6995_v26 = vpop.xlane.xlu1 %2730  ;;  %v2599_v39 = vsel %vm2465_vm3, %v6658_v30, 0.0 }
 0x3e5   :  { %v2750_v22 = vsel %vm2716_vm11, %v2599_v39, 0.0  ;;  %v2603_v39 = vsel %vm2469_vm9, %v6658_v30, 0.0  ;;  %vm2538_vm2 = vcmp.eq.s32.totalorder %v4918_v49, %v6979_v13  ;;  %vm2532_vm9 = vcmp.eq.s32.totalorder %v4918_v49, %v6950_v56 }
 0x3e6   :  { %v2762_v48 = vsel %vm2716_vm11, %v2603_v39, 0.0  ;;  %v2685_v39 = vsel %vm2551_vm15, %v6658_v30, 0.0  ;;  %vm2489_vm15 = vcmp.eq.s32.totalorder %v4918_v49, %v6429_v8 }
 0x3e8   :  { %2739 = vadd.xlane.f32.xlu0 %v2738_v23  ;;  %2943 = vadd.xlane.f32.xlu1 %v2942_v34  ;;  %v6989_v55 = vpop.permute.xlu0 %2329  ;;  %v2601_v34 = vsel %vm2467_vm5, %v6658_v30, 0.0  ;;  %v7012_v37 = vpop.xlane.xlu1 %2736  ;;  %vm2481_vm5 = vcmp.eq.s32.totalorder %v4918_v49, %v6375_v36 }
 0x3e9   :  { %v2756_v51 = vsel %vm2716_vm11, %v2601_v34, 0.0  ;;  %v2605_v34 = vsel %vm2471_vm12, %v6658_v30, 0.0 }
 0x3ea   :  { %v2768_v20 = vsel %vm2716_vm11, %v2605_v34, 0.0  ;;  %v2658_v34 = vsel %vm2524_vm4, %v6658_v30, 0.0  ;;  %vm2491_vm4 = vcmp.eq.s32.totalorder %v4918_v49, %v6443_v38 }
 0x3eb   :  { %v2927_v17 = vsel %vm2716_vm11, %v2658_v34, 0.0 }
 0x3ec   :  { %2745 = vadd.xlane.f32.xlu0 %v2744_v58  ;;  %v2336_v10 = vpop.permute.xlu0 %2335  ;;  %v2903_v58 = vsel %vm2716_vm11, %v2650_v54, 0.0 }
 0x3ed   :  { %vm2542_vm7 = vcmp.eq.s32.totalorder %v4918_v49, %v2336_v10 }
 0x3ee   :  { %v2676_v7 = vsel %vm2542_vm7, %v6658_v30, 0.0  ;;  %vm2483_vm7 = vcmp.eq.s32.totalorder %v4918_v49, %v6389_v29 }
 0x3ef   :  { %v2981_v19 = vsel %vm2716_vm11, %v2676_v7, 0.0  ;;  %v2664_v7 = vsel %vm2530_vm10, %v6658_v30, 0.0  ;;  %vm2485_vm10 = vcmp.eq.s32.totalorder %v4918_v49, %v6403_v52 }
 0x3f0   :  { %2751 = vadd.xlane.f32.xlu0 %v2750_v22  ;;  %2982 = vadd.xlane.f32.xlu1 %v2981_v19  ;;  %v2342_v23 = vpop.permute.xlu0 %2341  ;;  %v2945_v4 = vsel %vm2716_vm11, %v2664_v7, 0.0  ;;  %v7025_v22 = vpop.xlane.xlu1 %2742  ;;  %v3008_v7 = vsel %vm2716_vm11, %v2685_v39, 0.0 }
 0x3f1   :  { %vm2544_vm13 = vcmp.eq.s32.totalorder %v4918_v49, %v2342_v23 }
 0x3f2   :  { %v2678_v54 = vsel %vm2544_vm13, %v6658_v30, 0.0  ;;  %vm2487_vm13 = vcmp.eq.s32.totalorder %v4918_v49, %v6415_v32 }
 0x3f3   :  { %v2987_v23 = vsel %vm2716_vm11, %v2678_v54, 0.0 }
 0x3f4   :  { %2757 = vadd.xlane.f32.xlu0 %v2756_v51  ;;  %2904 = vadd.xlane.f32.xlu1 %v2903_v58  ;;  %v7016_v10 = vpop.permute.xlu0 %2347  ;;  %v2607_v58 = vsel %vm2473_vm14, %v6658_v30, 0.0  ;;  %v7045_v47 = vpop.xlane.xlu1 %2748 }
 0x3f5   :  { %v2774_v12 = vsel %vm2716_vm11, %v2607_v58, 0.0  ;;  %v2672_v58 = vsel %vm2538_vm2, %v6658_v30, 0.0  ;;  %vm2546_vm12 = vcmp.eq.s32.totalorder %v4918_v49, %v7016_v10  ;;  %vm2493_vm2 = vcmp.eq.s32.totalorder %v4918_v49, %v6455_v28 }
 0x3f6   :  { %v2969_v13 = vsel %vm2716_vm11, %v2672_v58, 0.0 }
 0x3f8   :  { %2763 = vadd.xlane.f32.xlu0 %v2762_v48  ;;  %2946 = vadd.xlane.f32.xlu1 %v2945_v4  ;;  %v7027_v19 = vpop.permute.xlu0 %2353  ;;  %v2609_v4 = vsel %vm2475_vm0, %v6658_v30, 0.0  ;;  %v7057_v54 = vpop.xlane.xlu1 %2754  ;;  %vm2567_vm0 = vcmp.eq.s32.totalorder %v4918_v49, %v6902_v6 }
 0x3f9   :  { %v2780_v43 = vsel %vm2716_vm11, %v2609_v4, 0.0 }
 0x3fc   :  { %2769 = vadd.xlane.f32.xlu0 %v2768_v20  ;;  %2988 = vadd.xlane.f32.xlu1 %v2987_v23  ;;  %v7037_v51 = vpop.permute.xlu0 %2359  ;;  %v2611_v23 = vsel %vm2477_vm1, %v6658_v30, 0.0  ;;  %v7076_v15 = vpop.xlane.xlu1 %2760  ;;  %vm2540_vm1 = vcmp.eq.s32.totalorder %v4918_v49, %v6989_v55 }
 0x3fd   :  { %v2786_v41 = vsel %vm2716_vm11, %v2611_v23, 0.0 }
 0x400   :  { %2775 = vadd.xlane.f32.xlu0 %v2774_v12  ;;  %3009 = vadd.xlane.f32.xlu1 %v3008_v7  ;;  %v2366_v48 = vpop.permute.xlu0 %2365  ;;  %v2613_v12 = vsel %vm2479_vm8, %v6658_v30, 0.0  ;;  %v7090_v23 = vpop.xlane.xlu1 %2766 }
 0x401   :  { %vm2552_vm3 = vcmp.eq.s32.totalorder %v4918_v49, %v2366_v48  ;;  %v2792_v48 = vsel %vm2716_vm11, %v2613_v12, 0.0 }
 0x402   :  { %v2686_v7 = vsel %vm2552_vm3, %v6658_v30, 0.0  ;;  %vm2495_vm3 = vcmp.eq.s32.totalorder %v4918_v49, %v6469_v46 }
 0x403   :  { %v3011_v4 = vsel %vm2716_vm11, %v2686_v7, 0.0  ;;  %v7105_v7 = vld [vmem:[%s8028_s2] ss:$0 sm:$0xff]  ;;  %s4369_s2 = smov [#allocation2]  }
 0x404   :  { %2781 = vadd.xlane.f32.xlu0 %v2780_v43  ;;  %2928 = vadd.xlane.f32.xlu1 %v2927_v17  ;;  %v7059_v20 = vpop.permute.xlu0 %2371  ;;  %v2615_v43 = vsel %vm2481_vm5, %v6658_v30, 0.0  ;;  %v2693_v17 = vsel %vm2559_vm6, %v6658_v30, 0.0  ;;  %v2680_v52 = vsel %vm2546_vm12, %v7105_v7, 0.0  ;;  %v7112_v10 = vpop.xlane.xlu1 %2772  ;;  %vm2497_vm6 = vcmp.eq.s32.totalorder %v4918_v49, %v6483_v60  ;;  %s4202_s20 = sshll.u32 %s4369_s2, 4  ;;  %s4203_s20 = int_to_ptr.vmem [resolvable:$true] %s4202_s20 }
 0x405   :  { %v2798_v36 = vsel %vm2716_vm11, %v2615_v43, 0.0  ;;  %v3032_v45 = vsel %vm2716_vm11, %v2693_v17, 0.0  ;;  %v2621_v17 = vsel %vm2487_vm13, %v7105_v7, 0.0  ;;  %vm2554_vm8 = vcmp.eq.s32.totalorder %v4918_v49, %v7059_v20  ;;  %s4344_s21 = scalar_lea.vmem %s4203_s20, 16  ;;  %s4348_s22 = scalar_lea.vmem %s4203_s20, 32 }
 0x406   :  { %v2816_v32 = vsel %vm2716_vm11, %v2621_v17, 0.0  ;;  %v2627_v17 = vsel %vm2493_vm2, %v7105_v7, 0.0  ;;  %vm2501_vm12 = vcmp.eq.s32.totalorder %v4918_v49, %v6509_v33  ;;  %p4345_p0 = scmp.ne.s32.totalorder %s4203_s20, %s4344_s21  ;;  %p4349_p1 = scmp.lt.s32.totalorder %s4203_s20, %s4203_s20 }
 0x407   :  { %v2834_v28 = vsel %vm2716_vm11, %v2627_v17, 0.0  ;;  %p4350_p2 = scmp.lt.s32.totalorder %s4348_s22, %s4344_s21 }
 0x408   :  { %2787 = vadd.xlane.f32.xlu0 %v2786_v41  ;;  %2970 = vadd.xlane.f32.xlu1 %v2969_v13  ;;  %v7068_v39 = vpop.permute.xlu0 %2377  ;;  %v2617_v41 = vsel %vm2483_vm7, %v6658_v30, 0.0  ;;  %v2666_v13 = vsel %vm2532_vm9, %v6658_v30, 0.0  ;;  %v2619_v30 = vsel %vm2485_vm10, %v7105_v7, 0.0  ;;  %vm2575_vm7 = vcmp.eq.s32.totalorder %v4918_v49, %v6936_v5 }
 0x409   :  { %v2804_v29 = vsel %vm2716_vm11, %v2617_v41, 0.0  ;;  %v2951_v56 = vsel %vm2716_vm11, %v2666_v13, 0.0  ;;  %v2623_v13 = vsel %vm2489_vm15, %v7105_v7, 0.0  ;;  %vm2499_vm9 = vcmp.eq.s32.totalorder %v4918_v49, %v6495_v62  ;;  %p4351_p3 = por %p4350_p2, %p4349_p1 }
 0x40a   :  { %v2822_v8 = vsel %vm2716_vm11, %v2623_v13, 0.0  ;;  %v2629_v13 = vsel %vm2495_vm3, %v7105_v7, 0.0  ;;  %vm2548_vm10 = vcmp.eq.s32.totalorder %v4918_v49, %v7027_v19  ;;  %vm2557_vm3 = vcmp.eq.s32.totalorder %v4918_v49, %v6845_v57 }
 0x40b   :  { %v2840_v46 = vsel %vm2716_vm11, %v2629_v13, 0.0  ;;  %p4352_p4 = pnand %p4351_p3, %p4345_p0 }
 0x40c   :  { %2793 = vadd.xlane.f32.xlu0 %v2792_v48  ;;  %3012 = vadd.xlane.f32.xlu1 %v3011_v4  ;;  %v7080_v34 = vpop.permute.xlu0 %2383  ;;  %v2810_v48 = vsel %vm2716_vm11, %v2619_v30, 0.0  ;;  %v2993_v4 = vsel %vm2716_vm11, %v2680_v52, 0.0  ;;  %v2625_v30 = vsel %vm2491_vm4, %v7105_v7, 0.0  ;;  %v2674_v52 = vsel %vm2540_vm1, %v7105_v7, 0.0 }
 0x40d   :  { %v2828_v55 = vsel %vm2716_vm11, %v2625_v30, 0.0  ;;  %v2709_v30 = vsel %vm2575_vm7, %v7105_v7, 0.0  ;;  %vm2556_vm4 = vcmp.eq.s32.totalorder %v4918_v49, %v7068_v39  ;;  %vm2507_vm1 = vcmp.eq.s32.totalorder %v4918_v49, %v6549_v1 }
 0x40e   :  { %vm2513_vm7 = vcmp.eq.s32.totalorder %v4918_v49, %v6581_v35 }
 0x410   :  { %2799 = vadd.xlane.f32.xlu0 %v2798_v36  ;;  %3033 = vadd.xlane.f32.xlu1 %v3032_v45  ;;  %v2390_v58 = vpop.permute.xlu0 %2389 }
 0x411   :  { %vm2560_vm14 = vcmp.eq.s32.totalorder %v4918_v49, %v2390_v58  ;;  %v7126_v58 = vpop.xlane.xlu1 %2778 }
 0x412   :  { %v2694_v36 = vsel %vm2560_vm14, %v7105_v7, 0.0  ;;  %vm2503_vm14 = vcmp.eq.s32.totalorder %v4918_v49, %v6523_v44 }
 0x413   :  { %v3035_v45 = vsel %vm2716_vm11, %v2694_v36, 0.0  ;;  %v2688_v36 = vsel %vm2554_vm8, %v7105_v7, 0.0  ;;  %v2637_v13 = vsel %vm2503_vm14, %v7105_v7, 0.0  ;;  %vm2509_vm8 = vcmp.eq.s32.totalorder %v4918_v49, %v6563_v11 }
 0x414   :  { %2805 = vadd.xlane.f32.xlu0 %v2804_v29  ;;  %2952 = vadd.xlane.f32.xlu1 %v2951_v56  ;;  %v7100_v12 = vpop.permute.xlu0 %2395  ;;  %v2701_v29 = vsel %vm2567_vm0, %v7105_v7, 0.0  ;;  %v3017_v20 = vsel %vm2716_vm11, %v2688_v36, 0.0  ;;  %vm2505_vm0 = vcmp.eq.s32.totalorder %v4918_v49, %v6535_v27  ;;  %v2864_v44 = vsel %vm2716_vm11, %v2637_v13, 0.0 }
 0x415   :  { %v3056_v6 = vsel %vm2716_vm11, %v2701_v29, 0.0  ;;  %v7144_v38 = vpop.xlane.xlu1 %2784  ;;  %vm2562_vm13 = vcmp.eq.s32.totalorder %v4918_v49, %v7100_v12 }
 0x418   :  { %2811 = vadd.xlane.f32.xlu0 %v2810_v48  ;;  %2994 = vadd.xlane.f32.xlu1 %v2993_v4  ;;  %v7116_v43 = vpop.permute.xlu0 %2401  ;;  %v2975_v48 = vsel %vm2716_vm11, %v2674_v52, 0.0  ;;  %v3080_v52 = vsel %vm2716_vm11, %v2709_v30, 0.0  ;;  %v2690_v30 = vsel %vm2556_vm4, %v7105_v7, 0.0 }
 0x419   :  { %v3023_v39 = vsel %vm2716_vm11, %v2690_v30, 0.0 }
 0x41c   :  { %2817 = vadd.xlane.f32.xlu0 %v2816_v32  ;;  %3036 = vadd.xlane.f32.xlu1 %v3035_v45  ;;  %v7128_v41 = vpop.permute.xlu0 %2407  ;;  %v7157_v32 = vpop.xlane.xlu1 %2790 }
 0x420   :  { %2823 = vadd.xlane.f32.xlu0 %v2822_v8  ;;  %3057 = vadd.xlane.f32.xlu1 %v3056_v6  ;;  %v2414_v56 = vpop.permute.xlu0 %2413  ;;  %v7177_v60 = vpop.xlane.xlu1 %2796 }
 0x421   :  { %vm2568_vm5 = vcmp.eq.s32.totalorder %v4918_v49, %v2414_v56  ;;  %v2631_v56 = vsel %vm2497_vm6, %v7105_v7, 0.0  ;;  %vm2571_vm6 = vcmp.eq.s32.totalorder %v4918_v49, %v6919_v0 }
 0x422   :  { %v2702_v29 = vsel %vm2568_vm5, %v7105_v7, 0.0  ;;  %v2846_v5 = vsel %vm2716_vm11, %v2631_v56, 0.0  ;;  %v2639_v56 = vsel %vm2505_vm0, %v7105_v7, 0.0  ;;  %vm2511_vm5 = vcmp.eq.s32.totalorder %v4918_v49, %v6572_v24 }
 0x423   :  { %v3059_v8 = vsel %vm2716_vm11, %v2702_v29, 0.0  ;;  %v2870_v27 = vsel %vm2716_vm11, %v2639_v56, 0.0  ;;  %vm2528_vm0 = vcmp.eq.s32.totalorder %v4918_v49, %v6938_v25 }
 0x424   :  { %2829 = vadd.xlane.f32.xlu0 %v2828_v55  ;;  %2976 = vadd.xlane.f32.xlu1 %v2975_v48  ;;  %v7148_v4 = vpop.permute.xlu0 %2419  ;;  %v2633_v55 = vsel %vm2499_vm9, %v7105_v7, 0.0  ;;  %v2682_v48 = vsel %vm2548_vm10, %v7105_v7, 0.0  ;;  %v7189_v36 = vpop.xlane.xlu1 %2802  ;;  %vm2565_vm9 = vcmp.eq.s32.totalorder %v4918_v49, %v6893_v21  ;;  %vm2519_vm10 = vcmp.eq.s32.totalorder %v4918_v49, %v6606_v3 }
 0x425   :  { %v2852_v19 = vsel %vm2716_vm11, %v2633_v55, 0.0  ;;  %v2999_v17 = vsel %vm2716_vm11, %v2682_v48, 0.0  ;;  %vm2570_vm2 = vcmp.eq.s32.totalorder %v4918_v49, %v7148_v4  ;;  %v2643_v48 = vsel %vm2509_vm8, %v7105_v7, 0.0 }
 0x426   :  { %v2704_v55 = vsel %vm2570_vm2, %v7105_v7, 0.0  ;;  %v2882_v57 = vsel %vm2716_vm11, %v2643_v48, 0.0  ;;  %v2699_v13 = vsel %vm2565_vm9, %v7105_v7, 0.0  ;;  %v8215_v48 = vld [vmem:[#allocation138_spill] sm:$0xff]  ;;  %vm2536_vm2 = vcmp.eq.s32.totalorder %v4918_v49, %v6967_v16 }
 0x427   :  { %v3065_v4 = vsel %vm2716_vm11, %v2704_v55, 0.0  ;;  %vm2535_vm4 = vcmp.eq.s32.totalorder %v4918_v49, %v8215_v48  ;;  %v8222_v48 = vld [vmem:[#allocation8_spill] sm:$0xff] }
 0x428   :  { %2835 = vadd.xlane.f32.xlu0 %v2834_v28  ;;  %3018 = vadd.xlane.f32.xlu1 %v3017_v20  ;;  %v7159_v45 = vpop.permute.xlu0 %2425  ;;  %v2635_v28 = vsel %vm2501_vm12, %v7105_v7, 0.0  ;;  %v2696_v20 = vsel %vm2562_vm13, %v7105_v7, 0.0  ;;  %vm2579_vm12 = vcmp.eq.s32.totalorder %v4918_v49, %v6956_v14  ;;  %vm2526_vm13 = vcmp.eq.s32.totalorder %v4918_v49, %v6933_v63 }
 0x429   :  { %v2858_v33 = vsel %vm2716_vm11, %v2635_v28, 0.0  ;;  %v3041_v12 = vsel %vm2716_vm11, %v2696_v20, 0.0  ;;  %v2645_v28 = vsel %vm2511_vm5, %v7105_v7, 0.0  ;;  %v2705_v20 = vsel %vm2571_vm6, %v7105_v7, 0.0 }
 0x42a   :  { %v2888_v24 = vsel %vm2716_vm11, %v2645_v28, 0.0  ;;  %v3068_v0 = vsel %vm2716_vm11, %v2705_v20, 0.0  ;;  %v2660_v30 = vsel %vm2526_vm13, %v7105_v7, 0.0  ;;  %vm3869_vm5 = vcmask 1041409  }
 0x42b   :  { %vm3871_vm6 = vcmask 1042434   ;;  %vm2550_vm13 = vcmp.eq.s32.totalorder %v4918_v49, %v7037_v51 }
 0x42c   :  { %2841 = vadd.xlane.f32.xlu0 %v2840_v46  ;;  %3060 = vadd.xlane.f32.xlu1 %v3059_v8  ;;  %v7169_v6 = vpop.permute.xlu0 %2431  ;;  %v7204_v46 = vpop.xlane.xlu1 %2808 }
 0x430   :  { %2847 = vadd.xlane.f32.xlu0 %v2846_v5  ;;  %3081 = vadd.xlane.f32.xlu1 %v3080_v52  ;;  %v2438_v62 = vpop.permute.xlu0 %2437  ;;  %v7216_v5 = vpop.xlane.xlu1 %2814  ;;  %v2641_v52 = vsel %vm2507_vm1, %v7105_v7, 0.0  ;;  %vm2522_vm1 = vcmp.eq.s32.totalorder %v4918_v49, %v6921_v50 }
 0x431   :  { %vm2576_vm15 = vcmp.eq.s32.totalorder %v4918_v49, %v2438_v62  ;;  %v2876_v1 = vsel %vm2716_vm11, %v2641_v52, 0.0  ;;  %v2691_v62 = vsel %vm2557_vm3, %v7105_v7, 0.0  ;;  %v2656_v28 = vsel %vm2522_vm1, %v7105_v7, 0.0 }
 0x432   :  { %v2710_v29 = vsel %vm2576_vm15, %v7105_v7, 0.0  ;;  %vm2514_vm15 = vcmp.eq.s32.totalorder %v4918_v49, %v6898_v9 }
 0x433   :  { %v3083_v8 = vsel %vm2716_vm11, %v2710_v29, 0.0  ;;  %v3050_v29 = vsel %vm2716_vm11, %v2699_v13, 0.0  ;;  %v2648_v55 = vsel %vm2514_vm15, %v7105_v7, 0.0  ;;  %v2670_v13 = vsel %vm2536_vm2, %v7105_v7, 0.0 }
 0x434   :  { %2853 = vadd.xlane.f32.xlu0 %v2852_v19  ;;  %3000 = vadd.xlane.f32.xlu1 %v2999_v17  ;;  %v7232_v11 = vpop.xlane.xlu1 %2820  ;;  %v3026_v19 = vsel %vm2716_vm11, %v2691_v62, 0.0  ;;  %v7236_v17 = vpop.permute.xlu0 %2443  ;;  %vm3881_vm15 = vcmask 1047559  }
 0x438   :  { %2859 = vadd.xlane.f32.xlu0 %v2858_v33  ;;  %3042 = vadd.xlane.f32.xlu1 %v3041_v12  ;;  %v7246_v33 = vpop.xlane.xlu1 %2826  ;;  %v2647_v12 = vsel %vm2513_vm7, %v7105_v7, 0.0  ;;  %v2450_v35 = vpop.permute.xlu0 %2449  ;;  %vm3873_vm7 = vcmask 1043459  }
 0x439   :  { %v2894_v21 = vsel %vm2716_vm11, %v2647_v12, 0.0  ;;  %vm2580_vm14 = vcmp.eq.s32.totalorder %v4918_v49, %v2450_v35  ;;  %v8217_v35 = vld [vmem:[#allocation142_spill] sm:$0xff] }
 0x43a   :  { %vm2543_vm8 = vcmp.eq.s32.totalorder %v4918_v49, %v8217_v35  ;;  %v8224_v35 = vld [vmem:[#allocation21_spill] sm:$0xff] }
 0x43c   :  { %2865 = vadd.xlane.f32.xlu0 %v2864_v44  ;;  %3084 = vadd.xlane.f32.xlu1 %v3083_v8  ;;  %v2653_v44 = vsel %vm2519_vm10, %v7105_v7, 0.0  ;;  %v2713_v8 = vsel %vm2579_vm12, %v7105_v7, 0.0  ;;  %v7261_v3 = vpop.xlane.xlu1 %2832  ;;  %vm3875_vm10 = vcmask 1044484   ;;  %vm3877_vm12 = vcmask 1045509  }
 0x43d   :  { %v2912_v14 = vsel %vm2716_vm11, %v2653_v44, 0.0  ;;  %v3092_v56 = vsel %vm2716_vm11, %v2713_v8, 0.0  ;;  %v8219_v8 = vld [vmem:[#allocation11_spill] sm:$0xff] }
 0x440   :  { %2871 = vadd.xlane.f32.xlu0 %v2870_v27  ;;  %3024 = vadd.xlane.f32.xlu1 %v3023_v39  ;;  %v2714_v27 = vsel %vm2580_vm14, %v7105_v7, 0.0  ;;  %v2933_v39 = vsel %vm2716_vm11, %v2660_v30, 0.0  ;;  %v7271_v52 = vpop.xlane.xlu1 %2838  ;;  %vm3879_vm14 = vcmask 1046534  }
 0x441   :  { %v3095_v63 = vsel %vm2716_vm11, %v2714_v27, 0.0  ;;  %v2677_v27 = vsel %vm2543_vm8, %v7105_v7, 0.0  ;;  %vm2558_vm8 = vcmp.eq.s32.totalorder %v4918_v49, %v7080_v34 }
 0x442   :  { %v2692_v34 = vsel %vm2558_vm8, %v7105_v7, 0.0  ;;  %vm2561_vm8 = vcmp.eq.s32.totalorder %v4918_v49, %v6873_v18 }
 0x444   :  { %2877 = vadd.xlane.f32.xlu0 %v2876_v1  ;;  %3066 = vadd.xlane.f32.xlu1 %v3065_v4  ;;  %v2897_v1 = vsel %vm2716_vm11, %v2648_v55, 0.0  ;;  %v2662_v4 = vsel %vm2528_vm0, %v7105_v7, 0.0  ;;  %v7280_v9 = vpop.xlane.xlu1 %2844  ;;  %vm4004_vm0 = vcmask 64512  }
 0x445   :  { %v2939_v62 = vsel %vm2716_vm11, %v2662_v4, 0.0 }
 0x448   :  { %2883 = vadd.xlane.f32.xlu0 %v2882_v57  ;;  %3027 = vadd.xlane.f32.xlu1 %v3026_v19  ;;  %v2669_v57 = vsel %vm2535_vm4, %v7105_v7, 0.0  ;;  %v7287_v19 = vpop.xlane.xlu1 %2850 }
 0x449   :  { %v2960_v25 = vsel %vm2716_vm11, %v2669_v57, 0.0  ;;  %v2984_v57 = vsel %vm2716_vm11, %v2677_v27, 0.0 }
 0x44c   :  { %2889 = vadd.xlane.f32.xlu0 %v2888_v24  ;;  %3069 = vadd.xlane.f32.xlu1 %v3068_v0  ;;  %v2921_v24 = vsel %vm2716_vm11, %v2656_v28, 0.0  ;;  %v8216_v0 = vld [vmem:[#allocation12_spill] sm:$0xff]  ;;  %v7303_v16 = vpop.xlane.xlu1 %2856 }
 0x450   :  { %2895 = vadd.xlane.f32.xlu0 %v2894_v21  ;;  %3051 = vadd.xlane.f32.xlu1 %v3050_v29  ;;  %v7299_v21 = vsub.s32 %v4918_v49, %v5874_v42  ;;  %v8218_v29 = vld [vmem:[#allocation5_spill] sm:$0xff] }
 0x451   :  { %v3102_v44 = vadd.f32 %v6985_v2, %v8218_v29 }
 0x453   :  { %v3364_v2 = vrot.slane %v3102_v44, %v7299_v21  ;;  %v8225_v44 = vld [vmem:[#allocation6_spill] sm:$0xff] }
 0x454   :  { %2913 = vadd.xlane.f32.xlu0 %v2912_v14  ;;  %3093 = vadd.xlane.f32.xlu1 %v3092_v56  ;;  %v2963_v56 = vsel %vm2716_vm11, %v2670_v13, 0.0 }
 0x458   :  { %2934 = vadd.xlane.f32.xlu0 %v2933_v39  ;;  %3096 = vadd.xlane.f32.xlu1 %v3095_v63  ;;  %v8220_v39 = vld [vmem:[#allocation132_spill] sm:$0xff] }
 0x459   :  { %vm2523_vm3 = vcmp.eq.s32.totalorder %v4918_v49, %v8220_v39 }
 0x45c   :  { %2898 = vadd.xlane.f32.xlu0 %v2897_v1  ;;  %v8221_v1 = vld [vmem:[#allocation15_spill] sm:$0xff] }
 0x460   :  { %2940 = vadd.xlane.f32.xlu0 %v2939_v62  ;;  %v3105_v62 = vadd.f32 %v6995_v26, %v8222_v48  ;;  %v8227_v48 = vld [vmem:[#allocation10_spill] sm:$0xff] }
 0x462   :  { %v3376_v29 = vrot.slane %v3105_v62, %v7299_v21  ;;  %v3109_v62 = vadd.f32 %v7025_v22, %v8227_v48 }
 0x464   :  { %2961 = vadd.xlane.f32.xlu0 %v2960_v25  ;;  %v7317_v25 = vpop.xlane.xlu1 %2862 }
 0x465   :  { %v2719_v20 = vpop.xlane.xlu0 %2718 }
 0x466   :  { %v3101_v12 = vadd.f32 %v2719_v20, %v8216_v0  ;;  %v8223_v0 = vld [vmem:[#allocation139_spill] sm:$0xff] }
 0x467   :  { %vm2537_vm9 = vcmp.eq.s32.totalorder %v4918_v49, %v8223_v0  ;;  %v8229_v0 = vld [vmem:[#allocation22_spill] sm:$0xff] }
 0x468   :  { %2922 = vadd.xlane.f32.xlu0 %v2921_v24  ;;  %v3360_v30 = vrot.slane %v3101_v12, %v7299_v21  ;;  %v2657_v24 = vsel %vm2523_vm3, %v7105_v7, 0.0 }
 0x469   :  { %v2725_v50 = vpop.xlane.xlu0 %2724 }
 0x46a   :  { %v3103_v14 = vadd.f32 %v2725_v50, %v8219_v8  ;;  %v3870_v28 = vsel %vm3869_vm5, %v3364_v2, %v3360_v30  ;;  %v3107_v8 = vadd.f32 %v7012_v37, %v8225_v44  ;;  %v2671_v30 = vsel %vm2537_vm9, %v7105_v7, 0.0 }
 0x46c   :  { %2964 = vadd.xlane.f32.xlu0 %v2963_v56  ;;  %v3368_v63 = vrot.slane %v3103_v14, %v7299_v21  ;;  %v2924_v14 = vsel %vm2716_vm11, %v2657_v24, 0.0 }
 0x46d   :  { %v2728_v55 = vpop.xlane.xlu0 %2727 }
 0x46e   :  { %v3104_v4 = vadd.f32 %v2728_v55, %v8221_v1  ;;  %v3872_v12 = vsel %vm3871_vm6, %v3368_v63, %v3870_v28  ;;  %v7336_v63 = vpop.xlane.xlu1 %2868  ;;  %v8226_v55 = vld [vmem:[#allocation23_spill] sm:$0xff]  ;;  %v3384_v1 = vrot.slane %v3107_v8, %v7299_v21  ;;  %v8228_v28 = vld [vmem:[#allocation129_spill] sm:$0xff] }
 0x46f   :  { %vm2517_vm4 = vcmp.eq.s32.totalorder %v4918_v49, %v8228_v28 }
 0x470   :  { %v3372_v20 = vrot.slane %v3104_v4, %v7299_v21  ;;  %2985 = vadd.xlane.f32.xlu0 %v2984_v57  ;;  %v2966_v4 = vsel %vm2716_vm11, %v2671_v30, 0.0  ;;  %v2684_v57 = vsel %vm2550_vm13, %v7105_v7, 0.0 }
 0x471   :  { %v2734_v13 = vpop.xlane.xlu0 %2733  ;;  %v3005_v22 = vsel %vm2716_vm11, %v2684_v57, 0.0 }
 0x472   :  { %v3874_v26 = vsel %vm3873_vm7, %v3372_v20, %v3872_v12  ;;  %v3106_v50 = vadd.f32 %v2734_v13, %v8224_v35  ;;  %v7356_v44 = vpop.xlane.xlu1 %2874 }
 0x473   :  { %v3876_v39 = vsel %vm3875_vm10, %v3376_v29, %v3874_v26  ;;  %v8230_v26 = vld [vmem:[#allocation7_spill] sm:$0xff]  ;;  %v3392_v29 = vrot.slane %v3109_v62, %v7299_v21 }
 0x474   :  { %v3380_v56 = vrot.slane %v3106_v50, %v7299_v21  ;;  %2925 = vadd.xlane.f32.xlu0 %v2924_v14  ;;  %v3111_v35 = vadd.f32 %v7045_v47, %v8230_v26  ;;  %v2651_v14 = vsel %vm2517_vm4, %v7105_v7, 0.0  ;;  %v8234_v62 = vld [vmem:[#allocation143_spill] sm:$0xff]  ;;  %vm2566_vm4 = vcmp.eq.s32.totalorder %v4918_v49, %v7128_v41 }
 0x475   :  { %v2740_v27 = vpop.xlane.xlu0 %2739  ;;  %vm2545_vm2 = vcmp.eq.s32.totalorder %v4918_v49, %v8234_v62 }
 0x476   :  { %v3108_v2 = vadd.f32 %v2740_v27, %v8226_v55  ;;  %v3878_v37 = vsel %vm3877_vm12, %v3380_v56, %v3876_v39  ;;  %v8231_v56 = vld [vmem:[#allocation136_spill] sm:$0xff]  ;;  %v8232_v27 = vld [vmem:[#allocation25_spill] sm:$0xff]  ;;  %v3400_v55 = vrot.slane %v3111_v35, %v7299_v21  ;;  %v7373_v28 = vpop.xlane.xlu1 %2880 }
 0x477   :  { %v3880_v24 = vsel %vm3879_vm14, %v3384_v1, %v3878_v37  ;;  %vm2531_vm1 = vcmp.eq.s32.totalorder %v4918_v49, %v8231_v56  ;;  %v2906_v1 = vsel %vm2716_vm11, %v2651_v14, 0.0 }
 0x478   :  { %v3388_v51 = vrot.slane %v3108_v2, %v7299_v21  ;;  %2967 = vadd.xlane.f32.xlu0 %v2966_v4  ;;  %v8233_v2 = vld [vmem:[#allocation9_spill] sm:$0xff]  ;;  %v2665_v48 = vsel %vm2531_vm1, %v7105_v7, 0.0 }
 0x479   :  { %v2746_v20 = vpop.xlane.xlu0 %2745  ;;  %v3113_v37 = vadd.f32 %v7057_v54, %v8233_v2  ;;  %v2948_v26 = vsel %vm2716_vm11, %v2665_v48, 0.0  ;;  %v8239_v2 = vld [vmem:[#allocation134_spill] sm:$0xff] }
 0x47a   :  { %v3110_v12 = vadd.f32 %v2746_v20, %v8229_v0  ;;  %v3882_v13 = vsel %vm3881_vm15, %v3388_v51, %v3880_v24  ;;  %v8235_v24 = vld [vmem:[#allocation28_spill] sm:$0xff]  ;;  %vm2525_vm3 = vcmp.eq.s32.totalorder %v4918_v49, %v8239_v2 }
 0x47b   :  { %v4005_v50 = vsel %vm4004_vm0, %v3882_v13, 0.0  ;;  %v3408_v54 = vrot.slane %v3113_v37, %v7299_v21 }
 0x47c   :  { %v3396_v8 = vrot.slane %v3110_v12, %v7299_v21  ;;  %3006 = vadd.xlane.f32.xlu0 %v3005_v22  ;;  %4006 = vadd.xlane.f32.xlu1 %v4005_v50  ;;  %v8236_v12 = vld [vmem:[#allocation14_spill] sm:$0xff]  ;;  %v2679_v22 = vsel %vm2545_vm2, %v7105_v7, 0.0 }
 0x47d   :  { %v2752_v30 = vpop.xlane.xlu0 %2751  ;;  %v3115_v13 = vadd.f32 %v7076_v15, %v8236_v12  ;;  %v2990_v15 = vsel %vm2716_vm11, %v2679_v22, 0.0 }
 0x47e   :  { %v3883_v47 = vsel %vm3869_vm5, %v3396_v8, %v3392_v29  ;;  %v3112_v39 = vadd.f32 %v2752_v30, %v8232_v27  ;;  %v8237_v8 = vld [vmem:[#allocation30_spill] sm:$0xff] }
 0x47f   :  { %v3884_v51 = vsel %vm3871_vm6, %v3400_v55, %v3883_v47  ;;  %v3416_v30 = vrot.slane %v3115_v13, %v7299_v21  ;;  %v8238_v47 = vld [vmem:[#allocation13_spill] sm:$0xff] }
 0x480   :  { %v3404_v4 = vrot.slane %v3112_v39, %v7299_v21  ;;  %2907 = vadd.xlane.f32.xlu0 %v2906_v1  ;;  %v3117_v27 = vadd.f32 %v7090_v23, %v8238_v47  ;;  %v7392_v39 = vpop.xlane.xlu1 %2886 }
 0x481   :  { %v2758_v57 = vpop.xlane.xlu0 %2757 }
 0x482   :  { %v3885_v20 = vsel %vm3873_vm7, %v3404_v4, %v3884_v51  ;;  %v3114_v0 = vadd.f32 %v2758_v57, %v8235_v24  ;;  %v8240_v4 = vld [vmem:[#allocation33_spill] sm:$0xff]  ;;  %v8241_v51 = vld [vmem:[#allocation16_spill] sm:$0xff]  ;;  %v3029_v57 = vsel %vm2716_vm11, %v2692_v34, 0.0 }
 0x483   :  { %v3886_v29 = vsel %vm3875_vm10, %v3408_v54, %v3885_v20  ;;  %v3119_v23 = vadd.f32 %v7112_v10, %v8241_v51  ;;  %v3424_v20 = vrot.slane %v3117_v27, %v7299_v21  ;;  %v8242_v54 = vld [vmem:[#allocation140_spill] sm:$0xff] }
 0x484   :  { %v3412_v35 = vrot.slane %v3114_v0, %v7299_v21  ;;  %2949 = vadd.xlane.f32.xlu0 %v2948_v26  ;;  %v2659_v0 = vsel %vm2525_vm3, %v7105_v7, 0.0  ;;  %vm2539_vm9 = vcmp.eq.s32.totalorder %v4918_v49, %v8242_v54  ;;  %v7411_v13 = vpop.xlane.xlu1 %2892  ;;  %vm2574_vm3 = vcmp.eq.s32.totalorder %v4918_v49, %v7169_v6 }
 0x485   :  { %v2764_v50 = vpop.xlane.xlu0 %2763  ;;  %v3432_v10 = vrot.slane %v3119_v23, %v7299_v21  ;;  %v2708_v18 = vsel %vm2574_vm3, %v7105_v7, 0.0  ;;  %vm2564_vm3 = vcmp.eq.s32.totalorder %v4918_v49, %v7116_v43  ;;  %v8262_v43 = vld [vmem:[#allocation43_spill] sm:$0xff] }
 0x486   :  { %v3116_v14 = vadd.f32 %v2764_v50, %v8237_v8  ;;  %v3887_v56 = vsel %vm3877_vm12, %v3412_v35, %v3886_v29  ;;  %v8243_v35 = vld [vmem:[#allocation35_spill] sm:$0xff]  ;;  %v8244_v50 = vld [vmem:[#allocation17_spill] sm:$0xff]  ;;  %v2930_v8 = vsel %vm2716_vm11, %v2659_v0, 0.0 }
 0x487   :  { %v3888_v1 = vsel %vm3879_vm14, %v3416_v30, %v3887_v56  ;;  %v3121_v29 = vadd.f32 %v7126_v58, %v8244_v50  ;;  %v2673_v56 = vsel %vm2539_vm9, %v7105_v7, 0.0  ;;  %v8245_v30 = vld [vmem:[#allocation146_spill] sm:$0xff] }
 0x488   :  { %v3420_v55 = vrot.slane %v3116_v14, %v7299_v21  ;;  %2991 = vadd.xlane.f32.xlu0 %v2990_v15  ;;  %vm2553_vm13 = vcmp.eq.s32.totalorder %v4918_v49, %v8245_v30  ;;  %v8247_v58 = vld [vmem:[#allocation18_spill] sm:$0xff] }
 0x489   :  { %v2770_v37 = vpop.xlane.xlu0 %2769  ;;  %v3440_v2 = vrot.slane %v3121_v29, %v7299_v21  ;;  %v2687_v51 = vsel %vm2553_vm13, %v7105_v7, 0.0 }
 0x48a   :  { %v3118_v48 = vadd.f32 %v2770_v37, %v8240_v4  ;;  %v7401_v62 = vsel %vm3881_vm15, %v3420_v55, %v3888_v1  ;;  %v8246_v55 = vld [vmem:[#allocation38_spill] sm:$0xff]  ;;  %v3123_v37 = vadd.f32 %v7144_v38, %v8247_v58  ;;  %v2972_v1 = vsel %vm2716_vm11, %v2673_v56, 0.0  ;;  %v7430_v4 = vpop.xlane.xlu1 %2910  ;;  %v8250_v56 = vld [vmem:[#allocation144_spill] sm:$0xff] }
 0x48b   :  { %v3014_v54 = vsel %vm2716_vm11, %v2687_v51, 0.0  ;;  %vm2547_vm2 = vcmp.eq.s32.totalorder %v4918_v49, %v8250_v56 }
 0x48c   :  { %v3428_v24 = vrot.slane %v3118_v48, %v7299_v21  ;;  %3030 = vadd.xlane.f32.xlu0 %v3029_v57  ;;  %v3448_v38 = vrot.slane %v3123_v37, %v7299_v21 }
 0x48d   :  { %v2776_v12 = vpop.xlane.xlu0 %2775 }
 0x48e   :  { %v3890_v26 = vsel %vm3869_vm5, %v3428_v24, %v3424_v20  ;;  %v3120_v22 = vadd.f32 %v2776_v12, %v8243_v35  ;;  %v8248_v20 = vld [vmem:[#allocation40_spill] sm:$0xff]  ;;  %v8249_v35 = vld [vmem:[#allocation137_spill] sm:$0xff] }
 0x48f   :  { %v3891_v15 = vsel %vm3871_vm6, %v3432_v10, %v3890_v26  ;;  %v2700_v26 = vsel %vm2566_vm4, %v7105_v7, 0.0  ;;  %vm2533_vm1 = vcmp.eq.s32.totalorder %v4918_v49, %v8249_v35  ;;  %v7448_v10 = vpop.xlane.xlu1 %2916  ;;  %v8255_v35 = vld [vmem:[#allocation147_spill] sm:$0xff]  ;;  %vm2569_vm4 = vcmp.eq.s32.totalorder %v4918_v49, %v6910_v40  ;;  %v8260_v40 = vld [vmem:[#allocation145_spill] sm:$0xff] }
 0x490   :  { %v3436_v14 = vrot.slane %v3120_v22, %v7299_v21  ;;  %2931 = vadd.xlane.f32.xlu0 %v2930_v8  ;;  %v3053_v29 = vsel %vm2716_vm11, %v2700_v26, 0.0  ;;  %vm2555_vm13 = vcmp.eq.s32.totalorder %v4918_v49, %v8255_v35 }
 0x491   :  { %v2782_v47 = vpop.xlane.xlu0 %2781 }
 0x492   :  { %v3892_v27 = vsel %vm3873_vm7, %v3436_v14, %v3891_v15  ;;  %v3122_v34 = vadd.f32 %v2782_v47, %v8246_v55  ;;  %v2667_v14 = vsel %vm2533_vm1, %v7105_v7, 0.0  ;;  %vm2549_vm1 = vcmp.eq.s32.totalorder %v4918_v49, %v8260_v40 }
 0x493   :  { %v3893_v57 = vsel %vm3875_vm10, %v3440_v2, %v3892_v27  ;;  %v2954_v15 = vsel %vm2716_vm11, %v2667_v14, 0.0  ;;  %v7459_v47 = vpop.xlane.xlu1 %2937  ;;  %v2681_v27 = vsel %vm2547_vm2, %v7105_v7, 0.0  ;;  %v2695_v2 = vsel %vm2561_vm8, %v7105_v7, 0.0 }
 0x494   :  { %v3444_v48 = vrot.slane %v3122_v34, %v7299_v21  ;;  %2973 = vadd.xlane.f32.xlu0 %v2972_v1  ;;  %v2996_v34 = vsel %vm2716_vm11, %v2681_v27, 0.0  ;;  %v3038_v1 = vsel %vm2716_vm11, %v2695_v2, 0.0  ;;  %v2689_v2 = vsel %vm2555_vm13, %v7105_v7, 0.0 }
 0x495   :  { %v2788_v23 = vpop.xlane.xlu0 %2787  ;;  %vm2563_vm2 = vcmp.eq.s32.totalorder %v4918_v49, %v6887_v53  ;;  %vm2577_vm8 = vcmp.eq.s32.totalorder %v4918_v49, %v6947_v31  ;;  %v2698_v31 = vsel %vm2564_vm3, %v7105_v7, 0.0  ;;  %vm2578_vm13 = vcmp.eq.s32.totalorder %v4918_v49, %v7236_v17 }
 0x496   :  { %v3124_v24 = vadd.f32 %v2788_v23, %v8248_v20  ;;  %v3894_v0 = vsel %vm3877_vm12, %v3444_v48, %v3893_v57  ;;  %v8251_v48 = vld [vmem:[#allocation27_spill] sm:$0xff]  ;;  %v8252_v23 = vld [vmem:[#allocation141_spill] sm:$0xff]  ;;  %v2712_v17 = vsel %vm2578_vm13, %v7105_v7, 0.0  ;;  %vm4171_vm3 = vcmask 851712  }
 0x497   :  { %v3895_v22 = vsel %vm3879_vm14, %v3448_v38, %v3894_v0  ;;  %v7472_v37 = vpop.xlane.xlu1 %2919  ;;  %v3133_v51 = vadd.f32 %v7216_v5, %v8251_v48  ;;  %vm2541_vm9 = vcmp.eq.s32.totalorder %v4918_v49, %v8252_v23  ;;  %v8254_v0 = vld [vmem:[#allocation29_spill] sm:$0xff]  ;;  %vm4185_vm13 = vcmask 982912  }
 0x498   :  { %v3452_v12 = vrot.slane %v3124_v24, %v7299_v21  ;;  %3015 = vadd.xlane.f32.xlu0 %v3014_v54  ;;  %v8253_v24 = vld [vmem:[#allocation53_spill] sm:$0xff]  ;;  %v3135_v38 = vadd.f32 %v7232_v11, %v8254_v0  ;;  %v3077_v54 = vsel %vm2716_vm11, %v2708_v18, 0.0  ;;  %v2675_v26 = vsel %vm2541_vm9, %v7105_v7, 0.0  ;;  %v8257_v11 = vld [vmem:[#allocation31_spill] sm:$0xff]  ;;  %v8258_v18 = vld [vmem:[#allocation58_spill] sm:$0xff] }
 0x499   :  { %v7445_v41 = vpop.xlane.xlu0 %2793  ;;  %v3137_v56 = vadd.f32 %v7246_v33, %v8257_v11  ;;  %vm2573_vm9 = vcmp.eq.s32.totalorder %v4918_v49, %v6929_v59 }
 0x49a   :  { %v3896_v50 = vsel %vm3881_vm15, %v3452_v12, %v3895_v22  ;;  %v3488_v12 = vrot.slane %v3133_v51, %v7299_v21  ;;  %v3496_v14 = vrot.slane %v3135_v38, %v7299_v21  ;;  %v2703_v38 = vsel %vm2569_vm4, %v7105_v7, 0.0 }
 0x49b   :  { %v4011_v8 = vsel %vm4004_vm0, %v3896_v50, 0.0  ;;  %v7480_v20 = vpop.xlane.xlu1 %2958  ;;  %v3504_v33 = vrot.slane %v3137_v56, %v7299_v21  ;;  %vm2572_vm4 = vcmp.eq.s32.totalorder %v4918_v49, %v7159_v45  ;;  %v2707_v59 = vsel %vm2573_vm9, %v7105_v7, 0.0  ;;  %v8265_v45 = vld [vmem:[#allocation73_spill] sm:$0xff] }
 0x49c   :  { %3054 = vadd.xlane.f32.xlu0 %v3053_v29  ;;  %4012 = vadd.xlane.f32.xlu1 %v4011_v8  ;;  %v8256_v29 = vld [vmem:[#allocation55_spill] sm:$0xff]  ;;  %vm4178_vm9 = vcmask 917312  }
 0x49d   :  { %v7456_v30 = vpop.xlane.xlu0 %2799 }
 0x49f   :  { %v7497_v27 = vpop.xlane.xlu1 %2901 }
 0x4a0   :  { %2955 = vadd.xlane.f32.xlu0 %v2954_v15  ;;  %v2978_v15 = vsel %vm2716_vm11, %v2675_v26, 0.0  ;;  %v8261_v26 = vld [vmem:[#allocation60_spill] sm:$0xff] }
 0x4a1   :  { %v7464_v55 = vpop.xlane.xlu0 %2805 }
 0x4a4   :  { %2997 = vadd.xlane.f32.xlu0 %v2996_v34 }
 0x4a5   :  { %v7470_v58 = vpop.xlane.xlu0 %2811 }
 0x4a8   :  { %3039 = vadd.xlane.f32.xlu0 %v3038_v1 }
 0x4a9   :  { %v2818_v57 = vpop.xlane.xlu0 %2817 }
 0x4aa   :  { %v3134_v6 = vadd.f32 %v2818_v57, %v8253_v24  ;;  %v8259_v57 = vld [vmem:[#allocation32_spill] sm:$0xff] }
 0x4ab   :  { %v3139_v24 = vadd.f32 %v7261_v3, %v8259_v57 }
 0x4ac   :  { %v3492_v5 = vrot.slane %v3134_v6, %v7299_v21  ;;  %3078 = vadd.xlane.f32.xlu0 %v3077_v54  ;;  %v3020_v6 = vsel %vm2716_vm11, %v2689_v2, 0.0 }
 0x4ad   :  { %v2824_v22 = vpop.xlane.xlu0 %2823  ;;  %v3512_v3 = vrot.slane %v3139_v24, %v7299_v21 }
 0x4ae   :  { %v3904_v50 = vsel %vm3869_vm5, %v3492_v5, %v3488_v12  ;;  %v3136_v8 = vadd.f32 %v2824_v22, %v8256_v29  ;;  %v7515_v5 = vpop.xlane.xlu1 %2943 }
 0x4af   :  { %v3905_v1 = vsel %vm3871_vm6, %v3496_v14, %v3904_v50  ;;  %v3062_v50 = vsel %vm2716_vm11, %v2703_v38, 0.0  ;;  %v8263_v38 = vld [vmem:[#allocation41_spill] sm:$0xff] }
 0x4b0   :  { %v3500_v34 = vrot.slane %v3136_v8, %v7299_v21  ;;  %2979 = vadd.xlane.f32.xlu0 %v2978_v15  ;;  %v2683_v8 = vsel %vm2549_vm1, %v7105_v7, 0.0  ;;  %v3149_v40 = vadd.f32 %v7317_v25, %v8263_v38  ;;  %vm2581_vm1 = vcmp.eq.s32.totalorder %v4918_v49, %v6975_v61  ;;  %v8273_v38 = vld [vmem:[#allocation75_spill] sm:$0xff] }
 0x4b1   :  { %v2830_v48 = vpop.xlane.xlu0 %2829 }
 0x4b2   :  { %v3906_v51 = vsel %vm3873_vm7, %v3500_v34, %v3905_v1  ;;  %v3138_v23 = vadd.f32 %v2830_v48, %v8258_v18  ;;  %v7526_v56 = vpop.xlane.xlu1 %2982  ;;  %v3002_v34 = vsel %vm2716_vm11, %v2683_v8, 0.0  ;;  %v2697_v1 = vsel %vm2563_vm2, %v7105_v7, 0.0 }
 0x4b3   :  { %v3907_v12 = vsel %vm3875_vm10, %v3504_v33, %v3906_v51  ;;  %v3044_v53 = vsel %vm2716_vm11, %v2697_v1, 0.0  ;;  %v2711_v18 = vsel %vm2577_vm8, %v7105_v7, 0.0  ;;  %v8269_v1 = vld [vmem:[#allocation63_spill] sm:$0xff]  ;;  %vm4157_vm2 = vcmask 720512  }
 0x4b4   :  { %v3508_v0 = vrot.slane %v3138_v23, %v7299_v21  ;;  %3021 = vadd.xlane.f32.xlu0 %v3020_v6  ;;  %v3086_v33 = vsel %vm2716_vm11, %v2711_v18, 0.0  ;;  %v3126_v6 = vadd.f32 %v7445_v41, %v8262_v43  ;;  %v2706_v41 = vsel %vm2572_vm4, %v7105_v7, 0.0 }
 0x4b5   :  { %v2836_v54 = vpop.xlane.xlu0 %2835  ;;  %vm4164_vm8 = vcmask 786112   ;;  %vm4192_vm4 = vcmask 1048512  }
 0x4b6   :  { %v3140_v35 = vadd.f32 %v2836_v54, %v8261_v26  ;;  %v3908_v22 = vsel %vm3877_vm12, %v3508_v0, %v3907_v12  ;;  %v7535_v51 = vpop.xlane.xlu1 %2904  ;;  %v3047_v0 = vsel %vm2716_vm11, %v2698_v31, 0.0  ;;  %v8264_v54 = vld [vmem:[#allocation19_spill] sm:$0xff]  ;;  %v3460_v25 = vrot.slane %v3126_v6, %v7299_v21 }
 0x4b7   :  { %v3909_v11 = vsel %vm3879_vm14, %v3512_v3, %v3908_v22  ;;  %v3125_v12 = vadd.f32 %v7157_v32, %v8264_v54  ;;  %v3074_v22 = vsel %vm2716_vm11, %v2707_v59, 0.0  ;;  %v8266_v3 = vld [vmem:[#allocation42_spill] sm:$0xff]  ;;  %v3089_v32 = vsel %vm2716_vm11, %v2712_v17, 0.0 }
 0x4b8   :  { %v3516_v29 = vrot.slane %v3140_v35, %v7299_v21  ;;  %3063 = vadd.xlane.f32.xlu0 %v3062_v50  ;;  %v3151_v50 = vadd.f32 %v7336_v63, %v8266_v3  ;;  %v3071_v17 = vsel %vm2716_vm11, %v2706_v41, 0.0 }
 0x4b9   :  { %v2842_v14 = vpop.xlane.xlu0 %2841  ;;  %v3456_v63 = vrot.slane %v3125_v12, %v7299_v21  ;;  %v8274_v12 = vld [vmem:[#allocation48_spill] sm:$0xff] }
 0x4ba   :  { %v3910_v15 = vsel %vm3881_vm15, %v3516_v29, %v3909_v11  ;;  %v7550_v24 = vpop.xlane.xlu1 %2946  ;;  %v8267_v29 = vld [vmem:[#allocation45_spill] sm:$0xff]  ;;  %v8268_v11 = vld [vmem:[#allocation20_spill] sm:$0xff] }
 0x4bb   :  { %v4017_v2 = vsel %vm4004_vm0, %v3910_v15, 0.0  ;;  %v3128_v8 = vadd.f32 %v7456_v30, %v8267_v29  ;;  %v3127_v15 = vadd.f32 %v7177_v60, %v8268_v11  ;;  %v8271_v30 = vld [vmem:[#allocation34_spill] sm:$0xff]  ;;  %v2715_v60 = vsel %vm2581_vm1, %v7105_v7, 0.0 }
 0x4bc   :  { %3003 = vadd.xlane.f32.xlu0 %v3002_v34  ;;  %4018 = vadd.xlane.f32.xlu1 %v4017_v2  ;;  %v3552_v34 = vrot.slane %v3149_v40, %v7299_v21  ;;  %v3141_v43 = vadd.f32 %v7271_v52, %v8271_v30  ;;  %v3897_v54 = vsel %vm3869_vm5, %v3460_v25, %v3456_v63  ;;  %v8279_v63 = vld [vmem:[#allocation50_spill] sm:$0xff] }
 0x4bd   :  { %v2848_v48 = vpop.xlane.xlu0 %2847  ;;  %v3468_v52 = vrot.slane %v3128_v8, %v7299_v21  ;;  %v3464_v61 = vrot.slane %v3127_v15, %v7299_v21  ;;  %v8277_v15 = vld [vmem:[#allocation78_spill] sm:$0xff] }
 0x4be   :  { %v7577_v2 = vpop.xlane.xlu1 %2988  ;;  %v3520_v3 = vrot.slane %v3141_v43, %v7299_v21  ;;  %v8280_v43 = vld [vmem:[#allocation68_spill] sm:$0xff] }
 0x4bf   :  { %v3898_v11 = vsel %vm3871_vm6, %v3464_v61, %v3897_v54  ;;  %v8283_v54 = vld [vmem:[#allocation80_spill] sm:$0xff] }
 0x4c0   :  { %3045 = vadd.xlane.f32.xlu0 %v3044_v53  ;;  %v3142_v53 = vadd.f32 %v2842_v14, %v8269_v1  ;;  %v8278_v1 = vld [vmem:[#allocation46_spill] sm:$0xff] }
 0x4c1   :  { %v7540_v23 = vpop.xlane.xlu0 %2853 }
 0x4c2   :  { %v3524_v7 = vrot.slane %v3142_v53, %v7299_v21  ;;  %v3155_v53 = vadd.f32 %v7373_v28, %v8278_v1 }
 0x4c4   :  { %3087 = vadd.xlane.f32.xlu0 %v3086_v33  ;;  %v8270_v33 = vld [vmem:[#allocation24_spill] sm:$0xff] }
 0x4c5   :  { %v7548_v57 = vpop.xlane.xlu0 %2859  ;;  %v3129_v31 = vadd.f32 %v7189_v36, %v8270_v33  ;;  %v3560_v36 = vrot.slane %v3151_v50, %v7299_v21  ;;  %v8276_v50 = vld [vmem:[#allocation36_spill] sm:$0xff]  ;;  %v3132_v33 = vadd.f32 %v7470_v58, %v8279_v63 }
 0x4c6   :  { %v3143_v25 = vadd.f32 %v7280_v9, %v8276_v50  ;;  %v8285_v50 = vld [vmem:[#allocation39_spill] sm:$0xff] }
 0x4c7   :  { %v3472_v41 = vrot.slane %v3129_v31, %v7299_v21  ;;  %v3911_v31 = vsel %vm3869_vm5, %v3524_v7, %v3520_v3 }
 0x4c8   :  { %3048 = vadd.xlane.f32.xlu0 %v3047_v0  ;;  %v8272_v0 = vld [vmem:[#allocation44_spill] sm:$0xff] }
 0x4c9   :  { %v2866_v26 = vpop.xlane.xlu0 %2865  ;;  %v3153_v14 = vadd.f32 %v7356_v44, %v8272_v0  ;;  %v8275_v44 = vld [vmem:[#allocation65_spill] sm:$0xff] }
 0x4ca   :  { %v3150_v35 = vadd.f32 %v2866_v26, %v8265_v45  ;;  %v3130_v26 = vadd.f32 %v7464_v55, %v8274_v12  ;;  %v3144_v45 = vadd.f32 %v2848_v48, %v8275_v44 }
 0x4cb   :  { %v3568_v55 = vrot.slane %v3153_v14, %v7299_v21  ;;  %v8281_v14 = vld [vmem:[#allocation26_spill] sm:$0xff] }
 0x4cc   :  { %v3556_v18 = vrot.slane %v3150_v35, %v7299_v21  ;;  %3090 = vadd.xlane.f32.xlu0 %v3089_v32  ;;  %v7610_v32 = vpop.xlane.xlu1 %3009  ;;  %v3476_v9 = vrot.slane %v3130_v26, %v7299_v21  ;;  %v3532_v30 = vrot.slane %v3144_v45, %v7299_v21  ;;  %v3131_v28 = vadd.f32 %v7204_v46, %v8281_v14  ;;  %v8284_v45 = vld [vmem:[#allocation70_spill] sm:$0xff]  ;;  %v8288_v14 = vld [vmem:[#allocation93_spill] sm:$0xff] }
 0x4cd   :  { %v2872_v6 = vpop.xlane.xlu0 %2871  ;;  %v3484_v46 = vrot.slane %v3132_v33, %v7299_v21  ;;  %v8286_v33 = vld [vmem:[#allocation54_spill] sm:$0xff] }
 0x4ce   :  { %v3918_v59 = vsel %vm3869_vm5, %v3556_v18, %v3552_v34  ;;  %v3152_v40 = vadd.f32 %v2872_v6, %v8273_v38  ;;  %v3899_v18 = vsel %vm3873_vm7, %v3468_v52, %v3898_v11  ;;  %v3146_v6 = vadd.f32 %v7540_v23, %v8280_v43  ;;  %v8282_v38 = vld [vmem:[#allocation37_spill] sm:$0xff]  ;;  %v8287_v43 = vld [vmem:[#allocation56_spill] sm:$0xff] }
 0x4cf   :  { %v3919_v29 = vsel %vm3871_vm6, %v3560_v36, %v3918_v59  ;;  %v3528_v59 = vrot.slane %v3143_v25, %v7299_v21  ;;  %v3098_v23 = vsel %vm2716_vm11, %v2715_v60, 0.0  ;;  %v3900_v12 = vsel %vm3875_vm10, %v3472_v41, %v3899_v18 }
 0x4d0   :  { %v3564_v35 = vrot.slane %v3152_v40, %v7299_v21  ;;  %3072 = vadd.xlane.f32.xlu0 %v3071_v17  ;;  %v3145_v40 = vadd.f32 %v7287_v19, %v8282_v38  ;;  %v3901_v61 = vsel %vm3877_vm12, %v3476_v9, %v3900_v12  ;;  %v7640_v19 = vpop.xlane.xlu1 %2928  ;;  %v3540_v44 = vrot.slane %v3146_v6, %v7299_v21 }
 0x4d1   :  { %v2878_v8 = vpop.xlane.xlu0 %2877  ;;  %v3912_v26 = vsel %vm3871_vm6, %v3528_v59, %v3911_v31  ;;  %v3480_v41 = vrot.slane %v3131_v28, %v7299_v21  ;;  %v3147_v25 = vadd.f32 %v7303_v16, %v8285_v50  ;;  %v4008_v11 = vsel %vm4004_vm0, %v7401_v62, 0.0 }
 0x4d2   :  { %v3920_v48 = vsel %vm3873_vm7, %v3564_v35, %v3919_v29  ;;  %v3154_v34 = vadd.f32 %v2878_v8, %v8277_v15  ;;  %v3913_v7 = vsel %vm3873_vm7, %v3532_v30, %v3912_v26  ;;  %v3148_v35 = vadd.f32 %v7548_v57, %v8284_v45 }
 0x4d3   :  { %v3921_v58 = vsel %vm3875_vm10, %v3568_v55, %v3920_v48  ;;  %v3536_v3 = vrot.slane %v3145_v40, %v7299_v21  ;;  %v3902_v48 = vsel %vm3879_vm14, %v3480_v41, %v3901_v61  ;;  %v3165_v31 = vadd.f32 %v7430_v4, %v8286_v33  ;;  %v8289_v40 = vld [vmem:[#allocation103_spill] sm:$0xff] }
 0x4d4   :  { %v3572_v0 = vrot.slane %v3154_v34, %v7299_v21  ;;  %3075 = vadd.xlane.f32.xlu0 %v3074_v22  ;;  %v3576_v22 = vrot.slane %v3155_v53, %v7299_v21  ;;  %v3548_v34 = vrot.slane %v3148_v35, %v7299_v21  ;;  %v3903_v16 = vsel %vm3881_vm15, %v3484_v46, %v3902_v48  ;;  %v7662_v9 = vpop.xlane.xlu1 %2970  ;;  %v8292_v35 = vld [vmem:[#allocation62_spill] sm:$0xff]  ;;  %v8293_v41 = vld [vmem:[#allocation67_spill] sm:$0xff] }
 0x4d5   :  { %v2884_v17 = vpop.xlane.xlu0 %2883  ;;  %v3914_v15 = vsel %vm3875_vm10, %v3536_v3, %v3913_v7  ;;  %v3544_v53 = vrot.slane %v3147_v25, %v7299_v21  ;;  %v4014_v62 = vsel %vm4004_vm0, %v3903_v16, 0.0  ;;  %v3167_v6 = vadd.f32 %v7448_v10, %v8287_v43  ;;  %v8291_v7 = vld [vmem:[#allocation105_spill] sm:$0xff] }
 0x4d6   :  { %v3922_v36 = vsel %vm3877_vm12, %v3572_v0, %v3921_v58  ;;  %v3156_v52 = vadd.f32 %v2884_v17, %v8283_v54  ;;  %v3915_v1 = vsel %vm3877_vm12, %v3540_v44, %v3914_v15  ;;  %v3616_v38 = vrot.slane %v3165_v31, %v7299_v21  ;;  %v8296_v31 = vld [vmem:[#allocation76_spill] sm:$0xff] }
 0x4d7   :  { %v3923_v8 = vsel %vm3879_vm14, %v3576_v22, %v3922_v36  ;;  %v3916_v63 = vsel %vm3879_vm14, %v3544_v53, %v3915_v1  ;;  %v3174_v58 = vadd.f32 %v7459_v47, %v8289_v40  ;;  %v3624_v36 = vrot.slane %v3167_v6, %v7299_v21  ;;  %v8297_v6 = vld [vmem:[#allocation83_spill] sm:$0xff] }
 0x4d8   :  { %v3580_v60 = vrot.slane %v3156_v52, %v7299_v21  ;;  %3099 = vadd.xlane.f32.xlu0 %v3098_v23  ;;  %v3917_v30 = vsel %vm3881_vm15, %v3548_v34, %v3916_v63  ;;  %v7676_v17 = vpop.xlane.xlu1 %3012  ;;  %v8290_v52 = vld [vmem:[#allocation61_spill] sm:$0xff]  ;;  %v3176_v44 = vadd.f32 %v7515_v5, %v8291_v7  ;;  %v3181_v3 = vadd.f32 %v7480_v20, %v8293_v41 }
 0x4d9   :  { %v2890_v29 = vpop.xlane.xlu0 %2889  ;;  %v4020_v59 = vsel %vm4004_vm0, %v3917_v30, 0.0  ;;  %v3652_v22 = vrot.slane %v3174_v58, %v7299_v21  ;;  %v3191_v30 = vadd.f32 %v7577_v2, %v8296_v31  ;;  %v8300_v2 = vld [vmem:[#allocation85_spill] sm:$0xff]  ;;  %vm4094_vm11 = vcmask 130112  }
 0x4da   :  { %v3924_v55 = vsel %vm3881_vm15, %v3580_v60, %v3923_v8  ;;  %v3660_v8 = vrot.slane %v3176_v44, %v7299_v21  ;;  %v3680_v5 = vrot.slane %v3181_v3, %v7299_v21 }
 0x4db   :  { %v4023_v57 = vsel %vm4004_vm0, %v3924_v55, 0.0 }
 0x4dc   :  { %4009 = vadd.xlane.f32.xlu0 %v4008_v11  ;;  %4024 = vadd.xlane.f32.xlu1 %v4023_v57  ;;  %v7687_v26 = vpop.xlane.xlu1 %3033  ;;  %v8294_v57 = vld [vmem:[#allocation109_spill] sm:$0xff] }
 0x4dd   :  { %v2896_v18 = vpop.xlane.xlu0 %2895 }
 0x4e0   :  { %4015 = vadd.xlane.f32.xlu0 %v4014_v62  ;;  %v7695_v50 = vpop.xlane.xlu1 %2952  ;;  %v8295_v62 = vld [vmem:[#allocation74_spill] sm:$0xff] }
 0x4e1   :  { %v2914_v0 = vpop.xlane.xlu0 %2913  ;;  %v3189_v63 = vadd.f32 %v7526_v56, %v8295_v62 }
 0x4e2   :  { %v3166_v28 = vadd.f32 %v2914_v0, %v8288_v14  ;;  %v3158_v0 = vadd.f32 %v2890_v29, %v8297_v6  ;;  %v8298_v14 = vld [vmem:[#allocation113_spill] sm:$0xff] }
 0x4e3   :  { %v3712_v40 = vrot.slane %v3189_v63, %v7299_v21 }
 0x4e4   :  { %v3620_v4 = vrot.slane %v3166_v28, %v7299_v21  ;;  %4021 = vadd.xlane.f32.xlu0 %v4020_v59  ;;  %v7706_v20 = vpop.xlane.xlu1 %2994  ;;  %v8299_v59 = vld [vmem:[#allocation47_spill] sm:$0xff] }
 0x4e5   :  { %v2935_v54 = vpop.xlane.xlu0 %2934 }
 0x4e6   :  { %v3932_v10 = vsel %vm3869_vm5, %v3620_v4, %v3616_v38  ;;  %v3173_v23 = vadd.f32 %v2935_v54, %v8290_v52  ;;  %v3157_v38 = vadd.f32 %v7392_v39, %v8299_v59  ;;  %v3720_v4 = vrot.slane %v3191_v30, %v7299_v21  ;;  %v8301_v52 = vld [vmem:[#allocation49_spill] sm:$0xff] }
 0x4e7   :  { %v7683_v12 = vsel %vm3871_vm6, %v3624_v36, %v3932_v10  ;;  %v3588_v54 = vrot.slane %v3158_v0, %v7299_v21  ;;  %v3160_v10 = vadd.f32 %v2896_v18, %v8300_v2 }
 0x4e8   :  { %v3648_v46 = vrot.slane %v3173_v23, %v7299_v21  ;;  %v7715_v33 = vpop.xlane.xlu1 %3036  ;;  %v3159_v23 = vadd.f32 %v7411_v13, %v8301_v52 }
 0x4e9   :  { %v2899_v47 = vpop.xlane.xlu0 %2898 }
 0x4ea   :  { %v3939_v61 = vsel %vm3869_vm5, %v3652_v22, %v3648_v46  ;;  %v8302_v22 = vld [vmem:[#allocation51_spill] sm:$0xff]  ;;  %v3592_v18 = vrot.slane %v3159_v23, %v7299_v21 }
 0x4eb   :  { %v3161_v39 = vadd.f32 %v2899_v47, %v8302_v22  ;;  %v8309_v23 = vld [vmem:[#allocation59_spill] sm:$0xff] }
 0x4ec   :  { %v7726_v36 = vpop.xlane.xlu1 %3057 }
 0x4ed   :  { %v2941_v45 = vpop.xlane.xlu0 %2940 }
 0x4ee   :  { %v3175_v60 = vadd.f32 %v2941_v45, %v8292_v35  ;;  %v3596_v45 = vrot.slane %v3160_v10, %v7299_v21  ;;  %v3600_v35 = vrot.slane %v3161_v39, %v7299_v21 }
 0x4f0   :  { %v3656_v25 = vrot.slane %v3175_v60, %v7299_v21  ;;  %v8303_v60 = vld [vmem:[#allocation88_spill] sm:$0xff]  ;;  %v7746_v41 = vpop.xlane.xlu1 %2976 }
 0x4f1   :  { %v2962_v55 = vpop.xlane.xlu0 %2961  ;;  %v3162_v13 = vadd.f32 %v7497_v27, %v8303_v60 }
 0x4f2   :  { %v3940_v11 = vsel %vm3871_vm6, %v3656_v25, %v3939_v61  ;;  %v3182_v48 = vadd.f32 %v2962_v55, %v8294_v57  ;;  %v3584_v61 = vrot.slane %v3157_v38, %v7299_v21  ;;  %v8307_v38 = vld [vmem:[#allocation95_spill] sm:$0xff] }
 0x4f3   :  { %v7702_v15 = vsel %vm3873_vm7, %v3660_v8, %v3940_v11  ;;  %v8304_v8 = vld [vmem:[#allocation52_spill] sm:$0xff]  ;;  %v3604_v57 = vrot.slane %v3162_v13, %v7299_v21 }
 0x4f4   :  { %v3684_v34 = vrot.slane %v3182_v48, %v7299_v21  ;;  %v3925_v44 = vsel %vm3869_vm5, %v3588_v54, %v3584_v61  ;;  %v3163_v55 = vadd.f32 %v7535_v51, %v8304_v8  ;;  %v8310_v61 = vld [vmem:[#allocation100_spill] sm:$0xff]  ;;  %v8311_v8 = vld [vmem:[#allocation107_spill] sm:$0xff] }
 0x4f5   :  { %v2923_v16 = vpop.xlane.xlu0 %2922  ;;  %v3926_v47 = vsel %vm3871_vm6, %v3592_v18, %v3925_v44 }
 0x4f6   :  { %v7709_v1 = vsel %vm3869_vm5, %v3684_v34, %v3680_v5  ;;  %v3927_v25 = vsel %vm3873_vm7, %v3596_v45, %v3926_v47  ;;  %v7756_v5 = vpop.xlane.xlu1 %3018  ;;  %v8305_v34 = vld [vmem:[#allocation90_spill] sm:$0xff]  ;;  %v3608_v63 = vrot.slane %v3163_v55, %v7299_v21 }
 0x4f7   :  { %v3928_v11 = vsel %vm3875_vm10, %v3600_v35, %v3927_v25 }
 0x4f8   :  { %v3929_v62 = vsel %vm3877_vm12, %v3604_v57, %v3928_v11  ;;  %v8312_v11 = vld [vmem:[#allocation64_spill] sm:$0xff] }
 0x4f9   :  { %v7711_v53 = vpop.xlane.xlu0 %2964  ;;  %v3177_v57 = vadd.f32 %v7550_v24, %v8312_v11  ;;  %v8322_v11 = vld [vmem:[#allocation82_spill] sm:$0xff] }
 0x4fa   :  { %v7765_v0 = vpop.xlane.xlu1 %3060 }
 0x4fd   :  { %v2986_v43 = vpop.xlane.xlu0 %2985 }
 0x4fe   :  { %v3190_v28 = vadd.f32 %v2986_v43, %v8298_v14  ;;  %v3930_v43 = vsel %vm3879_vm14, %v3608_v63, %v3929_v62  ;;  %v8306_v14 = vld [vmem:[#allocation57_spill] sm:$0xff]  ;;  %v8313_v62 = vld [vmem:[#allocation66_spill] sm:$0xff] }
 0x4ff   :  { %v3179_v63 = vadd.f32 %v7695_v50, %v8313_v62 }
 0x500   :  { %v3716_v58 = vrot.slane %v3190_v28, %v7299_v21  ;;  %v3169_v28 = vadd.f32 %v2923_v16, %v8306_v14  ;;  %v3171_v16 = vadd.f32 %v7640_v19, %v8309_v23 }
 0x501   :  { %v2926_v56 = vpop.xlane.xlu0 %2925  ;;  %v3672_v24 = vrot.slane %v3179_v63, %v7299_v21 }
 0x502   :  { %v3953_v29 = vsel %vm3869_vm5, %v3716_v58, %v3712_v40  ;;  %v3168_v40 = vadd.f32 %v7472_v37, %v8307_v38  ;;  %v8308_v58 = vld [vmem:[#allocation98_spill] sm:$0xff]  ;;  %v3632_v54 = vrot.slane %v3169_v28, %v7299_v21  ;;  %v3640_v45 = vrot.slane %v3171_v16, %v7299_v21  ;;  %v8315_v38 = vld [vmem:[#allocation69_spill] sm:$0xff] }
 0x503   :  { %v7735_v46 = vsel %vm3871_vm6, %v3720_v4, %v3953_v29  ;;  %v3170_v4 = vadd.f32 %v2926_v56, %v8308_v58  ;;  %v7777_v29 = vpop.xlane.xlu1 %3081 }
 0x504   :  { %v3628_v10 = vrot.slane %v3168_v40, %v7299_v21  ;;  %v3183_v40 = vadd.f32 %v7711_v53, %v8315_v38 }
 0x505   :  { %v7738_v7 = vpop.xlane.xlu0 %2967  ;;  %v3636_v52 = vrot.slane %v3170_v4, %v7299_v21 }
 0x506   :  { %v3934_v22 = vsel %vm3873_vm7, %v3628_v10, %v7683_v12  ;;  %v3688_v23 = vrot.slane %v3183_v40, %v7299_v21 }
 0x507   :  { %v3935_v37 = vsel %vm3875_vm10, %v3632_v54, %v3934_v22  ;;  %v7788_v18 = vpop.xlane.xlu1 %3000  ;;  %v8316_v54 = vld [vmem:[#allocation110_spill] sm:$0xff] }
 0x508   :  { %v3936_v56 = vsel %vm3877_vm12, %v3636_v52, %v3935_v37  ;;  %v3184_v10 = vadd.f32 %v7738_v7, %v8316_v54  ;;  %v8317_v37 = vld [vmem:[#allocation81_spill] sm:$0xff]  ;;  %v8328_v54 = vld [vmem:[#allocation120_spill] sm:$0xff] }
 0x509   :  { %v7749_v3 = vpop.xlane.xlu0 %3006  ;;  %v3937_v13 = vsel %vm3879_vm14, %v3640_v45, %v3936_v56  ;;  %v8320_v7 = vld [vmem:[#allocation117_spill] sm:$0xff] }
 0x50a   :  { %v3692_v22 = vrot.slane %v3184_v10, %v7299_v21  ;;  %v3197_v53 = vadd.f32 %v7749_v3, %v8317_v37  ;;  %v3198_v45 = vadd.f32 %v7610_v32, %v8320_v7  ;;  %v3199_v32 = vadd.f32 %v7676_v17, %v8322_v11  ;;  %v8332_v11 = vld [vmem:[#allocation79_spill] sm:$0xff] }
 0x50b   :  { %v7794_v25 = vpop.xlane.xlu1 %3042 }
 0x50d   :  { %v2908_v48 = vpop.xlane.xlu0 %2907 }
 0x50e   :  { %v3164_v27 = vadd.f32 %v2908_v48, %v8305_v34 }
 0x510   :  { %v3612_v31 = vrot.slane %v3164_v27, %v7299_v21  ;;  %v3664_v27 = vrot.slane %v3177_v57, %v7299_v21  ;;  %v8323_v57 = vld [vmem:[#allocation72_spill] sm:$0xff] }
 0x511   :  { %v2950_v30 = vpop.xlane.xlu0 %2949 }
 0x512   :  { %v3931_v51 = vsel %vm3881_vm15, %v3612_v31, %v3930_v43  ;;  %v3178_v55 = vadd.f32 %v2950_v30, %v8311_v8  ;;  %v7805_v31 = vpop.xlane.xlu1 %3084  ;;  %v3942_v43 = vsel %vm3875_vm10, %v3664_v27, %v7702_v15  ;;  %v3744_v8 = vrot.slane %v3197_v53, %v7299_v21  ;;  %v8324_v27 = vld [vmem:[#allocation114_spill] sm:$0xff]  ;;  %v8329_v53 = vld [vmem:[#allocation115_spill] sm:$0xff] }
 0x513   :  { %v4026_v6 = vsel %vm4004_vm0, %v3931_v51, 0.0 }
 0x514   :  { %4027 = vadd.xlane.f32.xlu0 %v4026_v6  ;;  %v3668_v34 = vrot.slane %v3178_v55, %v7299_v21  ;;  %v8314_v6 = vld [vmem:[#allocation108_spill] sm:$0xff] }
 0x515   :  { %v7768_v59 = vpop.xlane.xlu0 %2991 }
 0x516   :  { %v3943_v30 = vsel %vm3877_vm12, %v3668_v34, %v3942_v43  ;;  %v3025_v4 = vpop.xlane.xlu1 %3024  ;;  %v3187_v34 = vadd.f32 %v7746_v41, %v8323_v57  ;;  %v3192_v62 = vadd.f32 %v7768_v59, %v8324_v27  ;;  %v8327_v59 = vld [vmem:[#allocation86_spill] sm:$0xff] }
 0x517   :  { %v3944_v50 = vsel %vm3879_vm14, %v3672_v24, %v3943_v30  ;;  %v3752_v24 = vrot.slane %v3199_v32, %v7299_v21  ;;  %v3203_v40 = vadd.f32 %v3025_v4, %v8327_v59  ;;  %v8331_v4 = vld [vmem:[#allocation77_spill] sm:$0xff]  ;;  %v3195_v32 = vadd.f32 %v7788_v18, %v8332_v11 }
 0x518   :  { %v3704_v41 = vrot.slane %v3187_v34, %v7299_v21  ;;  %v8337_v59 = vld [vmem:[#allocation89_spill] sm:$0xff] }
 0x519   :  { %v7774_v2 = vpop.xlane.xlu0 %3030 }
 0x51d   :  { %v2932_v39 = vpop.xlane.xlu0 %2931 }
 0x51e   :  { %v3172_v44 = vadd.f32 %v2932_v39, %v8310_v61  ;;  %v8318_v39 = vld [vmem:[#allocation111_spill] sm:$0xff] }
 0x51f   :  { %v8319_v61 = vld [vmem:[#allocation71_spill] sm:$0xff] }
 0x520   :  { %v3644_v35 = vrot.slane %v3172_v44, %v7299_v21  ;;  %v3185_v44 = vadd.f32 %v7662_v9, %v8319_v61 }
 0x521   :  { %v2974_v60 = vpop.xlane.xlu0 %2973 }
 0x522   :  { %v3938_v19 = vsel %vm3881_vm15, %v3644_v35, %v3937_v13  ;;  %v3186_v56 = vadd.f32 %v2974_v60, %v8318_v39  ;;  %v7831_v35 = vpop.xlane.xlu1 %3066  ;;  %v3947_v13 = vsel %vm3871_vm6, %v3688_v23, %v7709_v1  ;;  %v8321_v60 = vld [vmem:[#allocation118_spill] sm:$0xff]  ;;  %v3696_v9 = vrot.slane %v3185_v44, %v7299_v21 }
 0x523   :  { %v4029_v12 = vsel %vm4004_vm0, %v3938_v19, 0.0  ;;  %v3748_v1 = vrot.slane %v3198_v45, %v7299_v21  ;;  %v3193_v44 = vadd.f32 %v7706_v20, %v8331_v4  ;;  %v8342_v4 = vld [vmem:[#allocation96_spill] sm:$0xff] }
 0x524   :  { %4030 = vadd.xlane.f32.xlu1 %v4029_v12  ;;  %v3948_v12 = vsel %vm3873_vm7, %v3692_v22, %v3947_v13  ;;  %v3700_v3 = vrot.slane %v3186_v56, %v7299_v21  ;;  %v8330_v56 = vld [vmem:[#allocation119_spill] sm:$0xff] }
 0x525   :  { %v3016_v47 = vpop.xlane.xlu0 %3015  ;;  %v3949_v63 = vsel %vm3875_vm10, %v3696_v9, %v3948_v12  ;;  %v3960_v30 = vsel %vm3869_vm5, %v3748_v1, %v3744_v8  ;;  %v3768_v12 = vrot.slane %v3203_v40, %v7299_v21  ;;  %v3728_v9 = vrot.slane %v3193_v44, %v7299_v21  ;;  %v8333_v1 = vld [vmem:[#allocation87_spill] sm:$0xff] }
 0x526   :  { %v3200_v55 = vadd.f32 %v3016_v47, %v8321_v60  ;;  %v3950_v47 = vsel %vm3877_vm12, %v3700_v3, %v3949_v63  ;;  %v3205_v27 = vadd.f32 %v7774_v2, %v8333_v1  ;;  %v3207_v40 = vadd.f32 %v7715_v33, %v8337_v59  ;;  %v8340_v33 = vld [vmem:[#allocation91_spill] sm:$0xff] }
 0x527   :  { %v3951_v22 = vsel %vm3879_vm14, %v3704_v41, %v3950_v47  ;;  %v8335_v47 = vld [vmem:[#allocation121_spill] sm:$0xff]  ;;  %v3215_v44 = vadd.f32 %v7765_v0, %v8342_v4 }
 0x528   :  { %v3206_v18 = vadd.f32 %v7687_v26, %v8335_v47  ;;  %v3776_v2 = vrot.slane %v3205_v27, %v7299_v21 }
 0x529   :  { %v7799_v48 = vpop.xlane.xlu0 %3054  ;;  %v3816_v27 = vrot.slane %v3215_v44, %v7299_v21  ;;  %v8355_v44 = vld [vmem:[#allocation128_spill] sm:$0xff] }
 0x52a   :  { %v3780_v26 = vrot.slane %v3206_v18, %v7299_v21  ;;  %v8349_v18 = vld [vmem:[#allocation102_spill] sm:$0xff] }
 0x52d   :  { %v2956_v51 = vpop.xlane.xlu0 %2955 }
 0x52e   :  { %v3180_v14 = vadd.f32 %v2956_v51, %v8314_v6  ;;  %v3028_v51 = vpop.xlane.xlu1 %3027  ;;  %v3756_v6 = vrot.slane %v3200_v55, %v7299_v21 }
 0x52f   :  { %v3204_v10 = vadd.f32 %v3028_v51, %v8328_v54  ;;  %v8334_v51 = vld [vmem:[#allocation116_spill] sm:$0xff] }
 0x530   :  { %v3676_v28 = vrot.slane %v3180_v14, %v7299_v21  ;;  %v8325_v14 = vld [vmem:[#allocation112_spill] sm:$0xff] }
 0x531   :  { %v2998_v58 = vpop.xlane.xlu0 %2997 }
 0x532   :  { %v3945_v15 = vsel %vm3881_vm15, %v3676_v28, %v3944_v50  ;;  %v8326_v28 = vld [vmem:[#allocation84_spill] sm:$0xff]  ;;  %v3194_v39 = vadd.f32 %v2998_v58, %v8329_v53  ;;  %v3772_v58 = vrot.slane %v3204_v10, %v7299_v21  ;;  %v3967_v10 = vsel %vm3869_vm5, %v3780_v26, %v3776_v2 }
 0x533   :  { %v4032_v52 = vsel %vm4004_vm0, %v3945_v15, 0.0  ;;  %v3201_v38 = vadd.f32 %v7756_v5, %v8326_v28  ;;  %v3724_v15 = vrot.slane %v3192_v62, %v7299_v21  ;;  %v3784_v53 = vrot.slane %v3207_v40, %v7299_v21  ;;  %v8352_v40 = vld [vmem:[#allocation127_spill] sm:$0xff] }
 0x534   :  { %4033 = vadd.xlane.f32.xlu0 %v4032_v52  ;;  %v3961_v52 = vsel %vm3871_vm6, %v3752_v24, %v3960_v30  ;;  %v3732_v55 = vrot.slane %v3194_v39, %v7299_v21  ;;  %v8336_v24 = vld [vmem:[#allocation122_spill] sm:$0xff]  ;;  %v3209_v39 = vadd.f32 %v7794_v25, %v8340_v33 }
 0x535   :  { %v7821_v16 = vpop.xlane.xlu0 %3039  ;;  %v3962_v37 = vsel %vm3873_vm7, %v3756_v6, %v3961_v52  ;;  %v3760_v7 = vrot.slane %v3201_v38, %v7299_v21  ;;  %v3955_v60 = vsel %vm3873_vm7, %v3724_v15, %v7735_v46  ;;  %v3736_v6 = vrot.slane %v3195_v32, %v7299_v21  ;;  %v8338_v15 = vld [vmem:[#allocation94_spill] sm:$0xff] }
 0x536   :  { %v3956_v62 = vsel %vm3875_vm10, %v3728_v9, %v3955_v60  ;;  %v3208_v41 = vadd.f32 %v7821_v16, %v8336_v24  ;;  %v3213_v52 = vadd.f32 %v7799_v48, %v8338_v15  ;;  %v8343_v48 = vld [vmem:[#allocation124_spill] sm:$0xff]  ;;  %v3792_v25 = vrot.slane %v3209_v39, %v7299_v21  ;;  %v8344_v60 = vld [vmem:[#allocation101_spill] sm:$0xff]  ;;  %v8347_v32 = vld [vmem:[#allocation130_spill] sm:$0xff] }
 0x537   :  { %v3963_v8 = vsel %vm3875_vm10, %v3760_v7, %v3962_v37  ;;  %v3968_v7 = vsel %vm3871_vm6, %v3784_v53, %v3967_v10  ;;  %v8346_v9 = vld [vmem:[#allocation92_spill] sm:$0xff]  ;;  %v8353_v15 = vld [vmem:[#allocation99_spill] sm:$0xff] }
 0x538   :  { %v3788_v16 = vrot.slane %v3208_v41, %v7299_v21  ;;  %v8351_v24 = vld [vmem:[#allocation104_spill] sm:$0xff] }
 0x539   :  { %v7835_v19 = vpop.xlane.xlu0 %3078 }
 0x53d   :  { %v2980_v43 = vpop.xlane.xlu0 %2979 }
 0x53e   :  { %v3188_v17 = vadd.f32 %v2980_v43, %v8325_v14  ;;  %v3957_v43 = vsel %vm3877_vm12, %v3732_v55, %v3956_v62  ;;  %v3070_v14 = vpop.xlane.xlu1 %3069  ;;  %v3221_v55 = vadd.f32 %v7835_v19, %v8344_v60 }
 0x53f   :  { %v3958_v38 = vsel %vm3879_vm14, %v3736_v6, %v3957_v43  ;;  %v3223_v6 = vadd.f32 %v7805_v31, %v8349_v18 }
 0x540   :  { %v3708_v50 = vrot.slane %v3188_v17, %v7299_v21  ;;  %v3840_v43 = vrot.slane %v3221_v55, %v7299_v21  ;;  %v8357_v55 = vld [vmem:[#allocation135_spill] sm:$0xff] }
 0x541   :  { %v3022_v23 = vpop.xlane.xlu0 %3021 }
 0x542   :  { %v3202_v61 = vadd.f32 %v3022_v23, %v8330_v56  ;;  %v3952_v5 = vsel %vm3881_vm15, %v3708_v50, %v3951_v22  ;;  %v8339_v23 = vld [vmem:[#allocation123_spill] sm:$0xff]  ;;  %v3052_v56 = vpop.xlane.xlu1 %3051 }
 0x543   :  { %v4035_v45 = vsel %vm4004_vm0, %v3952_v5, 0.0 }
 0x544   :  { %v3764_v13 = vrot.slane %v3202_v61, %v7299_v21  ;;  %4036 = vadd.xlane.f32.xlu1 %v4035_v45  ;;  %v8341_v61 = vld [vmem:[#allocation125_spill] sm:$0xff]  ;;  %v3212_v45 = vadd.f32 %v3052_v56, %v8343_v48  ;;  %v8356_v48 = vld [vmem:[#allocation106_spill] sm:$0xff] }
 0x545   :  { %v3064_v3 = vpop.xlane.xlu0 %3063  ;;  %v3214_v5 = vadd.f32 %v7726_v36, %v8341_v61  ;;  %v8345_v36 = vld [vmem:[#allocation126_spill] sm:$0xff] }
 0x546   :  { %v3964_v20 = vsel %vm3877_vm12, %v3764_v13, %v3963_v8  ;;  %v3808_v13 = vrot.slane %v3213_v52, %v7299_v21  ;;  %v3804_v62 = vrot.slane %v3212_v45, %v7299_v21 }
 0x547   :  { %v3965_v57 = vsel %vm3879_vm14, %v3768_v12, %v3964_v20  ;;  %v3969_v12 = vsel %vm3873_vm7, %v3788_v16, %v3968_v7  ;;  %v3216_v20 = vadd.f32 %v3064_v3, %v8345_v36  ;;  %v3812_v11 = vrot.slane %v3214_v5, %v7299_v21 }
 0x548   :  { %v3966_v34 = vsel %vm3881_vm15, %v3772_v58, %v3965_v57  ;;  %v3222_v57 = vadd.f32 %v7777_v29, %v8347_v32  ;;  %v3848_v16 = vrot.slane %v3223_v6, %v7299_v21  ;;  %v4110_v6 = vadd.s32 4294967264, %v4918_v49 }
 0x549   :  { %v3004_v63 = vpop.xlane.xlu0 %3003  ;;  %v4041_v46 = vsel %vm4004_vm0, %v3966_v34, 0.0  ;;  %v3970_v34 = vsel %vm3875_vm10, %v3792_v25, %v3969_v12 }
 0x54a   :  { %v3196_v30 = vadd.f32 %v3004_v63, %v8334_v51  ;;  %4042 = vadd.xlane.f32.xlu1 %v4041_v46  ;;  %v3974_v63 = vsel %vm3869_vm5, %v3812_v11, %v3808_v13  ;;  %v3094_v46 = vpop.xlane.xlu1 %3093  ;;  %v3820_v51 = vrot.slane %v3216_v20, %v7299_v21 }
 0x54b   :  { %v3975_v26 = vsel %vm3871_vm6, %v3816_v27, %v3974_v63 }
 0x54c   :  { %v3740_v17 = vrot.slane %v3196_v30, %v7299_v21  ;;  %v8348_v30 = vld [vmem:[#allocation131_spill] sm:$0xff]  ;;  %v3976_v31 = vsel %vm3873_vm7, %v3820_v51, %v3975_v26  ;;  %v4124_v26 = vadd.s32 4294967248, %v4918_v49 }
 0x54d   :  { %v3046_v28 = vpop.xlane.xlu0 %3045 }
 0x54e   :  { %v3959_v50 = vsel %vm3881_vm15, %v3740_v17, %v3958_v38  ;;  %v3210_v22 = vadd.f32 %v3046_v28, %v8339_v23  ;;  %v8350_v17 = vld [vmem:[#allocation97_spill] sm:$0xff]  ;;  %v3844_v38 = vrot.slane %v3222_v57, %v7299_v21  ;;  %v3097_v53 = vpop.xlane.xlu1 %3096 }
 0x54f   :  { %v4038_v54 = vsel %vm4004_vm0, %v3959_v50, 0.0  ;;  %v3217_v2 = vadd.f32 %v7831_v35, %v8350_v17  ;;  %v3218_v50 = vadd.f32 %v3070_v14, %v8352_v40  ;;  %v3227_v45 = vadd.f32 %v3097_v53, %v8356_v48 }
 0x550   :  { %4039 = vadd.xlane.f32.xlu0 %v4038_v54  ;;  %v3796_v8 = vrot.slane %v3210_v22, %v7299_v21  ;;  %v3981_v10 = vsel %vm3869_vm5, %v3844_v38, %v3840_v43  ;;  %vm4101_vm5 = vcmask 195712   ;;  %v4145_v53 = vadd.s32 4294967224, %v4918_v49 }
 0x551   :  { %v3088_v37 = vpop.xlane.xlu0 %3087  ;;  %v3824_v23 = vrot.slane %v3217_v2, %v7299_v21  ;;  %v3982_v39 = vsel %vm3871_vm6, %v3848_v16, %v3981_v10  ;;  %v3828_v5 = vrot.slane %v3218_v50, %v7299_v21  ;;  %v4131_v10 = vadd.s32 4294967240, %v4918_v49 }
 0x552   :  { %v3971_v19 = vsel %vm3877_vm12, %v3796_v8, %v3970_v34  ;;  %v3224_v29 = vadd.f32 %v3088_v37, %v8348_v30  ;;  %v8354_v37 = vld [vmem:[#allocation133_spill] sm:$0xff]  ;;  %v4103_v30 = vadd.s32 4294967272, %v4918_v49  ;;  %vm4108_vm6 = vcmask 261312  }
 0x553   :  { %v3226_v14 = vadd.f32 %v3094_v46, %v8354_v37  ;;  %v3977_v33 = vsel %vm3875_vm10, %v3824_v23, %v3976_v31  ;;  %v4138_v37 = vadd.s32 4294967232, %v4918_v49 }
 0x554   :  { %v3852_v35 = vrot.slane %v3224_v29, %v7299_v21  ;;  %v4096_v29 = vadd.s32 4294967280, %v4918_v49 }
 0x555   :  { %v3049_v58 = vpop.xlane.xlu0 %3048  ;;  %v3860_v12 = vrot.slane %v3226_v14, %v7299_v21 }
 0x556   :  { %v3211_v0 = vadd.f32 %v3049_v58, %v8346_v9  ;;  %v3983_v4 = vsel %vm3873_vm7, %v3852_v35, %v3982_v39  ;;  %v3978_v58 = vsel %vm3877_vm12, %v3828_v5, %v3977_v33  ;;  %v4099_v38 = vsub.s32 %v4096_v29, %v5874_v42 }
 0x557   :  { %v4152_v33 = vadd.s32 4294967216, %v4918_v49  ;;  %vm4115_vm7 = vcmask 326912  }
 0x558   :  { %v3800_v1 = vrot.slane %v3211_v0, %v7299_v21  ;;  %v3864_v0 = vrot.slane %v3227_v45, %v7299_v21 }
 0x559   :  { %v3091_v3 = vpop.xlane.xlu0 %3090 }
 0x55a   :  { %v3972_v47 = vsel %vm3879_vm14, %v3800_v1, %v3971_v19  ;;  %v3225_v41 = vadd.f32 %v3091_v3, %v8351_v24  ;;  %v4089_v3 = vadd.s32 4294967288, %v4918_v49  ;;  %v4106_v24 = vsub.s32 %v4103_v30, %v5874_v42 }
 0x55b   :  { %v3973_v28 = vsel %vm3881_vm15, %v3804_v62, %v3972_v47  ;;  %v4007_v62 = vpop.xlane.xlu1 %4006 }
 0x55c   :  { %v4044_v59 = vsel %vm4004_vm0, %v3973_v28, 0.0  ;;  %v3856_v22 = vrot.slane %v3225_v41, %v7299_v21  ;;  %v4092_v43 = vsub.s32 %v4089_v3, %v5874_v42  ;;  %v4053_v18 = vsub.f32 0.0, %v4007_v62 }
 0x55d   :  { %4045 = vadd.xlane.f32.xlu0 %v4044_v59  ;;  %v3073_v54 = vpop.xlane.xlu0 %3072  ;;  %v4117_v28 = vadd.s32 4294967256, %v4918_v49 }
 0x55e   :  { %v3219_v52 = vadd.f32 %v3073_v54, %v8353_v15  ;;  %v3984_v13 = vsel %vm3875_vm10, %v3856_v22, %v3983_v4  ;;  %v4088_v50 = vrot.slane %v4053_v18, %v7299_v21  ;;  %v4113_v54 = vsub.s32 %v4110_v6, %v5874_v42 }
 0x55f   :  { %v3985_v9 = vsel %vm3877_vm12, %v3860_v12, %v3984_v13  ;;  %v4013_v19 = vpop.xlane.xlu1 %4012  ;;  %v4120_v15 = vsub.s32 %v4117_v28, %v5874_v42  ;;  %vm4122_vm10 = vcmask 392512   ;;  %v4141_v13 = vsub.s32 %v4138_v37, %v5874_v42 }
 0x560   :  { %v3832_v56 = vrot.slane %v3219_v52, %v7299_v21  ;;  %v3986_v57 = vsel %vm3879_vm14, %v3864_v0, %v3985_v9  ;;  %v4055_v59 = vsub.f32 0.0, %v4013_v19  ;;  %vm4129_vm12 = vcmask 458112  }
 0x561   :  { %v3076_v61 = vpop.xlane.xlu0 %3075  ;;  %v4173_v9 = vadd.s32 4294967192, %v4918_v49  ;;  %v4187_v18 = vadd.s32 4294967176, %v4918_v49 }
 0x562   :  { %v3220_v7 = vadd.f32 %v3076_v61, %v8355_v44  ;;  %v3979_v60 = vsel %vm3879_vm14, %v3832_v56, %v3978_v58  ;;  %v4100_v23 = vrot.slane %v4055_v59, %v4099_v38  ;;  %v4134_v56 = vsub.s32 %v4131_v10, %v5874_v42 }
 0x563   :  { %v4019_v46 = vpop.xlane.xlu1 %4018  ;;  %v4148_v58 = vsub.s32 %v4145_v53, %v5874_v42  ;;  %vm4136_vm14 = vcmask 523712  }
 0x564   :  { %v3836_v8 = vrot.slane %v3220_v7, %v7299_v21  ;;  %v4057_v22 = vsub.f32 0.0, %v4019_v46  ;;  %v4159_v7 = vadd.s32 4294967208, %v4918_v49 }
 0x565   :  { %v3100_v25 = vpop.xlane.xlu0 %3099 }
 0x566   :  { %v3228_v36 = vadd.f32 %v3100_v25, %v8357_v55  ;;  %v3980_v20 = vsel %vm3881_vm15, %v3836_v8, %v3979_v60  ;;  %v4114_v48 = vrot.slane %v4057_v22, %v4113_v54  ;;  %v4155_v60 = vsub.s32 %v4152_v33, %v5874_v42 }
 0x567   :  { %v4047_v11 = vsel %vm4004_vm0, %v3980_v20, 0.0  ;;  %v4166_v20 = vadd.s32 4294967200, %v4918_v49 }
 0x568   :  { %v3868_v32 = vrot.slane %v3228_v36, %v7299_v21  ;;  %4048 = vadd.xlane.f32.xlu1 %v4047_v11  ;;  %v4127_v21 = vsub.s32 %v4124_v26, %v5874_v42 }
 0x569   :  { %v4010_v27 = vpop.xlane.xlu0 %4009  ;;  %v4025_v17 = vpop.xlane.xlu1 %4024 }
 0x56a   :  { %v3987_v34 = vsel %vm3881_vm15, %v3868_v32, %v3986_v57  ;;  %v4054_v51 = vsub.f32 0.0, %v4010_v27  ;;  %v4059_v45 = vsub.f32 0.0, %v4025_v17  ;;  %v4162_v32 = vsub.s32 %v4159_v7, %v5874_v42 }
 0x56b   :  { %v4050_v1 = vsel %vm4004_vm0, %v3987_v34, 0.0  ;;  %vm4143_vm15 = vcmask 589312   ;;  %vm4150_vm0 = vcmask 654912  }
 0x56c   :  { %4051 = vadd.xlane.f32.xlu0 %v4050_v1  ;;  %v4093_v2 = vrot.slane %v4054_v51, %v4092_v43  ;;  %v4128_v34 = vrot.slane %v4059_v45, %v4127_v21  ;;  %v4169_v43 = vsub.s32 %v4166_v20, %v5874_v42  ;;  %v4176_v51 = vsub.s32 %v4173_v9, %v5874_v42 }
 0x56d   :  { %v4016_v63 = vpop.xlane.xlu0 %4015 }
 0x56e   :  { %v4056_v41 = vsub.f32 0.0, %v4016_v63  ;;  %v4095_v31 = vsel %vm4094_vm11, %v4093_v2, %v4088_v50  ;;  %v4180_v63 = vadd.s32 4294967184, %v4918_v49  ;;  %v4190_v50 = vsub.s32 %v4187_v18, %v5874_v42 }
 0x56f   :  { %v4102_v39 = vsel %vm4101_vm5, %v4100_v23, %v4095_v31 }
 0x570   :  { %v4107_v35 = vrot.slane %v4056_v41, %v4106_v24  ;;  %v4183_v2 = vsub.s32 %v4180_v63, %v5874_v42 }
 0x571   :  { %v4022_v47 = vpop.xlane.xlu0 %4021 }
 0x572   :  { %v4058_v52 = vsub.f32 0.0, %v4022_v47  ;;  %v4109_v61 = vsel %vm4108_vm6, %v4107_v35, %v4102_v39 }
 0x573   :  { %v4116_v55 = vsel %vm4115_vm7, %v4114_v48, %v4109_v61 }
 0x574   :  { %v4121_v5 = vrot.slane %v4058_v52, %v4120_v15 }
 0x576   :  { %v4123_v0 = vsel %vm4122_vm10, %v4121_v5, %v4116_v55 }
 0x577   :  { %v4130_v3 = vsel %vm4129_vm12, %v4128_v34, %v4123_v0 }
 0x5a1   :  { %v4028_v40 = vpop.xlane.xlu0 %4027 }
 0x5a2   :  { %v4060_v4 = vsub.f32 0.0, %v4028_v40 }
 0x5a4   :  { %v4135_v11 = vrot.slane %v4060_v4, %v4134_v56 }
 0x5a6   :  { %v4137_v30 = vsel %vm4136_vm14, %v4135_v11, %v4130_v3 }
 0x5b1   :  { %v4031_v16 = vpop.xlane.xlu1 %4030 }
 0x5b2   :  { %v4061_v12 = vsub.f32 0.0, %v4031_v16 }
 0x5b4   :  { %v4142_v1 = vrot.slane %v4061_v12, %v4141_v13 }
 0x5b6   :  { %v4144_v6 = vsel %vm4143_vm15, %v4142_v1, %v4137_v30 }
 0x5c1   :  { %v4034_v14 = vpop.xlane.xlu0 %4033 }
 0x5c2   :  { %v4062_v25 = vsub.f32 0.0, %v4034_v14 }
 0x5c4   :  { %v4149_v19 = vrot.slane %v4062_v25, %v4148_v58 }
 0x5c6   :  { %v4151_v41 = vsel %vm4150_vm0, %v4149_v19, %v4144_v6 }
 0x5d1   :  { %v4037_v44 = vpop.xlane.xlu1 %4036 }
 0x5d2   :  { %v4063_v36 = vsub.f32 0.0, %v4037_v44 }
 0x5d4   :  { %v4156_v46 = vrot.slane %v4063_v36, %v4155_v60 }
 0x5d6   :  { %v4158_v38 = vsel %vm4157_vm2, %v4156_v46, %v4151_v41 }
 0x5d7   :  { %v4043_v27 = vpop.xlane.xlu1 %4042 }
 0x5d8   :  { %v4065_v17 = vsub.f32 0.0, %v4043_v27 }
 0x5da   :  { %v4170_v26 = vrot.slane %v4065_v17, %v4169_v43 }
 0x5dd   :  { %v4040_v8 = vpop.xlane.xlu0 %4039 }
 0x5de   :  { %v4064_v57 = vsub.f32 0.0, %v4040_v8 }
 0x5e0   :  { %v4163_v29 = vrot.slane %v4064_v57, %v4162_v32 }
 0x5e2   :  { %v4165_v59 = vsel %vm4164_vm8, %v4163_v29, %v4158_v38 }
 0x5e3   :  { %v4172_v31 = vsel %vm4171_vm3, %v4170_v26, %v4165_v59 }
 0x5ea   :  { %v4046_v62 = vpop.xlane.xlu0 %4045 }
 0x5eb   :  { %v4066_v47 = vsub.f32 0.0, %v4046_v62 }
 0x5ed   :  { %v4177_v40 = vrot.slane %v4066_v47, %v4176_v51 }
 0x5ef   :  { %v4179_v15 = vsel %vm4178_vm9, %v4177_v40, %v4172_v31 }
 0x5f5   :  { %v4049_v24 = vpop.xlane.xlu1 %4048 }
 0x5f6   :  { %v4067_v28 = vsub.f32 0.0, %v4049_v24 }
 0x5f8   :  { %v4184_v54 = vrot.slane %v4067_v28, %v4183_v2 }
 0x5f9   :  { %v4052_v10 = vpop.xlane.xlu0 %4051 }
 0x5fa   :  { %v4068_v49 = vsub.f32 0.0, %v4052_v10  ;;  %v4186_v52 = vsel %vm4185_vm13, %v4184_v54, %v4179_v15 }
 0x5fc   :  { %v4191_v35 = vrot.slane %v4068_v49, %v4190_v50 }
 0x5fe   :  { %v4193_v16 = vsel %vm4192_vm4, %v4191_v35, %v4186_v52 }
 0x5ff   :  { %4195 = vst [vmem:[#allocation2] sm:$0x1] %v4193_v16 }
 0x600   :  { %4355 = shalt.err (!%p4352_p4)
}
 0x601   :  { %s4356_s25 = scalar_lea.hbm %s8029_s3, 16 }
 0x602   :  { %p4357_p5 = scmp.ne.s32.totalorder %s8029_s3, %s4356_s25  ;;  %p4360_p6 = scmp.lt.u32.totalorder %s4356_s25, %s8029_s3 }
 0x604   :  { %p4362_p7 = pnand %p4360_p6, %p4357_p5 }
 0x606   :  { %4365 = shalt.err (!%p4362_p7)
}
 0x607   :  { %4205 = dma.vmem_to_hbm [thread:$0]  %s4203_s20, 16, %s8029_s3, [#allocation3]  }
 0x608   :  { %4366 = dma.done.wait [#allocation3], 16  }
 0x609   :  { %4367 = vsyncadd [#allocation3], 4294967280 }
 0x60a   :  { %4209 = vsyncpa [#allocation3], 1 }

</bundles_post_ra>
